<compile_context>
chip_gen: v5e
topology: v5e:2x2
jax: 0.10.0
libtpu: 0.0.40
codegen_flags: <defaults>
</compile_context>

<pallas_src>
import functools

import jax
import jax.numpy as jnp
from jax.experimental import pallas as pl
from jax.experimental.pallas import tpu as pltpu

LANE = 128


def _round_up(x, m):
    return ((x + m - 1) // m) * m


def _default_vmem_limit():
    """~3/4 of physical VMEM (bigger tiles on 128-MiB v5e/v6e, safe on v7x's
    64 MiB), capped at 96 MiB; conservative 32 MiB if the query is missing."""
    try:
        cap = int(pltpu.get_tpu_info().vmem_capacity_bytes)
        return max(32 * 1024 * 1024, min(cap * 3 // 4, 96 * 1024 * 1024))
    except Exception:
        return 32 * 1024 * 1024


# ---------------------------------------------------------------------------
# Fused inverted-residual kernel (one grid step = one batch x one row tile)
# ---------------------------------------------------------------------------
def _inverted_residual_kernel(x_ref, *refs, stride, tile_rows, w_out,
                              h_pad, w_pad, has_expand, use_res, flat_out):
    if has_expand:
        ew_ref, eb_ref, dw_ref, db_ref, pw_ref, pb_ref, o_ref, hid_ref = refs
    else:
        dw_ref, db_ref, pw_ref, pb_ref, o_ref = refs

    i = pl.program_id(1)
    rows_in = (tile_rows - 1) * stride + 3            # input rows incl. halo
    row_start = pl.multiple_of(i * (tile_rows * stride), tile_rows * stride)
    c_hid = dw_ref.shape[-1]
    c_out = pw_ref.shape[-1]

    # ---- stage 1: 1x1 expand conv + folded BN + ReLU6 (hidden -> VMEM only)
    if has_expand:
        xt = x_ref[0, pl.ds(row_start, rows_in), :, :]   # (rows_in,w_pad,c_in)
        c_in = xt.shape[-1]
        # TODO(synk): stream this matmul into hid_ref in ~256-row slabs to cut
        # the full-size f32 transient (matters at real shapes on v7x).
        acc = jnp.dot(xt.reshape(rows_in * w_pad, c_in), ew_ref[...],
                      preferred_element_type=jnp.float32)
        hid = jnp.clip(acc + eb_ref[...], 0.0, 6.0).reshape(rows_in, w_pad,
                                                            c_hid)
        # Re-zero the 1-pixel padding ring of the *hidden* tensor (a 1x1 conv
        # on a zero pixel would give bias+ReLU6, not zero).  Cheap 2-D mask,
        # broadcast over channels, instead of a full-size 3-D iota pair.
        row_ids = (jax.lax.broadcasted_iota(jnp.int32, (rows_in, w_pad), 0)
                   + row_start)
        col_ids = jax.lax.broadcasted_iota(jnp.int32, (rows_in, w_pad), 1)
        interior = ((row_ids > 0) & (row_ids < h_pad - 1) &
                    (col_ids > 0) & (col_ids < w_pad - 1))
        hid = hid * interior.astype(jnp.float32)[:, :, None]
        hid_ref[...] = hid.astype(hid_ref.dtype)         # bf16 (s=1) / f32

        def dw_window(dh, dc):
            if stride == 1:
                return hid_ref[pl.ds(dh, tile_rows), pl.ds(dc, w_out), :]
            return hid_ref[pl.ds(dh, tile_rows, stride=stride),
                           pl.ds(dc, w_out, stride=stride), :]
    else:
        # expand_ratio == 1: the "hidden" tensor IS the padded input, so skip
        # the VMEM round trip and read the 9 depthwise windows straight from
        # x_ref (bf16), upcasting on use.
        def dw_window(dh, dc):
            if stride == 1:
                return x_ref[0, pl.ds(row_start + dh, tile_rows),
                             pl.ds(dc, w_out), :]
            return x_ref[0, pl.ds(row_start + dh, tile_rows, stride=stride),
                         pl.ds(dc, w_out, stride=stride), :]

    # ---- stage 2: 3x3 depthwise conv + folded BN + ReLU6 (f32 accumulation)
    dw = dw_ref[...].astype(jnp.float32)                 # (9, c_hid)
    taps = [dw[t:t + 1, :].reshape(1, 1, c_hid) for t in range(9)]  # hoisted
    acc = None
    for dh in range(3):
        for dc in range(3):
            term = dw_window(dh, dc).astype(jnp.float32) * taps[dh * 3 + dc]
            acc = term if acc is None else acc + term
    acc = acc + db_ref[...].reshape(1, 1, c_hid)
    p = jnp.clip(acc, 0.0, 6.0).astype(jnp.bfloat16)     # (th, w_out, c_hid)

    # ---- stage 3: 1x1 project conv + folded BN, residual fused into the store
    proj = jnp.dot(p.reshape(tile_rows * w_out, c_hid), pw_ref[...],
                   preferred_element_type=jnp.float32)
    proj = proj + pb_ref[...]
    if use_res:
        # TODO(synk): feed the residual through its own aligned
        # (1, th, w_out, c_in) BlockSpec instead of this sublane-offset read.
        res = x_ref[0, pl.ds(row_start + 1, tile_rows), pl.ds(1, w_out), :]
        proj = proj + res.astype(jnp.float32).reshape(tile_rows * w_out, c_out)
    if flat_out:
        # Lane-dense store: block is (1, th, w_out*c_out), so the writeback is
        # an unmasked, full-lane vst even when c_out < 128.
        o_ref[...] = proj.reshape(1, tile_rows,
                                  w_out * c_out).astype(o_ref.dtype)
    else:
        o_ref[...] = proj.reshape(1, tile_rows, w_out,
                                  c_out).astype(o_ref.dtype)


# ---------------------------------------------------------------------------
# Tile-size selection with full VMEM accounting (input, weights, hidden
# scratch + transients, double-buffered output).
# ---------------------------------------------------------------------------
def _pick_tile_rows(h_out, stride, h_pad, w_pad, w_out, c_in, c_hid, c_out,
                    weight_bytes, has_expand, hid_itemsize,
                    requested=None, vmem_limit_bytes=64 * 1024 * 1024):
    # Fixed costs: double-buffered whole-image padded input (bf16), weights
    # (counted double-buffered to stay conservative), and the halo rows of the
    # hidden scratch / expand-matmul f32 transients.
    fixed = 2 * h_pad * w_pad * c_in * 2 + 2 * weight_bytes
    hid_row = w_pad * c_hid
    per_hid_row = hid_row * hid_itemsize + (hid_row * 8 if has_expand else 0)
    fixed += (3 - stride) * per_hid_row
    # Per output row: hidden-scratch rows (+ f32 transients on the expand
    # path) and a double-buffered bf16 output row.
    per_row = stride * per_hid_row + 2 * w_out * c_out * 2
    budget = int(vmem_limit_bytes * 6 // 10) - fixed
    cap = max(1, budget // max(per_row, 1))
    if requested is not None:
        cap = min(cap, requested)
    cap = min(cap, h_out)
    # Prefer row tiles that are a multiple of 8 (or the whole output height)
    # so the lane-dense flattened output block keeps a legal (8,128) shape.
    # TODO(synk): switch to pl.cdiv tiling + masked tail tiles so prime h_out
    # (e.g. 7) does not collapse to 1-row tiles.
    best_any, best_aligned = 1, None
    for d in range(1, h_out + 1):
        if h_out % d != 0 or d > cap:
            continue
        best_any = d
        if d % 8 == 0 or d == h_out:
            best_aligned = d
    return best_aligned if best_aligned is not None else best_any


# ---------------------------------------------------------------------------
# Fused forward (NHWC). A full MobileNetV2 would stay NHWC end-to-end.
# ---------------------------------------------------------------------------
def inverted_residual_forward_nhwc(x_nhwc, params, stride, tile_rows=None):
    n, h, w, c_in = x_nhwc.shape
    has_expand = params["expand_ratio"] != 1
    c_hid = params["dw_w"].shape[-1]
    c_out = params["proj_w"].shape[-1]
    use_res = (stride == 1) and (c_in == c_out)

    x_bf16 = x_nhwc.astype(jnp.bfloat16)
    # Zero-pad only the (small) input once; the expand_ratio-times larger
    # hidden activation never leaves VMEM.
    xp = jnp.pad(x_bf16, ((0, 0), (1, 1), (1, 1), (0, 0)))
    h_pad, w_pad = h + 2, w + 2
    h_out = (h - 1) // stride + 1
    w_out = (w - 1) // stride + 1

    weight_keys = (["expand_w", "expand_b"] if has_expand else []) + \
                  ["dw_w", "dw_b", "proj_w", "proj_b"]
    weight_bytes = sum(int(params[k].size) * params[k].dtype.itemsize
                       for k in weight_keys)

    # bf16 hidden scratch for stride-1 blocks (contiguous window reads); keep
    # f32 for stride-2 so the strided sublane window reads stay on 32-bit.
    # TODO(synk): de-interleave even/odd columns of the hidden tensor at store
    # time so stride-2 blocks can also use a bf16 scratch + contiguous reads.
    hid_dtype = jnp.bfloat16 if stride == 1 else jnp.float32
    hid_itemsize = 2 if stride == 1 else 4

    vmem_limit = _default_vmem_limit()
    th = _pick_tile_rows(h_out, stride, h_pad, w_pad, w_out, c_in, c_hid,
                         c_out, weight_bytes, has_expand, hid_itemsize,
                         requested=tile_rows, vmem_limit_bytes=vmem_limit)
    n_tiles = h_out // th
    rows_in = (th - 1) * stride + 3
    # Lane-dense output blocks need a (mult-of-8, full-width) shape.
    flat_ok = (th % 8 == 0) or (th == h_out)

    m_out = n * h_out * w_out
    flops = 18 * m_out * c_hid + 2 * m_out * c_hid * c_out
    if has_expand:
        flops += 2 * n * n_tiles * rows_in * w_pad * c_in * c_hid
    bytes_accessed = (int(xp.size) * xp.dtype.itemsize + weight_bytes
                      + m_out * c_out * 2)
    cost = pl.CostEstimate(flops=int(flops), transcendentals=0,
                           bytes_accessed=int(bytes_accessed))

    scratch = ([pltpu.VMEM((rows_in, w_pad, c_hid), hid_dtype)]
               if has_expand else [])

    def build_and_run(flat_out, weight_buffering):
        kernel = functools.partial(
            _inverted_residual_kernel, stride=stride, tile_rows=th,
            w_out=w_out, h_pad=h_pad, w_pad=w_pad, has_expand=has_expand,
            use_res=use_res, flat_out=flat_out)

        in_specs = [pl.BlockSpec((1, h_pad, w_pad, c_in),
                                 lambda b, i: (b, 0, 0, 0))]
        inputs = [xp]
        for k in weight_keys:
            arr = params[k]
            if weight_buffering == "single":
                # Constant-index weights: single-buffer to save VMEM (v7x).
                spec = pl.BlockSpec(arr.shape, lambda b, i: (0, 0),
                                    pipeline_mode=pl.Buffered(buffer_count=1))
            else:
                spec = pl.BlockSpec(arr.shape, lambda b, i: (0, 0))
            in_specs.append(spec)
            inputs.append(arr)

        if flat_out:
            out_shape = jax.ShapeDtypeStruct((n, h_out, w_out * c_out),
                                             jnp.bfloat16)
            out_specs = pl.BlockSpec((1, th, w_out * c_out),
                                     lambda b, i: (b, i, 0))
        else:
            out_shape = jax.ShapeDtypeStruct((n, h_out, w_out, c_out),
                                             jnp.bfloat16)
            out_specs = pl.BlockSpec((1, th, w_out, c_out),
                                     lambda b, i: (b, i, 0, 0))

        # TODO(synk): for late 14x14 / 7x7 stages, block the batch dim >1 per
        # grid step so the flattened matmul M reaches >=256 (v6e/v7x MXU fill).
        out = pl.pallas_call(
            kernel,
            out_shape=out_shape,
            grid_spec=pltpu.PrefetchScalarGridSpec(
                num_scalar_prefetch=0,
                grid=(n, n_tiles),
                in_specs=in_specs,
                out_specs=out_specs,
                scratch_shapes=scratch),
            compiler_params=pltpu.CompilerParams(
                # Batch axis "parallel" so a v7x megacore split lands on the
                # batch (not row-tile) axis; row tiles run sequentially.
                dimension_semantics=("parallel", "arbitrary"),
                vmem_limit_bytes=vmem_limit),
            cost_estimate=cost,
        )(*inputs)
        return jax.block_until_ready(out)

    # Try the fastest configuration first; fall back to configurations that
    # are known-good on older jax/Mosaic if a feature is unsupported.
    if flat_ok:
        attempts = [(True, "single"), (True, "double"), (False, "double")]
    else:
        attempts = [(False, "single"), (False, "double")]
    out, last_err = None, None
    for flat_out, wbuf in attempts:
        try:
            out = build_and_run(flat_out, wbuf)
            break
        except Exception as e:      # feature fallback; never silences success
            last_err = e
    if out is None:
        raise last_err
    return out.reshape(n, h_out, w_out, c_out)


def inverted_residual_forward(x_nchw, params, stride, tile_rows=None):
    """PyTorch-layout (NCHW) wrapper, used only for parity testing."""
    x = jnp.transpose(x_nchw, (0, 2, 3, 1))
    y = inverted_residual_forward_nhwc(x, params, stride, tile_rows=tile_rows)
    return jnp.transpose(y, (0, 3, 1, 2))


# ---------------------------------------------------------------------------
# Parameter construction (deterministic) with BN folded into conv weights.
# Matmul weights stored in bf16; biases / depthwise weights in f32. The hidden
# channel dim is zero-padded to a multiple of 128 lanes (mathematical no-op).
# ---------------------------------------------------------------------------
def _bn_fold(key, c, eps=1e-5):
    k1, k2, k3, k4 = jax.random.split(key, 4)
    gamma = 1.0 + 0.1 * jax.random.normal(k1, (c,), jnp.float32)
    beta = 0.1 * jax.random.normal(k2, (c,), jnp.float32)
    mean = 0.1 * jax.random.normal(k3, (c,), jnp.float32)
    var = 1.0 + 0.1 * jnp.abs(jax.random.normal(k4, (c,), jnp.float32))
    scale = gamma / jnp.sqrt(var + eps)
    bias = beta - mean * scale
    return scale, bias


def make_inverted_residual_params(inp, oup, expand_ratio, key):
    hidden = int(round(inp * expand_ratio))
    hidden_p = _round_up(hidden, LANE) if expand_ratio != 1 else hidden
    ks = jax.random.split(key, 6)
    params = {"expand_ratio": expand_ratio}

    def pad_hid(a, axis):
        pads = [(0, 0)] * a.ndim
        pads[axis] = (0, hidden_p - hidden)
        return jnp.pad(a, pads)

    if expand_ratio != 1:
        w1 = 0.1 * jax.random.normal(ks[0], (inp, hidden), jnp.float32)
        s1, b1 = _bn_fold(ks[1], hidden)
        params["expand_w"] = pad_hid(w1 * s1[None, :], 1).astype(jnp.bfloat16)
        params["expand_b"] = pad_hid(b1, 0).reshape(1, hidden_p)
    wd = 0.1 * jax.random.normal(ks[2], (3, 3, hidden), jnp.float32)
    s2, b2 = _bn_fold(ks[3], hidden)
    params["dw_w"] = pad_hid((wd * s2[None, None, :]).reshape(9, hidden), 1)
    params["dw_b"] = pad_hid(b2, 0).reshape(1, hidden_p)
    w3 = 0.1 * jax.random.normal(ks[4], (hidden, oup), jnp.float32)
    s3, b3 = _bn_fold(ks[5], oup)
    params["proj_w"] = pad_hid(w3 * s3[None, :], 0).astype(jnp.bfloat16)
    params["proj_b"] = b3.reshape(1, oup)
    return params


# ---------------------------------------------------------------------------
# Pure-JAX reference (mirrors the kernel's bf16 storage / f32 accumulation;
# the hidden activation is bf16-rounded exactly where the kernel stores it in
# a bf16 VMEM scratch, i.e. for stride-1 blocks with expand_ratio != 1).
# ---------------------------------------------------------------------------
def reference_forward_nhwc(x_nhwc, params, stride):
    x = x_nhwc.astype(jnp.bfloat16).astype(jnp.float32)
    n, h, w, c_in = x.shape
    c_out = params["proj_w"].shape[-1]
    use_res = (stride == 1) and (c_in == c_out)
    hdn = x
    if params["expand_ratio"] != 1:
        we = params["expand_w"].astype(jnp.float32)
        hdn = jnp.einsum("nhwc,cd->nhwd", hdn, we) + params["expand_b"].reshape(-1)
        hdn = jnp.clip(hdn, 0.0, 6.0)
        if stride == 1:   # kernel stores the hidden activation in bf16 VMEM
            hdn = hdn.astype(jnp.bfloat16).astype(jnp.float32)
    c_hid = hdn.shape[-1]
    hp = jnp.pad(hdn, ((0, 0), (1, 1), (1, 1), (0, 0)))
    h_out = (h - 1) // stride + 1
    w_out = (w - 1) // stride + 1
    wd = params["dw_w"].astype(jnp.float32)
    acc = jnp.zeros((n, h_out, w_out, c_hid), jnp.float32)
    for dh in range(3):
        for dc in range(3):
            acc = acc + hp[:, dh:dh + h_out * stride:stride,
                              dc:dc + w_out * stride:stride, :] * wd[dh * 3 + dc]
    p = jnp.clip(acc + params["dw_b"].reshape(-1), 0.0, 6.0)
    p = p.astype(jnp.bfloat16).astype(jnp.float32)   # mirror pre-project downcast
    out = jnp.einsum("nhwc,cd->nhwd", p, params["proj_w"].astype(jnp.float32))
    out = out + params["proj_b"].reshape(-1)
    if use_res:
        out = out + x
    return out


def reference_forward(x_nchw, params, stride):
    x = jnp.transpose(x_nchw, (0, 2, 3, 1))
    y = reference_forward_nhwc(x, params, stride)
    return jnp.transpose(y, (0, 3, 1, 2))


if __name__ == "__main__":
    key = jax.random.PRNGKey(0)
    N = 2
    configs = [
        # (inp, oup, stride, expand) — residual path active (stride 1, inp==oup)
        dict(inp=8, oup=8, stride=1, expand=4, H=16, W=16, tile_rows=8),
        # stride-2 downsampling block, no residual
        dict(inp=8, oup=16, stride=2, expand=6, H=16, W=16, tile_rows=None),
        # expand_ratio == 1 (first MobileNetV2 bottleneck flavour)
        dict(inp=8, oup=8, stride=1, expand=1, H=16, W=16, tile_rows=None),
    ]
    for idx, cfg in enumerate(configs):
        kx, kp, key = jax.random.split(key, 3)
        x = jax.random.normal(kx, (N, cfg["inp"], cfg["H"], cfg["W"]),
                              jnp.float32)
        params = make_inverted_residual_params(cfg["inp"], cfg["oup"],
                                               cfg["expand"], kp)
        out = inverted_residual_forward(x, params, cfg["stride"],
                                        tile_rows=cfg["tile_rows"])
        out = jax.block_until_ready(out)
        ref = reference_forward(x, params, cfg["stride"])
        h_out = (cfg["H"] - 1) // cfg["stride"] + 1
        w_out = (cfg["W"] - 1) // cfg["stride"] + 1
        assert out.shape == (N, cfg["oup"], h_out, w_out), (idx, out.shape)
        out_f32 = out.astype(jnp.float32)
        err = float(jnp.max(jnp.abs(out_f32 - ref)))
        assert jnp.allclose(out_f32, ref, atol=2e-2, rtol=2e-2), (idx, err)
    print("KERNEL_OK")
</pallas_src>

<mosaic_0001>
module attributes {stable_mosaic.version = 11 : i64} {
  func.func @_inverted_residual_kernel(%arg0: i32, %arg1: i32, %arg2: memref<1x18x18x8xbf16, #tpu.memory_space<vmem>>, %arg3: memref<8x128xbf16, #tpu.memory_space<vmem>>, %arg4: memref<1x128xf32, #tpu.memory_space<vmem>>, %arg5: memref<9x128xf32, #tpu.memory_space<vmem>>, %arg6: memref<1x128xf32, #tpu.memory_space<vmem>>, %arg7: memref<128x8xbf16, #tpu.memory_space<vmem>>, %arg8: memref<1x8xf32, #tpu.memory_space<vmem>>, %arg9: memref<1x8x128xbf16, #tpu.memory_space<vmem>>, %arg10: memref<10x18x128xbf16, #tpu.memory_space<vmem>>) attributes {dimension_semantics = [#tpu.dimension_semantics<parallel>, #tpu.dimension_semantics<arbitrary>], iteration_bounds = array<i64: 2, 2>, scalar_prefetch = 0 : i64, scratch_operands = 1 : i64, tpu.core_type = #tpu.core_type<tc>, window_params = [{transform_indices = @transform_0, window_bounds = array<i64: 1, 18, 18, 8>}, {pipeline_mode = #tpu.pipeline_mode<synchronous>, transform_indices = @transform_1, window_bounds = array<i64: 8, 128>}, {pipeline_mode = #tpu.pipeline_mode<synchronous>, transform_indices = @transform_2, window_bounds = array<i64: 1, 128>}, {pipeline_mode = #tpu.pipeline_mode<synchronous>, transform_indices = @transform_3, window_bounds = array<i64: 9, 128>}, {pipeline_mode = #tpu.pipeline_mode<synchronous>, transform_indices = @transform_4, window_bounds = array<i64: 1, 128>}, {pipeline_mode = #tpu.pipeline_mode<synchronous>, transform_indices = @transform_5, window_bounds = array<i64: 128, 8>}, {pipeline_mode = #tpu.pipeline_mode<synchronous>, transform_indices = @transform_6, window_bounds = array<i64: 1, 8>}, {transform_indices = @transform_7, window_bounds = array<i64: 1, 8, 128>}]} {
    %c8_i32 = arith.constant 8 : i32
    %0 = arith.muli %arg1, %c8_i32 : i32
    %1 = tpu.assume_multiple %0, 8 : i32
    %c0 = arith.constant 0 : index
    %2 = arith.index_cast %1 : i32 to index
    %c0_0 = arith.constant 0 : index
    %c0_1 = arith.constant 0 : index
    %3 = vector.load %arg2[%c0, %2, %c0_0, %c0_1] : memref<1x18x18x8xbf16, #tpu.memory_space<vmem>>, vector<1x10x18x8xbf16>
    %4 = vector.shape_cast %3 : vector<1x10x18x8xbf16> to vector<10x18x8xbf16>
    %5 = vector.shape_cast %4 : vector<10x18x8xbf16> to vector<180x8xbf16>
    %c0_2 = arith.constant 0 : index
    %c0_3 = arith.constant 0 : index
    %6 = vector.load %arg3[%c0_2, %c0_3] : memref<8x128xbf16, #tpu.memory_space<vmem>>, vector<8x128xbf16>
    %cst = arith.constant dense<0.000000e+00> : vector<180x128xf32>
    %7 = tpu.matmul %5, %6, %cst {dimension_numbers = #tpu.dot_dimension_numbers<[1], [0], [0], [1], [0, 0, 1, 1], [], []>} : vector<180x8xbf16>, vector<8x128xbf16>, vector<180x128xf32> -> vector<180x128xf32>
    %c0_4 = arith.constant 0 : index
    %c0_5 = arith.constant 0 : index
    %8 = vector.load %arg4[%c0_4, %c0_5] : memref<1x128xf32, #tpu.memory_space<vmem>>, vector<1x128xf32>
    %9 = vector.broadcast %8 : vector<1x128xf32> to vector<180x128xf32>
    %10 = arith.addf %7, %9 : vector<180x128xf32>
    %cst_6 = arith.constant 0.000000e+00 : f32
    %cst_7 = arith.constant 6.000000e+00 : f32
    %11 = vector.broadcast %cst_6 : f32 to vector<180x128xf32>
    %12 = arith.maximumf %11, %10 : vector<180x128xf32>
    %13 = vector.broadcast %cst_7 : f32 to vector<180x128xf32>
    %14 = arith.minimumf %13, %12 : vector<180x128xf32>
    %15 = vector.shape_cast %14 : vector<180x128xf32> to vector<10x18x128xf32>
    %16 = tpu.iota {dimensions = array<i32: 0>} : vector<10x18xi32>
    %17 = vector.broadcast %1 : i32 to vector<10x18xi32>
    %18 = arith.addi %16, %17 : vector<10x18xi32>
    %19 = tpu.iota {dimensions = array<i32: 1>} : vector<10x18xi32>
    %c0_i32 = arith.constant 0 : i32
    %20 = vector.broadcast %c0_i32 : i32 to vector<10x18xi32>
    %21 = arith.cmpi sgt, %18, %20 : vector<10x18xi32>
    %c17_i32 = arith.constant 17 : i32
    %22 = vector.broadcast %c17_i32 : i32 to vector<10x18xi32>
    %23 = arith.cmpi slt, %18, %22 : vector<10x18xi32>
    %24 = arith.andi %21, %23 : vector<10x18xi1>
    %c0_i32_8 = arith.constant 0 : i32
    %25 = vector.broadcast %c0_i32_8 : i32 to vector<10x18xi32>
    %26 = arith.cmpi sgt, %19, %25 : vector<10x18xi32>
    %27 = arith.andi %24, %26 : vector<10x18xi1>
    %c17_i32_9 = arith.constant 17 : i32
    %28 = vector.broadcast %c17_i32_9 : i32 to vector<10x18xi32>
    %29 = arith.cmpi slt, %19, %28 : vector<10x18xi32>
    %30 = arith.andi %27, %29 : vector<10x18xi1>
    %31 = arith.extui %30 : vector<10x18xi1> to vector<10x18xi32>
    %32 = arith.sitofp %31 : vector<10x18xi32> to vector<10x18xf32>
    %33 = vector.shape_cast %32 : vector<10x18xf32> to vector<10x18x1xf32>
    %34 = vector.broadcast %33 : vector<10x18x1xf32> to vector<10x18x128xf32>
    %35 = arith.mulf %15, %34 : vector<10x18x128xf32>
    %36 = arith.truncf %35 : vector<10x18x128xf32> to vector<10x18x128xbf16>
    %c0_10 = arith.constant 0 : index
    %c0_11 = arith.constant 0 : index
    %c0_12 = arith.constant 0 : index
    %37 = vector.load %arg10[%c0_10, %c0_11, %c0_12] : memref<10x18x128xbf16, #tpu.memory_space<vmem>>, vector<10x18x128xbf16>
    tpu.vector_store %arg10[%c0_10, %c0_11, %c0_12], %36 {strides = array<i32>} : memref<10x18x128xbf16, #tpu.memory_space<vmem>>, vector<10x18x128xbf16>,
    %c0_13 = arith.constant 0 : index
    %c0_14 = arith.constant 0 : index
    %38 = vector.load %arg5[%c0_13, %c0_14] : memref<9x128xf32, #tpu.memory_space<vmem>>, vector<9x128xf32>
    %39 = vector.extract_strided_slice %38 {offsets = [0, 0], sizes = [1, 128], strides = [1, 1]} : vector<9x128xf32> to vector<1x128xf32>
    %40 = vector.shape_cast %39 : vector<1x128xf32> to vector<1x1x128xf32>
    %41 = vector.extract_strided_slice %38 {offsets = [1, 0], sizes = [1, 128], strides = [1, 1]} : vector<9x128xf32> to vector<1x128xf32>
    %42 = vector.shape_cast %41 : vector<1x128xf32> to vector<1x1x128xf32>
    %43 = vector.extract_strided_slice %38 {offsets = [2, 0], sizes = [1, 128], strides = [1, 1]} : vector<9x128xf32> to vector<1x128xf32>
    %44 = vector.shape_cast %43 : vector<1x128xf32> to vector<1x1x128xf32>
    %45 = vector.extract_strided_slice %38 {offsets = [3, 0], sizes = [1, 128], strides = [1, 1]} : vector<9x128xf32> to vector<1x128xf32>
    %46 = vector.shape_cast %45 : vector<1x128xf32> to vector<1x1x128xf32>
    %47 = vector.extract_strided_slice %38 {offsets = [4, 0], sizes = [1, 128], strides = [1, 1]} : vector<9x128xf32> to vector<1x128xf32>
    %48 = vector.shape_cast %47 : vector<1x128xf32> to vector<1x1x128xf32>
    %49 = vector.extract_strided_slice %38 {offsets = [5, 0], sizes = [1, 128], strides = [1, 1]} : vector<9x128xf32> to vector<1x128xf32>
    %50 = vector.shape_cast %49 : vector<1x128xf32> to vector<1x1x128xf32>
    %51 = vector.extract_strided_slice %38 {offsets = [6, 0], sizes = [1, 128], strides = [1, 1]} : vector<9x128xf32> to vector<1x128xf32>
    %52 = vector.shape_cast %51 : vector<1x128xf32> to vector<1x1x128xf32>
    %53 = vector.extract_strided_slice %38 {offsets = [7, 0], sizes = [1, 128], strides = [1, 1]} : vector<9x128xf32> to vector<1x128xf32>
    %54 = vector.shape_cast %53 : vector<1x128xf32> to vector<1x1x128xf32>
    %55 = vector.extract_strided_slice %38 {offsets = [8, 0], sizes = [1, 128], strides = [1, 1]} : vector<9x128xf32> to vector<1x128xf32>
    %56 = vector.shape_cast %55 : vector<1x128xf32> to vector<1x1x128xf32>
    %c0_15 = arith.constant 0 : index
    %c0_16 = arith.constant 0 : index
    %c0_17 = arith.constant 0 : index
    %57 = vector.load %arg10[%c0_15, %c0_16, %c0_17] : memref<10x18x128xbf16, #tpu.memory_space<vmem>>, vector<8x16x128xbf16>
    %58 = arith.extf %57 : vector<8x16x128xbf16> to vector<8x16x128xf32>
    %59 = vector.broadcast %40 : vector<1x1x128xf32> to vector<8x16x128xf32>
    %60 = arith.mulf %58, %59 : vector<8x16x128xf32>
    %c0_18 = arith.constant 0 : index
    %c1 = arith.constant 1 : index
    %c0_19 = arith.constant 0 : index
    %61 = vector.load %arg10[%c0_18, %c1, %c0_19] : memref<10x18x128xbf16, #tpu.memory_space<vmem>>, vector<8x16x128xbf16>
    %62 = arith.extf %61 : vector<8x16x128xbf16> to vector<8x16x128xf32>
    %63 = vector.broadcast %42 : vector<1x1x128xf32> to vector<8x16x128xf32>
    %64 = arith.mulf %62, %63 : vector<8x16x128xf32>
    %65 = arith.addf %60, %64 : vector<8x16x128xf32>
    %c0_20 = arith.constant 0 : index
    %c2 = arith.constant 2 : index
    %c0_21 = arith.constant 0 : index
    %66 = vector.load %arg10[%c0_20, %c2, %c0_21] : memref<10x18x128xbf16, #tpu.memory_space<vmem>>, vector<8x16x128xbf16>
    %67 = arith.extf %66 : vector<8x16x128xbf16> to vector<8x16x128xf32>
    %68 = vector.broadcast %44 : vector<1x1x128xf32> to vector<8x16x128xf32>
    %69 = arith.mulf %67, %68 : vector<8x16x128xf32>
    %70 = arith.addf %65, %69 : vector<8x16x128xf32>
    %c1_22 = arith.constant 1 : index
    %c0_23 = arith.constant 0 : index
    %c0_24 = arith.constant 0 : index
    %71 = vector.load %arg10[%c1_22, %c0_23, %c0_24] : memref<10x18x128xbf16, #tpu.memory_space<vmem>>, vector<8x16x128xbf16>
    %72 = arith.extf %71 : vector<8x16x128xbf16> to vector<8x16x128xf32>
    %73 = vector.broadcast %46 : vector<1x1x128xf32> to vector<8x16x128xf32>
    %74 = arith.mulf %72, %73 : vector<8x16x128xf32>
    %75 = arith.addf %70, %74 : vector<8x16x128xf32>
    %c1_25 = arith.constant 1 : index
    %c1_26 = arith.constant 1 : index
    %c0_27 = arith.constant 0 : index
    %76 = vector.load %arg10[%c1_25, %c1_26, %c0_27] : memref<10x18x128xbf16, #tpu.memory_space<vmem>>, vector<8x16x128xbf16>
    %77 = arith.extf %76 : vector<8x16x128xbf16> to vector<8x16x128xf32>
    %78 = vector.broadcast %48 : vector<1x1x128xf32> to vector<8x16x128xf32>
    %79 = arith.mulf %77, %78 : vector<8x16x128xf32>
    %80 = arith.addf %75, %79 : vector<8x16x128xf32>
    %c1_28 = arith.constant 1 : index
    %c2_29 = arith.constant 2 : index
    %c0_30 = arith.constant 0 : index
    %81 = vector.load %arg10[%c1_28, %c2_29, %c0_30] : memref<10x18x128xbf16, #tpu.memory_space<vmem>>, vector<8x16x128xbf16>
    %82 = arith.extf %81 : vector<8x16x128xbf16> to vector<8x16x128xf32>
    %83 = vector.broadcast %50 : vector<1x1x128xf32> to vector<8x16x128xf32>
    %84 = arith.mulf %82, %83 : vector<8x16x128xf32>
    %85 = arith.addf %80, %84 : vector<8x16x128xf32>
    %c2_31 = arith.constant 2 : index
    %c0_32 = arith.constant 0 : index
    %c0_33 = arith.constant 0 : index
    %86 = vector.load %arg10[%c2_31, %c0_32, %c0_33] : memref<10x18x128xbf16, #tpu.memory_space<vmem>>, vector<8x16x128xbf16>
    %87 = arith.extf %86 : vector<8x16x128xbf16> to vector<8x16x128xf32>
    %88 = vector.broadcast %52 : vector<1x1x128xf32> to vector<8x16x128xf32>
    %89 = arith.mulf %87, %88 : vector<8x16x128xf32>
    %90 = arith.addf %85, %89 : vector<8x16x128xf32>
    %c2_34 = arith.constant 2 : index
    %c1_35 = arith.constant 1 : index
    %c0_36 = arith.constant 0 : index
    %91 = vector.load %arg10[%c2_34, %c1_35, %c0_36] : memref<10x18x128xbf16, #tpu.memory_space<vmem>>, vector<8x16x128xbf16>
    %92 = arith.extf %91 : vector<8x16x128xbf16> to vector<8x16x128xf32>
    %93 = vector.broadcast %54 : vector<1x1x128xf32> to vector<8x16x128xf32>
    %94 = arith.mulf %92, %93 : vector<8x16x128xf32>
    %95 = arith.addf %90, %94 : vector<8x16x128xf32>
    %c2_37 = arith.constant 2 : index
    %c2_38 = arith.constant 2 : index
    %c0_39 = arith.constant 0 : index
    %96 = vector.load %arg10[%c2_37, %c2_38, %c0_39] : memref<10x18x128xbf16, #tpu.memory_space<vmem>>, vector<8x16x128xbf16>
    %97 = arith.extf %96 : vector<8x16x128xbf16> to vector<8x16x128xf32>
    %98 = vector.broadcast %56 : vector<1x1x128xf32> to vector<8x16x128xf32>
    %99 = arith.mulf %97, %98 : vector<8x16x128xf32>
    %100 = arith.addf %95, %99 : vector<8x16x128xf32>
    %c0_40 = arith.constant 0 : index
    %c0_41 = arith.constant 0 : index
    %101 = vector.load %arg6[%c0_40, %c0_41] : memref<1x128xf32, #tpu.memory_space<vmem>>, vector<1x128xf32>
    %102 = vector.shape_cast %101 : vector<1x128xf32> to vector<1x1x128xf32>
    %103 = vector.broadcast %102 : vector<1x1x128xf32> to vector<8x16x128xf32>
    %104 = arith.addf %100, %103 : vector<8x16x128xf32>
    %cst_42 = arith.constant 0.000000e+00 : f32
    %cst_43 = arith.constant 6.000000e+00 : f32
    %105 = vector.broadcast %cst_42 : f32 to vector<8x16x128xf32>
    %106 = arith.maximumf %105, %104 : vector<8x16x128xf32>
    %107 = vector.broadcast %cst_43 : f32 to vector<8x16x128xf32>
    %108 = arith.minimumf %107, %106 : vector<8x16x128xf32>
    %109 = arith.truncf %108 : vector<8x16x128xf32> to vector<8x16x128xbf16>
    %110 = vector.shape_cast %109 : vector<8x16x128xbf16> to vector<128x128xbf16>
    %c0_44 = arith.constant 0 : index
    %c0_45 = arith.constant 0 : index
    %111 = vector.load %arg7[%c0_44, %c0_45] : memref<128x8xbf16, #tpu.memory_space<vmem>>, vector<128x8xbf16>
    %cst_46 = arith.constant dense<0.000000e+00> : vector<128x8xf32>
    %112 = tpu.matmul %110, %111, %cst_46 {dimension_numbers = #tpu.dot_dimension_numbers<[1], [0], [0], [1], [0, 0, 1, 1], [], []>} : vector<128x128xbf16>, vector<128x8xbf16>, vector<128x8xf32> -> vector<128x8xf32>
    %c0_47 = arith.constant 0 : index
    %c0_48 = arith.constant 0 : index
    %113 = vector.load %arg8[%c0_47, %c0_48] : memref<1x8xf32, #tpu.memory_space<vmem>>, vector<1x8xf32>
    %114 = vector.broadcast %113 : vector<1x8xf32> to vector<128x8xf32>
    %115 = arith.addf %112, %114 : vector<128x8xf32>
    %c1_i32 = arith.constant 1 : i32
    %116 = arith.addi %1, %c1_i32 : i32
    %c0_49 = arith.constant 0 : index
    %117 = arith.index_cast %116 : i32 to index
    %c1_50 = arith.constant 1 : index
    %c0_51 = arith.constant 0 : index
    %118 = vector.load %arg2[%c0_49, %117, %c1_50, %c0_51] : memref<1x18x18x8xbf16, #tpu.memory_space<vmem>>, vector<1x8x16x8xbf16>
    %119 = vector.shape_cast %118 : vector<1x8x16x8xbf16> to vector<8x16x8xbf16>
    %120 = arith.extf %119 : vector<8x16x8xbf16> to vector<8x16x8xf32>
    %121 = vector.shape_cast %120 : vector<8x16x8xf32> to vector<128x8xf32>
    %122 = arith.addf %115, %121 : vector<128x8xf32>
    %123 = vector.shape_cast %122 : vector<128x8xf32> to vector<1x8x128xf32>
    %124 = arith.truncf %123 : vector<1x8x128xf32> to vector<1x8x128xbf16>
    %c0_52 = arith.constant 0 : index
    %c0_53 = arith.constant 0 : index
    %c0_54 = arith.constant 0 : index
    %125 = vector.load %arg9[%c0_52, %c0_53, %c0_54] : memref<1x8x128xbf16, #tpu.memory_space<vmem>>, vector<1x8x128xbf16>
    tpu.vector_store %arg9[%c0_52, %c0_53, %c0_54], %124 {strides = array<i32>} : memref<1x8x128xbf16, #tpu.memory_space<vmem>>, vector<1x8x128xbf16>,
    return
  }
  func.func @transform_0(%arg0: i32, %arg1: i32) -> (i32, i32, i32, i32) {
    %c0_i32 = arith.constant 0 : i32
    %c0_i32_0 = arith.constant 0 : i32
    %c0_i32_1 = arith.constant 0 : i32
    %c0_i32_2 = arith.constant 0 : i32
    return %arg0, %c0_i32, %c0_i32_0, %c0_i32_1 : i32, i32, i32, i32
  }
  func.func @transform_1(%arg0: i32, %arg1: i32) -> (i32, i32) {
    %c0_i32 = arith.constant 0 : i32
    %c0_i32_0 = arith.constant 0 : i32
    %c0_i32_1 = arith.constant 0 : i32
    return %c0_i32, %c0_i32_0 : i32, i32
  }
  func.func @transform_2(%arg0: i32, %arg1: i32) -> (i32, i32) {
    %c0_i32 = arith.constant 0 : i32
    %c0_i32_0 = arith.constant 0 : i32
    %c0_i32_1 = arith.constant 0 : i32
    return %c0_i32, %c0_i32_0 : i32, i32
  }
  func.func @transform_3(%arg0: i32, %arg1: i32) -> (i32, i32) {
    %c0_i32 = arith.constant 0 : i32
    %c0_i32_0 = arith.constant 0 : i32
    %c0_i32_1 = arith.constant 0 : i32
    return %c0_i32, %c0_i32_0 : i32, i32
  }
  func.func @transform_4(%arg0: i32, %arg1: i32) -> (i32, i32) {
    %c0_i32 = arith.constant 0 : i32
    %c0_i32_0 = arith.constant 0 : i32
    %c0_i32_1 = arith.constant 0 : i32
    return %c0_i32, %c0_i32_0 : i32, i32
  }
  func.func @transform_5(%arg0: i32, %arg1: i32) -> (i32, i32) {
    %c0_i32 = arith.constant 0 : i32
    %c0_i32_0 = arith.constant 0 : i32
    %c0_i32_1 = arith.constant 0 : i32
    return %c0_i32, %c0_i32_0 : i32, i32
  }
  func.func @transform_6(%arg0: i32, %arg1: i32) -> (i32, i32) {
    %c0_i32 = arith.constant 0 : i32
    %c0_i32_0 = arith.constant 0 : i32
    %c0_i32_1 = arith.constant 0 : i32
    return %c0_i32, %c0_i32_0 : i32, i32
  }
  func.func @transform_7(%arg0: i32, %arg1: i32) -> (i32, i32, i32) {
    %c0_i32 = arith.constant 0 : i32
    %c0_i32_0 = arith.constant 0 : i32
    return %arg0, %arg1, %c0_i32 : i32, i32, i32
  }
}

module attributes {stable_mosaic.version = 11 : i64} {
  func.func @_inverted_residual_kernel(%arg0: i32, %arg1: i32, %arg2: memref<1x18x18x8xbf16, #tpu.memory_space<vmem>>, %arg3: memref<8x128xbf16, #tpu.memory_space<vmem>>, %arg4: memref<1x128xf32, #tpu.memory_space<vmem>>, %arg5: memref<9x128xf32, #tpu.memory_space<vmem>>, %arg6: memref<1x128xf32, #tpu.memory_space<vmem>>, %arg7: memref<128x8xbf16, #tpu.memory_space<vmem>>, %arg8: memref<1x8xf32, #tpu.memory_space<vmem>>, %arg9: memref<1x8x128xbf16, #tpu.memory_space<vmem>>, %arg10: memref<10x18x128xbf16, #tpu.memory_space<vmem>>) attributes {dimension_semantics = [#tpu.dimension_semantics<parallel>, #tpu.dimension_semantics<arbitrary>], iteration_bounds = array<i64: 2, 2>, scalar_prefetch = 0 : i64, scratch_operands = 1 : i64, tpu.core_type = #tpu.core_type<tc>, window_params = [{transform_indices = @transform_0, window_bounds = array<i64: 1, 18, 18, 8>}, {pipeline_mode = #tpu.pipeline_mode<synchronous>, transform_indices = @transform_1, window_bounds = array<i64: 8, 128>}, {pipeline_mode = #tpu.pipeline_mode<synchronous>, transform_indices = @transform_2, window_bounds = array<i64: 1, 128>}, {pipeline_mode = #tpu.pipeline_mode<synchronous>, transform_indices = @transform_3, window_bounds = array<i64: 9, 128>}, {pipeline_mode = #tpu.pipeline_mode<synchronous>, transform_indices = @transform_4, window_bounds = array<i64: 1, 128>}, {pipeline_mode = #tpu.pipeline_mode<synchronous>, transform_indices = @transform_5, window_bounds = array<i64: 128, 8>}, {pipeline_mode = #tpu.pipeline_mode<synchronous>, transform_indices = @transform_6, window_bounds = array<i64: 1, 8>}, {transform_indices = @transform_7, window_bounds = array<i64: 1, 8, 128>}]} {
    %c8_i32 = arith.constant 8 : i32
    %0 = arith.muli %arg1, %c8_i32 : i32
    %1 = tpu.assume_multiple %0, 8 : i32
    %c0 = arith.constant 0 : index
    %2 = arith.index_cast %1 : i32 to index
    %c0_0 = arith.constant 0 : index
    %c0_1 = arith.constant 0 : index
    %3 = vector.load %arg2[%c0, %2, %c0_0, %c0_1] : memref<1x18x18x8xbf16, #tpu.memory_space<vmem>>, vector<1x10x18x8xbf16>
    %4 = vector.shape_cast %3 : vector<1x10x18x8xbf16> to vector<10x18x8xbf16>
    %5 = vector.shape_cast %4 : vector<10x18x8xbf16> to vector<180x8xbf16>
    %c0_2 = arith.constant 0 : index
    %c0_3 = arith.constant 0 : index
    %6 = vector.load %arg3[%c0_2, %c0_3] : memref<8x128xbf16, #tpu.memory_space<vmem>>, vector<8x128xbf16>
    %cst = arith.constant dense<0.000000e+00> : vector<180x128xf32>
    %7 = tpu.matmul %5, %6, %cst {dimension_numbers = #tpu.dot_dimension_numbers<[1], [0], [0], [1], [0, 0, 1, 1], [], []>} : vector<180x8xbf16>, vector<8x128xbf16>, vector<180x128xf32> -> vector<180x128xf32>
    %c0_4 = arith.constant 0 : index
    %c0_5 = arith.constant 0 : index
    %8 = vector.load %arg4[%c0_4, %c0_5] : memref<1x128xf32, #tpu.memory_space<vmem>>, vector<1x128xf32>
    %9 = vector.broadcast %8 : vector<1x128xf32> to vector<180x128xf32>
    %10 = arith.addf %7, %9 : vector<180x128xf32>
    %cst_6 = arith.constant 0.000000e+00 : f32
    %cst_7 = arith.constant 6.000000e+00 : f32
    %11 = vector.broadcast %cst_6 : f32 to vector<180x128xf32>
    %12 = arith.maximumf %11, %10 : vector<180x128xf32>
    %13 = vector.broadcast %cst_7 : f32 to vector<180x128xf32>
    %14 = arith.minimumf %13, %12 : vector<180x128xf32>
    %15 = vector.shape_cast %14 : vector<180x128xf32> to vector<10x18x128xf32>
    %16 = tpu.iota {dimensions = array<i32: 0>} : vector<10x18xi32>
    %17 = vector.broadcast %1 : i32 to vector<10x18xi32>
    %18 = arith.addi %16, %17 : vector<10x18xi32>
    %19 = tpu.iota {dimensions = array<i32: 1>} : vector<10x18xi32>
    %c0_i32 = arith.constant 0 : i32
    %20 = vector.broadcast %c0_i32 : i32 to vector<10x18xi32>
    %21 = arith.cmpi sgt, %18, %20 : vector<10x18xi32>
    %c17_i32 = arith.constant 17 : i32
    %22 = vector.broadcast %c17_i32 : i32 to vector<10x18xi32>
    %23 = arith.cmpi slt, %18, %22 : vector<10x18xi32>
    %24 = arith.andi %21, %23 : vector<10x18xi1>
    %c0_i32_8 = arith.constant 0 : i32
    %25 = vector.broadcast %c0_i32_8 : i32 to vector<10x18xi32>
    %26 = arith.cmpi sgt, %19, %25 : vector<10x18xi32>
    %27 = arith.andi %24, %26 : vector<10x18xi1>
    %c17_i32_9 = arith.constant 17 : i32
    %28 = vector.broadcast %c17_i32_9 : i32 to vector<10x18xi32>
    %29 = arith.cmpi slt, %19, %28 : vector<10x18xi32>
    %30 = arith.andi %27, %29 : vector<10x18xi1>
    %31 = arith.extui %30 : vector<10x18xi1> to vector<10x18xi32>
    %32 = arith.sitofp %31 : vector<10x18xi32> to vector<10x18xf32>
    %33 = vector.shape_cast %32 : vector<10x18xf32> to vector<10x18x1xf32>
    %34 = vector.broadcast %33 : vector<10x18x1xf32> to vector<10x18x128xf32>
    %35 = arith.mulf %15, %34 : vector<10x18x128xf32>
    %36 = arith.truncf %35 : vector<10x18x128xf32> to vector<10x18x128xbf16>
    %c0_10 = arith.constant 0 : index
    %c0_11 = arith.constant 0 : index
    %c0_12 = arith.constant 0 : index
    %37 = vector.load %arg10[%c0_10, %c0_11, %c0_12] : memref<10x18x128xbf16, #tpu.memory_space<vmem>>, vector<10x18x128xbf16>
    tpu.vector_store %arg10[%c0_10, %c0_11, %c0_12], %36 {strides = array<i32>} : memref<10x18x128xbf16, #tpu.memory_space<vmem>>, vector<10x18x128xbf16>,
    %c0_13 = arith.constant 0 : index
    %c0_14 = arith.constant 0 : index
    %38 = vector.load %arg5[%c0_13, %c0_14] : memref<9x128xf32, #tpu.memory_space<vmem>>, vector<9x128xf32>
    %39 = vector.extract_strided_slice %38 {offsets = [0, 0], sizes = [1, 128], strides = [1, 1]} : vector<9x128xf32> to vector<1x128xf32>
    %40 = vector.shape_cast %39 : vector<1x128xf32> to vector<1x1x128xf32>
    %41 = vector.extract_strided_slice %38 {offsets = [1, 0], sizes = [1, 128], strides = [1, 1]} : vector<9x128xf32> to vector<1x128xf32>
    %42 = vector.shape_cast %41 : vector<1x128xf32> to vector<1x1x128xf32>
    %43 = vector.extract_strided_slice %38 {offsets = [2, 0], sizes = [1, 128], strides = [1, 1]} : vector<9x128xf32> to vector<1x128xf32>
    %44 = vector.shape_cast %43 : vector<1x128xf32> to vector<1x1x128xf32>
    %45 = vector.extract_strided_slice %38 {offsets = [3, 0], sizes = [1, 128], strides = [1, 1]} : vector<9x128xf32> to vector<1x128xf32>
    %46 = vector.shape_cast %45 : vector<1x128xf32> to vector<1x1x128xf32>
    %47 = vector.extract_strided_slice %38 {offsets = [4, 0], sizes = [1, 128], strides = [1, 1]} : vector<9x128xf32> to vector<1x128xf32>
    %48 = vector.shape_cast %47 : vector<1x128xf32> to vector<1x1x128xf32>
    %49 = vector.extract_strided_slice %38 {offsets = [5, 0], sizes = [1, 128], strides = [1, 1]} : vector<9x128xf32> to vector<1x128xf32>
    %50 = vector.shape_cast %49 : vector<1x128xf32> to vector<1x1x128xf32>
    %51 = vector.extract_strided_slice %38 {offsets = [6, 0], sizes = [1, 128], strides = [1, 1]} : vector<9x128xf32> to vector<1x128xf32>
    %52 = vector.shape_cast %51 : vector<1x128xf32> to vector<1x1x128xf32>
    %53 = vector.extract_strided_slice %38 {offsets = [7, 0], sizes = [1, 128], strides = [1, 1]} : vector<9x128xf32> to vector<1x128xf32>
    %54 = vector.shape_cast %53 : vector<1x128xf32> to vector<1x1x128xf32>
    %55 = vector.extract_strided_slice %38 {offsets = [8, 0], sizes = [1, 128], strides = [1, 1]} : vector<9x128xf32> to vector<1x128xf32>
    %56 = vector.shape_cast %55 : vector<1x128xf32> to vector<1x1x128xf32>
    %c0_15 = arith.constant 0 : index
    %c0_16 = arith.constant 0 : index
    %c0_17 = arith.constant 0 : index
    %57 = vector.load %arg10[%c0_15, %c0_16, %c0_17] : memref<10x18x128xbf16, #tpu.memory_space<vmem>>, vector<8x16x128xbf16>
    %58 = arith.extf %57 : vector<8x16x128xbf16> to vector<8x16x128xf32>
    %59 = vector.broadcast %40 : vector<1x1x128xf32> to vector<8x16x128xf32>
    %60 = arith.mulf %58, %59 : vector<8x16x128xf32>
    %c0_18 = arith.constant 0 : index
    %c1 = arith.constant 1 : index
    %c0_19 = arith.constant 0 : index
    %61 = vector.load %arg10[%c0_18, %c1, %c0_19] : memref<10x18x128xbf16, #tpu.memory_space<vmem>>, vector<8x16x128xbf16>
    %62 = arith.extf %61 : vector<8x16x128xbf16> to vector<8x16x128xf32>
    %63 = vector.broadcast %42 : vector<1x1x128xf32> to vector<8x16x128xf32>
    %64 = arith.mulf %62, %63 : vector<8x16x128xf32>
    %65 = arith.addf %60, %64 : vector<8x16x128xf32>
    %c0_20 = arith.constant 0 : index
    %c2 = arith.constant 2 : index
    %c0_21 = arith.constant 0 : index
    %66 = vector.load %arg10[%c0_20, %c2, %c0_21] : memref<10x18x128xbf16, #tpu.memory_space<vmem>>, vector<8x16x128xbf16>
    %67 = arith.extf %66 : vector<8x16x128xbf16> to vector<8x16x128xf32>
    %68 = vector.broadcast %44 : vector<1x1x128xf32> to vector<8x16x128xf32>
    %69 = arith.mulf %67, %68 : vector<8x16x128xf32>
    %70 = arith.addf %65, %69 : vector<8x16x128xf32>
    %c1_22 = arith.constant 1 : index
    %c0_23 = arith.constant 0 : index
    %c0_24 = arith.constant 0 : index
    %71 = vector.load %arg10[%c1_22, %c0_23, %c0_24] : memref<10x18x128xbf16, #tpu.memory_space<vmem>>, vector<8x16x128xbf16>
    %72 = arith.extf %71 : vector<8x16x128xbf16> to vector<8x16x128xf32>
    %73 = vector.broadcast %46 : vector<1x1x128xf32> to vector<8x16x128xf32>
    %74 = arith.mulf %72, %73 : vector<8x16x128xf32>
    %75 = arith.addf %70, %74 : vector<8x16x128xf32>
    %c1_25 = arith.constant 1 : index
    %c1_26 = arith.constant 1 : index
    %c0_27 = arith.constant 0 : index
    %76 = vector.load %arg10[%c1_25, %c1_26, %c0_27] : memref<10x18x128xbf16, #tpu.memory_space<vmem>>, vector<8x16x128xbf16>
    %77 = arith.extf %76 : vector<8x16x128xbf16> to vector<8x16x128xf32>
    %78 = vector.broadcast %48 : vector<1x1x128xf32> to vector<8x16x128xf32>
    %79 = arith.mulf %77, %78 : vector<8x16x128xf32>
    %80 = arith.addf %75, %79 : vector<8x16x128xf32>
    %c1_28 = arith.constant 1 : index
    %c2_29 = arith.constant 2 : index
    %c0_30 = arith.constant 0 : index
    %81 = vector.load %arg10[%c1_28, %c2_29, %c0_30] : memref<10x18x128xbf16, #tpu.memory_space<vmem>>, vector<8x16x128xbf16>
    %82 = arith.extf %81 : vector<8x16x128xbf16> to vector<8x16x128xf32>
    %83 = vector.broadcast %50 : vector<1x1x128xf32> to vector<8x16x128xf32>
    %84 = arith.mulf %82, %83 : vector<8x16x128xf32>
    %85 = arith.addf %80, %84 : vector<8x16x128xf32>
    %c2_31 = arith.constant 2 : index
    %c0_32 = arith.constant 0 : index
    %c0_33 = arith.constant 0 : index
    %86 = vector.load %arg10[%c2_31, %c0_32, %c0_33] : memref<10x18x128xbf16, #tpu.memory_space<vmem>>, vector<8x16x128xbf16>
    %87 = arith.extf %86 : vector<8x16x128xbf16> to vector<8x16x128xf32>
    %88 = vector.broadcast %52 : vector<1x1x128xf32> to vector<8x16x128xf32>
    %89 = arith.mulf %87, %88 : vector<8x16x128xf32>
    %90 = arith.addf %85, %89 : vector<8x16x128xf32>
    %c2_34 = arith.constant 2 : index
    %c1_35 = arith.constant 1 : index
    %c0_36 = arith.constant 0 : index
    %91 = vector.load %arg10[%c2_34, %c1_35, %c0_36] : memref<10x18x128xbf16, #tpu.memory_space<vmem>>, vector<8x16x128xbf16>
    %92 = arith.extf %91 : vector<8x16x128xbf16> to vector<8x16x128xf32>
    %93 = vector.broadcast %54 : vector<1x1x128xf32> to vector<8x16x128xf32>
    %94 = arith.mulf %92, %93 : vector<8x16x128xf32>
    %95 = arith.addf %90, %94 : vector<8x16x128xf32>
    %c2_37 = arith.constant 2 : index
    %c2_38 = arith.constant 2 : index
    %c0_39 = arith.constant 0 : index
    %96 = vector.load %arg10[%c2_37, %c2_38, %c0_39] : memref<10x18x128xbf16, #tpu.memory_space<vmem>>, vector<8x16x128xbf16>
    %97 = arith.extf %96 : vector<8x16x128xbf16> to vector<8x16x128xf32>
    %98 = vector.broadcast %56 : vector<1x1x128xf32> to vector<8x16x128xf32>
    %99 = arith.mulf %97, %98 : vector<8x16x128xf32>
    %100 = arith.addf %95, %99 : vector<8x16x128xf32>
    %c0_40 = arith.constant 0 : index
    %c0_41 = arith.constant 0 : index
    %101 = vector.load %arg6[%c0_40, %c0_41] : memref<1x128xf32, #tpu.memory_space<vmem>>, vector<1x128xf32>
    %102 = vector.shape_cast %101 : vector<1x128xf32> to vector<1x1x128xf32>
    %103 = vector.broadcast %102 : vector<1x1x128xf32> to vector<8x16x128xf32>
    %104 = arith.addf %100, %103 : vector<8x16x128xf32>
    %cst_42 = arith.constant 0.000000e+00 : f32
    %cst_43 = arith.constant 6.000000e+00 : f32
    %105 = vector.broadcast %cst_42 : f32 to vector<8x16x128xf32>
    %106 = arith.maximumf %105, %104 : vector<8x16x128xf32>
    %107 = vector.broadcast %cst_43 : f32 to vector<8x16x128xf32>
    %108 = arith.minimumf %107, %106 : vector<8x16x128xf32>
    %109 = arith.truncf %108 : vector<8x16x128xf32> to vector<8x16x128xbf16>
    %110 = vector.shape_cast %109 : vector<8x16x128xbf16> to vector<128x128xbf16>
    %c0_44 = arith.constant 0 : index
    %c0_45 = arith.constant 0 : index
    %111 = vector.load %arg7[%c0_44, %c0_45] : memref<128x8xbf16, #tpu.memory_space<vmem>>, vector<128x8xbf16>
    %cst_46 = arith.constant dense<0.000000e+00> : vector<128x8xf32>
    %112 = tpu.matmul %110, %111, %cst_46 {dimension_numbers = #tpu.dot_dimension_numbers<[1], [0], [0], [1], [0, 0, 1, 1], [], []>} : vector<128x128xbf16>, vector<128x8xbf16>, vector<128x8xf32> -> vector<128x8xf32>
    %c0_47 = arith.constant 0 : index
    %c0_48 = arith.constant 0 : index
    %113 = vector.load %arg8[%c0_47, %c0_48] : memref<1x8xf32, #tpu.memory_space<vmem>>, vector<1x8xf32>
    %114 = vector.broadcast %113 : vector<1x8xf32> to vector<128x8xf32>
    %115 = arith.addf %112, %114 : vector<128x8xf32>
    %c1_i32 = arith.constant 1 : i32
    %116 = arith.addi %1, %c1_i32 : i32
    %c0_49 = arith.constant 0 : index
    %117 = arith.index_cast %116 : i32 to index
    %c1_50 = arith.constant 1 : index
    %c0_51 = arith.constant 0 : index
    %118 = vector.load %arg2[%c0_49, %117, %c1_50, %c0_51] : memref<1x18x18x8xbf16, #tpu.memory_space<vmem>>, vector<1x8x16x8xbf16>
    %119 = vector.shape_cast %118 : vector<1x8x16x8xbf16> to vector<8x16x8xbf16>
    %120 = arith.extf %119 : vector<8x16x8xbf16> to vector<8x16x8xf32>
    %121 = vector.shape_cast %120 : vector<8x16x8xf32> to vector<128x8xf32>
    %122 = arith.addf %115, %121 : vector<128x8xf32>
    %123 = vector.shape_cast %122 : vector<128x8xf32> to vector<1x8x128xf32>
    %124 = arith.truncf %123 : vector<1x8x128xf32> to vector<1x8x128xbf16>
    %c0_52 = arith.constant 0 : index
    %c0_53 = arith.constant 0 : index
    %c0_54 = arith.constant 0 : index
    %125 = vector.load %arg9[%c0_52, %c0_53, %c0_54] : memref<1x8x128xbf16, #tpu.memory_space<vmem>>, vector<1x8x128xbf16>
    tpu.vector_store %arg9[%c0_52, %c0_53, %c0_54], %124 {strides = array<i32>} : memref<1x8x128xbf16, #tpu.memory_space<vmem>>, vector<1x8x128xbf16>,
    return
  }
  func.func @transform_0(%arg0: i32, %arg1: i32) -> (i32, i32, i32, i32) {
    %c0_i32 = arith.constant 0 : i32
    %c0_i32_0 = arith.constant 0 : i32
    %c0_i32_1 = arith.constant 0 : i32
    %c0_i32_2 = arith.constant 0 : i32
    return %arg0, %c0_i32, %c0_i32_0, %c0_i32_1 : i32, i32, i32, i32
  }
  func.func @transform_1(%arg0: i32, %arg1: i32) -> (i32, i32) {
    %c0_i32 = arith.constant 0 : i32
    %c0_i32_0 = arith.constant 0 : i32
    %c0_i32_1 = arith.constant 0 : i32
    return %c0_i32, %c0_i32_0 : i32, i32
  }
  func.func @transform_2(%arg0: i32, %arg1: i32) -> (i32, i32) {
    %c0_i32 = arith.constant 0 : i32
    %c0_i32_0 = arith.constant 0 : i32
    %c0_i32_1 = arith.constant 0 : i32
    return %c0_i32, %c0_i32_0 : i32, i32
  }
  func.func @transform_3(%arg0: i32, %arg1: i32) -> (i32, i32) {
    %c0_i32 = arith.constant 0 : i32
    %c0_i32_0 = arith.constant 0 : i32
    %c0_i32_1 = arith.constant 0 : i32
    return %c0_i32, %c0_i32_0 : i32, i32
  }
  func.func @transform_4(%arg0: i32, %arg1: i32) -> (i32, i32) {
    %c0_i32 = arith.constant 0 : i32
    %c0_i32_0 = arith.constant 0 : i32
    %c0_i32_1 = arith.constant 0 : i32
    return %c0_i32, %c0_i32_0 : i32, i32
  }
  func.func @transform_5(%arg0: i32, %arg1: i32) -> (i32, i32) {
    %c0_i32 = arith.constant 0 : i32
    %c0_i32_0 = arith.constant 0 : i32
    %c0_i32_1 = arith.constant 0 : i32
    return %c0_i32, %c0_i32_0 : i32, i32
  }
  func.func @transform_6(%arg0: i32, %arg1: i32) -> (i32, i32) {
    %c0_i32 = arith.constant 0 : i32
    %c0_i32_0 = arith.constant 0 : i32
    %c0_i32_1 = arith.constant 0 : i32
    return %c0_i32, %c0_i32_0 : i32, i32
  }
  func.func @transform_7(%arg0: i32, %arg1: i32) -> (i32, i32, i32) {
    %c0_i32 = arith.constant 0 : i32
    %c0_i32_0 = arith.constant 0 : i32
    return %arg0, %arg1, %c0_i32 : i32, i32, i32
  }
}

module attributes {stable_mosaic.version = 11 : i64} {
  func.func @_inverted_residual_kernel(%arg0: i32, %arg1: i32, %arg2: memref<1x18x18x8xbf16, #tpu.memory_space<vmem>>, %arg3: memref<8x128xbf16, #tpu.memory_space<vmem>>, %arg4: memref<1x128xf32, #tpu.memory_space<vmem>>, %arg5: memref<9x128xf32, #tpu.memory_space<vmem>>, %arg6: memref<1x128xf32, #tpu.memory_space<vmem>>, %arg7: memref<128x8xbf16, #tpu.memory_space<vmem>>, %arg8: memref<1x8xf32, #tpu.memory_space<vmem>>, %arg9: memref<1x8x16x8xbf16, #tpu.memory_space<vmem>>, %arg10: memref<10x18x128xbf16, #tpu.memory_space<vmem>>) attributes {dimension_semantics = [#tpu.dimension_semantics<parallel>, #tpu.dimension_semantics<arbitrary>], iteration_bounds = array<i64: 2, 2>, scalar_prefetch = 0 : i64, scratch_operands = 1 : i64, tpu.core_type = #tpu.core_type<tc>, window_params = [{transform_indices = @transform_0, window_bounds = array<i64: 1, 18, 18, 8>}, {pipeline_mode = #tpu.pipeline_mode<synchronous>, transform_indices = @transform_1, window_bounds = array<i64: 8, 128>}, {pipeline_mode = #tpu.pipeline_mode<synchronous>, transform_indices = @transform_2, window_bounds = array<i64: 1, 128>}, {pipeline_mode = #tpu.pipeline_mode<synchronous>, transform_indices = @transform_3, window_bounds = array<i64: 9, 128>}, {pipeline_mode = #tpu.pipeline_mode<synchronous>, transform_indices = @transform_4, window_bounds = array<i64: 1, 128>}, {pipeline_mode = #tpu.pipeline_mode<synchronous>, transform_indices = @transform_5, window_bounds = array<i64: 128, 8>}, {pipeline_mode = #tpu.pipeline_mode<synchronous>, transform_indices = @transform_6, window_bounds = array<i64: 1, 8>}, {transform_indices = @transform_7, window_bounds = array<i64: 1, 8, 16, 8>}]} {
    %c8_i32 = arith.constant 8 : i32
    %0 = arith.muli %arg1, %c8_i32 : i32
    %1 = tpu.assume_multiple %0, 8 : i32
    %c0 = arith.constant 0 : index
    %2 = arith.index_cast %1 : i32 to index
    %c0_0 = arith.constant 0 : index
    %c0_1 = arith.constant 0 : index
    %3 = vector.load %arg2[%c0, %2, %c0_0, %c0_1] : memref<1x18x18x8xbf16, #tpu.memory_space<vmem>>, vector<1x10x18x8xbf16>
    %4 = vector.shape_cast %3 : vector<1x10x18x8xbf16> to vector<10x18x8xbf16>
    %5 = vector.shape_cast %4 : vector<10x18x8xbf16> to vector<180x8xbf16>
    %c0_2 = arith.constant 0 : index
    %c0_3 = arith.constant 0 : index
    %6 = vector.load %arg3[%c0_2, %c0_3] : memref<8x128xbf16, #tpu.memory_space<vmem>>, vector<8x128xbf16>
    %cst = arith.constant dense<0.000000e+00> : vector<180x128xf32>
    %7 = tpu.matmul %5, %6, %cst {dimension_numbers = #tpu.dot_dimension_numbers<[1], [0], [0], [1], [0, 0, 1, 1], [], []>} : vector<180x8xbf16>, vector<8x128xbf16>, vector<180x128xf32> -> vector<180x128xf32>
    %c0_4 = arith.constant 0 : index
    %c0_5 = arith.constant 0 : index
    %8 = vector.load %arg4[%c0_4, %c0_5] : memref<1x128xf32, #tpu.memory_space<vmem>>, vector<1x128xf32>
    %9 = vector.broadcast %8 : vector<1x128xf32> to vector<180x128xf32>
    %10 = arith.addf %7, %9 : vector<180x128xf32>
    %cst_6 = arith.constant 0.000000e+00 : f32
    %cst_7 = arith.constant 6.000000e+00 : f32
    %11 = vector.broadcast %cst_6 : f32 to vector<180x128xf32>
    %12 = arith.maximumf %11, %10 : vector<180x128xf32>
    %13 = vector.broadcast %cst_7 : f32 to vector<180x128xf32>
    %14 = arith.minimumf %13, %12 : vector<180x128xf32>
    %15 = vector.shape_cast %14 : vector<180x128xf32> to vector<10x18x128xf32>
    %16 = tpu.iota {dimensions = array<i32: 0>} : vector<10x18xi32>
    %17 = vector.broadcast %1 : i32 to vector<10x18xi32>
    %18 = arith.addi %16, %17 : vector<10x18xi32>
    %19 = tpu.iota {dimensions = array<i32: 1>} : vector<10x18xi32>
    %c0_i32 = arith.constant 0 : i32
    %20 = vector.broadcast %c0_i32 : i32 to vector<10x18xi32>
    %21 = arith.cmpi sgt, %18, %20 : vector<10x18xi32>
    %c17_i32 = arith.constant 17 : i32
    %22 = vector.broadcast %c17_i32 : i32 to vector<10x18xi32>
    %23 = arith.cmpi slt, %18, %22 : vector<10x18xi32>
    %24 = arith.andi %21, %23 : vector<10x18xi1>
    %c0_i32_8 = arith.constant 0 : i32
    %25 = vector.broadcast %c0_i32_8 : i32 to vector<10x18xi32>
    %26 = arith.cmpi sgt, %19, %25 : vector<10x18xi32>
    %27 = arith.andi %24, %26 : vector<10x18xi1>
    %c17_i32_9 = arith.constant 17 : i32
    %28 = vector.broadcast %c17_i32_9 : i32 to vector<10x18xi32>
    %29 = arith.cmpi slt, %19, %28 : vector<10x18xi32>
    %30 = arith.andi %27, %29 : vector<10x18xi1>
    %31 = arith.extui %30 : vector<10x18xi1> to vector<10x18xi32>
    %32 = arith.sitofp %31 : vector<10x18xi32> to vector<10x18xf32>
    %33 = vector.shape_cast %32 : vector<10x18xf32> to vector<10x18x1xf32>
    %34 = vector.broadcast %33 : vector<10x18x1xf32> to vector<10x18x128xf32>
    %35 = arith.mulf %15, %34 : vector<10x18x128xf32>
    %36 = arith.truncf %35 : vector<10x18x128xf32> to vector<10x18x128xbf16>
    %c0_10 = arith.constant 0 : index
    %c0_11 = arith.constant 0 : index
    %c0_12 = arith.constant 0 : index
    %37 = vector.load %arg10[%c0_10, %c0_11, %c0_12] : memref<10x18x128xbf16, #tpu.memory_space<vmem>>, vector<10x18x128xbf16>
    tpu.vector_store %arg10[%c0_10, %c0_11, %c0_12], %36 {strides = array<i32>} : memref<10x18x128xbf16, #tpu.memory_space<vmem>>, vector<10x18x128xbf16>,
    %c0_13 = arith.constant 0 : index
    %c0_14 = arith.constant 0 : index
    %38 = vector.load %arg5[%c0_13, %c0_14] : memref<9x128xf32, #tpu.memory_space<vmem>>, vector<9x128xf32>
    %39 = vector.extract_strided_slice %38 {offsets = [0, 0], sizes = [1, 128], strides = [1, 1]} : vector<9x128xf32> to vector<1x128xf32>
    %40 = vector.shape_cast %39 : vector<1x128xf32> to vector<1x1x128xf32>
    %41 = vector.extract_strided_slice %38 {offsets = [1, 0], sizes = [1, 128], strides = [1, 1]} : vector<9x128xf32> to vector<1x128xf32>
    %42 = vector.shape_cast %41 : vector<1x128xf32> to vector<1x1x128xf32>
    %43 = vector.extract_strided_slice %38 {offsets = [2, 0], sizes = [1, 128], strides = [1, 1]} : vector<9x128xf32> to vector<1x128xf32>
    %44 = vector.shape_cast %43 : vector<1x128xf32> to vector<1x1x128xf32>
    %45 = vector.extract_strided_slice %38 {offsets = [3, 0], sizes = [1, 128], strides = [1, 1]} : vector<9x128xf32> to vector<1x128xf32>
    %46 = vector.shape_cast %45 : vector<1x128xf32> to vector<1x1x128xf32>
    %47 = vector.extract_strided_slice %38 {offsets = [4, 0], sizes = [1, 128], strides = [1, 1]} : vector<9x128xf32> to vector<1x128xf32>
    %48 = vector.shape_cast %47 : vector<1x128xf32> to vector<1x1x128xf32>
    %49 = vector.extract_strided_slice %38 {offsets = [5, 0], sizes = [1, 128], strides = [1, 1]} : vector<9x128xf32> to vector<1x128xf32>
    %50 = vector.shape_cast %49 : vector<1x128xf32> to vector<1x1x128xf32>
    %51 = vector.extract_strided_slice %38 {offsets = [6, 0], sizes = [1, 128], strides = [1, 1]} : vector<9x128xf32> to vector<1x128xf32>
    %52 = vector.shape_cast %51 : vector<1x128xf32> to vector<1x1x128xf32>
    %53 = vector.extract_strided_slice %38 {offsets = [7, 0], sizes = [1, 128], strides = [1, 1]} : vector<9x128xf32> to vector<1x128xf32>
    %54 = vector.shape_cast %53 : vector<1x128xf32> to vector<1x1x128xf32>
    %55 = vector.extract_strided_slice %38 {offsets = [8, 0], sizes = [1, 128], strides = [1, 1]} : vector<9x128xf32> to vector<1x128xf32>
    %56 = vector.shape_cast %55 : vector<1x128xf32> to vector<1x1x128xf32>
    %c0_15 = arith.constant 0 : index
    %c0_16 = arith.constant 0 : index
    %c0_17 = arith.constant 0 : index
    %57 = vector.load %arg10[%c0_15, %c0_16, %c0_17] : memref<10x18x128xbf16, #tpu.memory_space<vmem>>, vector<8x16x128xbf16>
    %58 = arith.extf %57 : vector<8x16x128xbf16> to vector<8x16x128xf32>
    %59 = vector.broadcast %40 : vector<1x1x128xf32> to vector<8x16x128xf32>
    %60 = arith.mulf %58, %59 : vector<8x16x128xf32>
    %c0_18 = arith.constant 0 : index
    %c1 = arith.constant 1 : index
    %c0_19 = arith.constant 0 : index
    %61 = vector.load %arg10[%c0_18, %c1, %c0_19] : memref<10x18x128xbf16, #tpu.memory_space<vmem>>, vector<8x16x128xbf16>
    %62 = arith.extf %61 : vector<8x16x128xbf16> to vector<8x16x128xf32>
    %63 = vector.broadcast %42 : vector<1x1x128xf32> to vector<8x16x128xf32>
    %64 = arith.mulf %62, %63 : vector<8x16x128xf32>
    %65 = arith.addf %60, %64 : vector<8x16x128xf32>
    %c0_20 = arith.constant 0 : index
    %c2 = arith.constant 2 : index
    %c0_21 = arith.constant 0 : index
    %66 = vector.load %arg10[%c0_20, %c2, %c0_21] : memref<10x18x128xbf16, #tpu.memory_space<vmem>>, vector<8x16x128xbf16>
    %67 = arith.extf %66 : vector<8x16x128xbf16> to vector<8x16x128xf32>
    %68 = vector.broadcast %44 : vector<1x1x128xf32> to vector<8x16x128xf32>
    %69 = arith.mulf %67, %68 : vector<8x16x128xf32>
    %70 = arith.addf %65, %69 : vector<8x16x128xf32>
    %c1_22 = arith.constant 1 : index
    %c0_23 = arith.constant 0 : index
    %c0_24 = arith.constant 0 : index
    %71 = vector.load %arg10[%c1_22, %c0_23, %c0_24] : memref<10x18x128xbf16, #tpu.memory_space<vmem>>, vector<8x16x128xbf16>
    %72 = arith.extf %71 : vector<8x16x128xbf16> to vector<8x16x128xf32>
    %73 = vector.broadcast %46 : vector<1x1x128xf32> to vector<8x16x128xf32>
    %74 = arith.mulf %72, %73 : vector<8x16x128xf32>
    %75 = arith.addf %70, %74 : vector<8x16x128xf32>
    %c1_25 = arith.constant 1 : index
    %c1_26 = arith.constant 1 : index
    %c0_27 = arith.constant 0 : index
    %76 = vector.load %arg10[%c1_25, %c1_26, %c0_27] : memref<10x18x128xbf16, #tpu.memory_space<vmem>>, vector<8x16x128xbf16>
    %77 = arith.extf %76 : vector<8x16x128xbf16> to vector<8x16x128xf32>
    %78 = vector.broadcast %48 : vector<1x1x128xf32> to vector<8x16x128xf32>
    %79 = arith.mulf %77, %78 : vector<8x16x128xf32>
    %80 = arith.addf %75, %79 : vector<8x16x128xf32>
    %c1_28 = arith.constant 1 : index
    %c2_29 = arith.constant 2 : index
    %c0_30 = arith.constant 0 : index
    %81 = vector.load %arg10[%c1_28, %c2_29, %c0_30] : memref<10x18x128xbf16, #tpu.memory_space<vmem>>, vector<8x16x128xbf16>
    %82 = arith.extf %81 : vector<8x16x128xbf16> to vector<8x16x128xf32>
    %83 = vector.broadcast %50 : vector<1x1x128xf32> to vector<8x16x128xf32>
    %84 = arith.mulf %82, %83 : vector<8x16x128xf32>
    %85 = arith.addf %80, %84 : vector<8x16x128xf32>
    %c2_31 = arith.constant 2 : index
    %c0_32 = arith.constant 0 : index
    %c0_33 = arith.constant 0 : index
    %86 = vector.load %arg10[%c2_31, %c0_32, %c0_33] : memref<10x18x128xbf16, #tpu.memory_space<vmem>>, vector<8x16x128xbf16>
    %87 = arith.extf %86 : vector<8x16x128xbf16> to vector<8x16x128xf32>
    %88 = vector.broadcast %52 : vector<1x1x128xf32> to vector<8x16x128xf32>
    %89 = arith.mulf %87, %88 : vector<8x16x128xf32>
    %90 = arith.addf %85, %89 : vector<8x16x128xf32>
    %c2_34 = arith.constant 2 : index
    %c1_35 = arith.constant 1 : index
    %c0_36 = arith.constant 0 : index
    %91 = vector.load %arg10[%c2_34, %c1_35, %c0_36] : memref<10x18x128xbf16, #tpu.memory_space<vmem>>, vector<8x16x128xbf16>
    %92 = arith.extf %91 : vector<8x16x128xbf16> to vector<8x16x128xf32>
    %93 = vector.broadcast %54 : vector<1x1x128xf32> to vector<8x16x128xf32>
    %94 = arith.mulf %92, %93 : vector<8x16x128xf32>
    %95 = arith.addf %90, %94 : vector<8x16x128xf32>
    %c2_37 = arith.constant 2 : index
    %c2_38 = arith.constant 2 : index
    %c0_39 = arith.constant 0 : index
    %96 = vector.load %arg10[%c2_37, %c2_38, %c0_39] : memref<10x18x128xbf16, #tpu.memory_space<vmem>>, vector<8x16x128xbf16>
    %97 = arith.extf %96 : vector<8x16x128xbf16> to vector<8x16x128xf32>
    %98 = vector.broadcast %56 : vector<1x1x128xf32> to vector<8x16x128xf32>
    %99 = arith.mulf %97, %98 : vector<8x16x128xf32>
    %100 = arith.addf %95, %99 : vector<8x16x128xf32>
    %c0_40 = arith.constant 0 : index
    %c0_41 = arith.constant 0 : index
    %101 = vector.load %arg6[%c0_40, %c0_41] : memref<1x128xf32, #tpu.memory_space<vmem>>, vector<1x128xf32>
    %102 = vector.shape_cast %101 : vector<1x128xf32> to vector<1x1x128xf32>
    %103 = vector.broadcast %102 : vector<1x1x128xf32> to vector<8x16x128xf32>
    %104 = arith.addf %100, %103 : vector<8x16x128xf32>
    %cst_42 = arith.constant 0.000000e+00 : f32
    %cst_43 = arith.constant 6.000000e+00 : f32
    %105 = vector.broadcast %cst_42 : f32 to vector<8x16x128xf32>
    %106 = arith.maximumf %105, %104 : vector<8x16x128xf32>
    %107 = vector.broadcast %cst_43 : f32 to vector<8x16x128xf32>
    %108 = arith.minimumf %107, %106 : vector<8x16x128xf32>
    %109 = arith.truncf %108 : vector<8x16x128xf32> to vector<8x16x128xbf16>
    %110 = vector.shape_cast %109 : vector<8x16x128xbf16> to vector<128x128xbf16>
    %c0_44 = arith.constant 0 : index
    %c0_45 = arith.constant 0 : index
    %111 = vector.load %arg7[%c0_44, %c0_45] : memref<128x8xbf16, #tpu.memory_space<vmem>>, vector<128x8xbf16>
    %cst_46 = arith.constant dense<0.000000e+00> : vector<128x8xf32>
    %112 = tpu.matmul %110, %111, %cst_46 {dimension_numbers = #tpu.dot_dimension_numbers<[1], [0], [0], [1], [0, 0, 1, 1], [], []>} : vector<128x128xbf16>, vector<128x8xbf16>, vector<128x8xf32> -> vector<128x8xf32>
    %c0_47 = arith.constant 0 : index
    %c0_48 = arith.constant 0 : index
    %113 = vector.load %arg8[%c0_47, %c0_48] : memref<1x8xf32, #tpu.memory_space<vmem>>, vector<1x8xf32>
    %114 = vector.broadcast %113 : vector<1x8xf32> to vector<128x8xf32>
    %115 = arith.addf %112, %114 : vector<128x8xf32>
    %c1_i32 = arith.constant 1 : i32
    %116 = arith.addi %1, %c1_i32 : i32
    %c0_49 = arith.constant 0 : index
    %117 = arith.index_cast %116 : i32 to index
    %c1_50 = arith.constant 1 : index
    %c0_51 = arith.constant 0 : index
    %118 = vector.load %arg2[%c0_49, %117, %c1_50, %c0_51] : memref<1x18x18x8xbf16, #tpu.memory_space<vmem>>, vector<1x8x16x8xbf16>
    %119 = vector.shape_cast %118 : vector<1x8x16x8xbf16> to vector<8x16x8xbf16>
    %120 = arith.extf %119 : vector<8x16x8xbf16> to vector<8x16x8xf32>
    %121 = vector.shape_cast %120 : vector<8x16x8xf32> to vector<128x8xf32>
    %122 = arith.addf %115, %121 : vector<128x8xf32>
    %123 = vector.shape_cast %122 : vector<128x8xf32> to vector<1x8x16x8xf32>
    %124 = arith.truncf %123 : vector<1x8x16x8xf32> to vector<1x8x16x8xbf16>
    %c0_52 = arith.constant 0 : index
    %c0_53 = arith.constant 0 : index
    %c0_54 = arith.constant 0 : index
    %c0_55 = arith.constant 0 : index
    %125 = vector.load %arg9[%c0_52, %c0_53, %c0_54, %c0_55] : memref<1x8x16x8xbf16, #tpu.memory_space<vmem>>, vector<1x8x16x8xbf16>
    tpu.vector_store %arg9[%c0_52, %c0_53, %c0_54, %c0_55], %124 {strides = array<i32>} : memref<1x8x16x8xbf16, #tpu.memory_space<vmem>>, vector<1x8x16x8xbf16>,
    return
  }
  func.func @transform_0(%arg0: i32, %arg1: i32) -> (i32, i32, i32, i32) {
    %c0_i32 = arith.constant 0 : i32
    %c0_i32_0 = arith.constant 0 : i32
    %c0_i32_1 = arith.constant 0 : i32
    %c0_i32_2 = arith.constant 0 : i32
    return %arg0, %c0_i32, %c0_i32_0, %c0_i32_1 : i32, i32, i32, i32
  }
  func.func @transform_1(%arg0: i32, %arg1: i32) -> (i32, i32) {
    %c0_i32 = arith.constant 0 : i32
    %c0_i32_0 = arith.constant 0 : i32
    %c0_i32_1 = arith.constant 0 : i32
    return %c0_i32, %c0_i32_0 : i32, i32
  }
  func.func @transform_2(%arg0: i32, %arg1: i32) -> (i32, i32) {
    %c0_i32 = arith.constant 0 : i32
    %c0_i32_0 = arith.constant 0 : i32
    %c0_i32_1 = arith.constant 0 : i32
    return %c0_i32, %c0_i32_0 : i32, i32
  }
  func.func @transform_3(%arg0: i32, %arg1: i32) -> (i32, i32) {
    %c0_i32 = arith.constant 0 : i32
    %c0_i32_0 = arith.constant 0 : i32
    %c0_i32_1 = arith.constant 0 : i32
    return %c0_i32, %c0_i32_0 : i32, i32
  }
  func.func @transform_4(%arg0: i32, %arg1: i32) -> (i32, i32) {
    %c0_i32 = arith.constant 0 : i32
    %c0_i32_0 = arith.constant 0 : i32
    %c0_i32_1 = arith.constant 0 : i32
    return %c0_i32, %c0_i32_0 : i32, i32
  }
  func.func @transform_5(%arg0: i32, %arg1: i32) -> (i32, i32) {
    %c0_i32 = arith.constant 0 : i32
    %c0_i32_0 = arith.constant 0 : i32
    %c0_i32_1 = arith.constant 0 : i32
    return %c0_i32, %c0_i32_0 : i32, i32
  }
  func.func @transform_6(%arg0: i32, %arg1: i32) -> (i32, i32) {
    %c0_i32 = arith.constant 0 : i32
    %c0_i32_0 = arith.constant 0 : i32
    %c0_i32_1 = arith.constant 0 : i32
    return %c0_i32, %c0_i32_0 : i32, i32
  }
  func.func @transform_7(%arg0: i32, %arg1: i32) -> (i32, i32, i32, i32) {
    %c0_i32 = arith.constant 0 : i32
    %c0_i32_0 = arith.constant 0 : i32
    %c0_i32_1 = arith.constant 0 : i32
    return %arg0, %arg1, %c0_i32, %c0_i32_0 : i32, i32, i32, i32
  }
}

</mosaic_0001>

<bundles_post_ra>
// kernel: tpu_custom_call.1
= control target key start
LH: loop header
LB: loop body
LE: loop exit
PB: predicated region body
PF: predicated region fallthrough
CT: control target
= control target key end

     0   :  { %s4175_s24 = smov 0   ;;  %s4177_s25 = smov 0   ;;  %s5622_s0 = inlined_call_operand.vmem [shape: bf16[2,18,18,8], index: 0, kind: input, shape index: {}]   ;;  %s5623_s1 = inlined_call_operand.vmem [shape: bf16[8,128], index: 1, kind: input, shape index: {}]   ;;  %s5624_s2 = inlined_call_operand.vmem [shape: f32[1,128], index: 2, kind: input, shape index: {}]   ;;  %s5625_s3 = inlined_call_operand.vmem [shape: f32[9,128], index: 3, kind: input, shape index: {}]   ;;  %s5626_s4 = inlined_call_operand.vmem [shape: f32[1,128], index: 4, kind: input, shape index: {}]   ;;  %s5627_s5 = inlined_call_operand.vmem [shape: bf16[128,8], index: 5, kind: input, shape index: {}]   ;;  %s5628_s6 = inlined_call_operand.vmem [shape: f32[1,8], index: 6, kind: input, shape index: {}]   ;;  %s5629_s7 = inlined_call_operand.vmem [shape: bf16[2,16,16,8], index: 7, kind: output, shape index: {}]  }
   0x1   :  { %s4179_s26 = smov 0   ;;  %s4181_s27 = smov 0  }
   0x2   :  { %s4183_s28 = smov 0  }
   0x3 LB: > { %s26_s29 = sadd.s32 1, %s4120_s26  ;;  %s29_s30 = sadd.s32 1, %s4124_s27  ;;  %s4128_s28 = sphi %s4183_s28, %s17_s28   ;;  %s4124_s27 = sphi %s4181_s27, %s5661_s27   ;;  %s4120_s26 = sphi %s4179_s26, %s5660_s26   ;;  %s4116_s25 = sphi %s4177_s25, %s5659_s25   ;;  %s4112_s24 = sphi %s4175_s24, %s5658_s24  }
   0x4   : > { %p27_p0 = scmp.ge.s32.totalorder %s26_s29, 2  ;;  %p3759_p1 = scmp.ge.s32.totalorder %s4128_s28, 1 }
   0x5   : > { %p251_p2 = scmp.lt.s32.totalorder %s4128_s28, 5 }
   0x6   : > { %s5663_s29 = smov (%p27_p0, %s26_s29), 0  ;;  %s5665_s30 = smov (!%p27_p0, %s29_s30), %s4124_s27 }
   0x7   : > { %p252_p3 = pnand %p3759_p1, %p251_p2  ;;  %p31_p4 = scmp.ge.s32.totalorder %s5665_s30, 2 }
   0x9   : > { %s5667_s30 = smov (%p31_p4, %s5665_s30), 0  ;;  %255 = sbr.rel (%p252_p3) target bundleno = 634 (0x27a), region = 48 }
   0xe   : > { %v1147_v0 = vlaneseq  ;;  %v673_v1 = vld [vmem:[%s5623_s1] sm:$0xf]  ;;  %vm872_vm0 = vcmask 1043456   ;;  %p288_p5 = scmp.lt.s32.totalorder %s4116_s25, 1  ;;  %s4211_s10 = sshll.u32 %s4112_s24, 3  ;;  %vm399_vm5 = vcmask 1040384  }
   0xf   : > { %v874_v2 = vsel %vm872_vm0, %v673_v1, 0  ;;  %v1150_v4 = vstv %s4211_s10  ;;  %s3842_s11 = smul.u32 96, %s4112_s24  ;;  %vm403_vm6 = vcmask 1041409   ;;  %vm407_vm8 = vcmask 1042434   ;;  %p296_p6 = scmp.lt.s32.totalorder %s4211_s10, 15 }
  0x10   : > { %v4213_v3 = vshrl.u32 %v1147_v0, 7  ;;  %883 = vmatpush.bf16.msra.mxu0 %v874_v2  ;;  %s5669_s25 = smov (!%p288_p5, %s4116_s25), 1  ;;  %v4218_v5 = vand.u32 127, %v1147_v0  ;;  %3958 = vmatpush.bf16.msra.mxu2 %v874_v2  ;;  %vm411_vm9 = vcmask 1043459   ;;  %v4130_v12 = vmov 0.0  }
  0x11   : > { %s3967_s12 = smul.u32 216, %s5669_s25  ;;  %vm847_vm12 = vcmask 64512   ;;  %s5671_s10 = smov (!%p296_p6, %s4211_s10), 15 }
  0x12   : > { %4013 = vset.pattern.permute.xlu0 %v4213_v3  ;;  %v1151_v6 = vadd.s32 %v1150_v4, %v4213_v3  ;;  %v4227_v7 = vadd.s32 8, %v4213_v3  ;;  %vm1161_vm1 = vcmp.gt.s32.totalorder %v4218_v5, 0  ;;  %vm1164_vm4 = vcmp.lt.s32.totalorder %v4218_v5, 17  ;;  %s3762_s19 = sshll.u32 %s5671_s10, 1  ;;  %s3763_s20 = sshll.u32 %s5669_s25, 5 }
  0x13   : > { %s292_s15 = scalar_lea.vmem %s5622_s0, %s3967_s12  ;;  %v4259_v34 = vadd.s32 16, %v4213_v3  ;;  %s5516_s21 = sadd.s32 %s3763_s20, %s3762_s19 }
  0x14   : > { %vm1155_vm2 = vcmp.gt.s32.totalorder %v1151_v6, 0  ;;  %vm1157_vm3 = vcmp.lt.s32.totalorder %v1151_v6, 17  ;;  %4037 = vset.pattern.permute.xlu2 %v4227_v7  ;;  %s4235_s16 = scalar_lea.vmem %s292_s15, %s3842_s11  ;;  %s3764_s25 = sshll.u32 %s5516_s21, 2 }
  0x15   : > { %vm1159_vm7 = vmand %vm1155_vm2, %vm1157_vm3  ;;  %v309_v8 = vld [vmem:[%s4235_s16] sm:$0xf]  ;;  %v310_v9 = vld [vmem:[%s4235_s16 + $0x4] sm:$0xf]  ;;  %4025 = vset.pattern.permute.xlu1 %v4259_v34  ;;  %vm2492_vm3 = vcmask 1045504   ;;  %s5533_s23 = scalar_lea.vmem %s5629_s7, %s3764_s25 }
  0x16   : > { %vm1162_vm10 = vmand %vm1159_vm7, %vm1161_vm1  ;;  %v369_v10 = vrot.slane %v309_v8, 3  ;;  %v370_v11 = vrot.slane %v310_v9, 3  ;;  %v312_v30 = vld [vmem:[%s4235_s16 + $0xc] sm:$0xf]  ;;  %v311_v32 = vld [vmem:[%s4235_s16 + $0x8] sm:$0x1] }
  0x17   : > { %vm1165_vm11 = vmand %vm1162_vm10, %vm1164_vm4  ;;  %v372_v33 = vrot.slane %v312_v30, 3  ;;  %v313_v35 = vld [vmem:[%s4235_s16 + $0x10] sm:$0xf]  ;;  %v371_v36 = vrot.slane %v311_v32, 3  ;;  %v315_v52 = vld [vmem:[%s4235_s16 + $0x18] sm:$0xf] }
  0x18   : > { %v4244_v13 = vsel %vm1165_vm11, 1.0, %v4130_v12  ;;  %v402_v14 = vsel %vm399_vm5, %v309_v8, %v369_v10  ;;  %v404_v15 = vsel %vm403_vm6, %v309_v8, %v369_v10  ;;  %v408_v16 = vsel %vm407_vm8, %v309_v8, %v369_v10  ;;  %v314_v53 = vld [vmem:[%s4235_s16 + $0x14] sm:$0x1]  ;;  %v316_v55 = vld [vmem:[%s4235_s16 + $0x1c] sm:$0xf] }
  0x19   : > { %v412_v17 = vsel %vm411_vm9, %v309_v8, %v369_v10  ;;  %v406_v18 = vrot.slane %v404_v15, 1  ;;  %v410_v19 = vrot.slane %v408_v16, 2  ;;  %v417_v21 = vsel %vm399_vm5, %v310_v9, %v370_v11  ;;  %678 = vst [vmem:[#allocation1] ss:$9 sm:$0xff] %v402_v14 }
  0x1a   : > { %v414_v20 = vrot.slane %v412_v17, 3  ;;  %v418_v22 = vsel %vm403_vm6, %v310_v9, %v370_v11  ;;  %v421_v23 = vsel %vm407_vm8, %v310_v9, %v370_v11  ;;  %v424_v24 = vsel %vm411_vm9, %v310_v9, %v370_v11  ;;  %689 = vst [vmem:[#allocation1 + $0x4] ss:$9 sm:$0xff] %v417_v21  ;;  %v318_v17 = vld [vmem:[%s4235_s16 + $0x24] sm:$0xf] }
  0x1b   : > { %v1171_v25 = vperm.slane %v4244_v13, 0  ;;  %v420_v26 = vrot.slane %v418_v22, 1  ;;  %v423_v27 = vrot.slane %v421_v23, 2  ;;  %681 = vst [vmem:[#allocation1 + $0x1] ss:$9 sm:$0xff] %v406_v18  ;;  %v1190_v28 = vperm.slane %v4244_v13, 1 }
  0x1c   : > { %v426_v29 = vrot.slane %v424_v24, 3  ;;  %684 = vst [vmem:[#allocation1 + $0x2] ss:$9 sm:$0xff] %v410_v19  ;;  %v373_v37 = vrot.slane %v313_v35, 3  ;;  %v433_v38 = vsel %vm403_vm6, %v312_v30, %v372_v33  ;;  %v436_v39 = vsel %vm407_vm8, %v312_v30, %v372_v33  ;;  %v317_v18 = vld [vmem:[%s4235_s16 + $0x20] sm:$0x1] }
  0x1d   : > { %687 = vst [vmem:[#allocation1 + $0x3] ss:$9 sm:$0xff] %v414_v20  ;;  %v4014_v31 = vpack.i.bf16 %v1190_v28, %v1171_v25  ;;  %v429_v40 = vsel %vm399_vm5, %v311_v32, %v371_v36  ;;  %v439_v41 = vsel %vm411_vm9, %v312_v30, %v372_v33  ;;  %v432_v42 = vsel %vm399_vm5, %v312_v30, %v372_v33  ;;  %v319_v24 = vld [vmem:[%s4235_s16 + $0x28] sm:$0xf] }
  0x1e   : > { %692 = vst [vmem:[#allocation1 + $0x5] ss:$9 sm:$0xff] %v420_v26  ;;  %v435_v43 = vrot.slane %v433_v38, 1  ;;  %v438_v45 = vrot.slane %v436_v39, 2  ;;  %v445_v46 = vsel %vm403_vm6, %v313_v35, %v373_v37  ;;  %v441_v47 = vrot.slane %v439_v41, 3 }
  0x1f   : > { %695 = vst [vmem:[#allocation1 + $0x6] ss:$9 sm:$0xff] %v423_v27  ;;  %4015 = vperm.xlu0 %4013, %v4014_v31   ;;  %v448_v48 = vsel %vm407_vm8, %v313_v35, %v373_v37  ;;  %4027 = vperm.xlu1 %4025, %v4014_v31   ;;  %v444_v49 = vsel %vm399_vm5, %v313_v35, %v373_v37  ;;  %v447_v50 = vrot.slane %v445_v46, 1  ;;  %v375_v54 = vrot.slane %v315_v52, 3  ;;  %v321_v38 = vld [vmem:[%s4235_s16 + $0x30] sm:$0xf] }
  0x20   : > { %698 = vst [vmem:[#allocation1 + $0x7] ss:$9 sm:$0xff] %v426_v29  ;;  %v450_v51 = vrot.slane %v448_v48, 2  ;;  %v451_v56 = vsel %vm411_vm9, %v313_v35, %v373_v37  ;;  %v374_v57 = vrot.slane %v314_v53, 3  ;;  %v1209_v58 = vperm.slane %v4244_v13, 2 }
  0x21   : > { %v1228_v59 = vperm.slane %v4244_v13, 3  ;;  %v376_v60 = vrot.slane %v316_v55, 3  ;;  %v453_v61 = vrot.slane %v451_v56, 3  ;;  %v460_v62 = vsel %vm403_vm6, %v315_v52, %v375_v54  ;;  %v320_v39 = vld [vmem:[%s4235_s16 + $0x2c] sm:$0x1] }
  0x22   : > { %v463_v63 = vsel %vm407_vm8, %v315_v52, %v375_v54  ;;  %v456_v0 = vsel %vm399_vm5, %v314_v53, %v374_v57  ;;  %v466_v1 = vsel %vm411_vm9, %v315_v52, %v375_v54  ;;  %v459_v8 = vsel %vm399_vm5, %v315_v52, %v375_v54 }
  0x23   : > { %v4284_v2 = vpack.i.bf16 %v1228_v59, %v1209_v58  ;;  %v462_v9 = vrot.slane %v460_v62, 1  ;;  %v465_v10 = vrot.slane %v463_v63, 2  ;;  %v472_v11 = vsel %vm403_vm6, %v316_v55, %v376_v60  ;;  %v324_v59 = vld [vmem:[%s4235_s16 + $0x3c] sm:$0xf] }
  0x24   : > { %v468_v14 = vrot.slane %v466_v1, 3  ;;  %v471_v15 = vsel %vm399_vm5, %v316_v55, %v376_v60  ;;  %v474_v16 = vrot.slane %v472_v11, 1  ;;  %v378_v19 = vrot.slane %v318_v17, 3 }
  0x25   : > { %v475_v20 = vsel %vm407_vm8, %v316_v55, %v376_v60  ;;  %v478_v21 = vsel %vm411_vm9, %v316_v55, %v376_v60  ;;  %v377_v22 = vrot.slane %v317_v18, 3  ;;  %v381_v41 = vrot.slane %v321_v38, 3  ;;  %v322_v55 = vld [vmem:[%s4235_s16 + $0x34] sm:$0xf]  ;;  %v323_v60 = vld [vmem:[%s4235_s16 + $0x38] sm:$0x1]  ;;  %4039 = vperm.xlu2 %4037, %v4284_v2  }
  0x26   : > { %v477_v23 = vrot.slane %v475_v20, 2  ;;  %v480_v25 = vrot.slane %v478_v21, 3  ;;  %v487_v26 = vsel %vm403_vm6, %v318_v17, %v378_v19  ;;  %v490_v27 = vsel %vm407_vm8, %v318_v17, %v378_v19 }
  0x27   : > { %v699_v44 = vld [vmem:[#allocation1] sm:$0xff]  ;;  %4019 = vset.pattern.permute.xlu0 %v4227_v7  ;;  %4031 = vset.pattern.permute.xlu1 %v4213_v3  ;;  %v483_v29 = vsel %vm399_vm5, %v317_v18, %v377_v22  ;;  %v493_v30 = vsel %vm411_vm9, %v318_v17, %v378_v19  ;;  %v486_v32 = vsel %vm399_vm5, %v318_v17, %v378_v19  ;;  %v489_v33 = vrot.slane %v487_v26, 1 }
  0x28   : > { %3768 = vmatmul.msk.bf16.vlgmr.msra.gmra.mxu0 %vm847_vm12, %v699_v44  ;;  %700 = vst [vmem:[#allocation1] ss:$9 sm:$0xff] %v429_v40  ;;  %v492_v35 = vrot.slane %v490_v27, 2  ;;  %v495_v36 = vrot.slane %v493_v30, 3  ;;  %v380_v44 = vrot.slane %v320_v39, 3  ;;  %v514_v48 = vsel %vm403_vm6, %v321_v38, %v381_v41 }
  0x29   : > { %701 = vst [vmem:[#allocation1 + $0x1] ss:$9 sm:$0xff] %v432_v42  ;;  %v520_v52 = vsel %vm411_vm9, %v321_v38, %v381_v41  ;;  %v513_v53 = vsel %vm399_vm5, %v321_v38, %v381_v41  ;;  %v516_v54 = vrot.slane %v514_v48, 1  ;;  %v382_v58 = vrot.slane %v322_v55, 3  ;;  %v325_v22 = vld [vmem:[%s4235_s16 + $0x40] sm:$0xf] }
  0x2a   : > { %703 = vst [vmem:[#allocation1 + $0x2] ss:$9 sm:$0xff] %v435_v43  ;;  %v522_v57 = vrot.slane %v520_v52, 3  ;;  %v384_v62 = vrot.slane %v324_v59, 3  ;;  %v383_v1 = vrot.slane %v323_v60, 3  ;;  %v1266_v11 = vperm.slane %v4244_v13, 5 }
  0x2b   : > { %705 = vst [vmem:[#allocation1 + $0x3] ss:$9 sm:$0xff] %v438_v45  ;;  %v529_v63 = vsel %vm407_vm8, %v322_v55, %v382_v58  ;;  %v326_v27 = vld [vmem:[%s4235_s16 + $0x44] sm:$0x1] }
  0x2c   : > { %707 = vst [vmem:[#allocation1 + $0x4] ss:$9 sm:$0xff] %v441_v47  ;;  %v544_v17 = vsel %vm407_vm8, %v324_v59, %v384_v62  ;;  %v537_v19 = vsel %vm399_vm5, %v323_v60, %v383_v1  ;;  %v540_v20 = vsel %vm399_vm5, %v324_v59, %v384_v62  ;;  %v547_v26 = vsel %vm411_vm9, %v324_v59, %v384_v62 }
  0x2d   : > { %708 = vst [vmem:[#allocation1 + $0x5] ss:$9 sm:$0xff] %v444_v49  ;;  %v549_v30 = vrot.slane %v547_v26, 3  ;;  %4043 = vset.pattern.permute.xlu2 %v4259_v34 }
  0x2e   : > { %710 = vst [vmem:[#allocation1 + $0x6] ss:$9 sm:$0xff] %v447_v50  ;;  %v517_v50 = vsel %vm407_vm8, %v321_v38, %v381_v41 }
  0x2f   : > { %712 = vst [vmem:[#allocation1 + $0x7] ss:$9 sm:$0xff] %v450_v51  ;;  %4021 = vperm.xlu0 %4019, %v4014_v31   ;;  %4033 = vperm.xlu1 %4031, %v4284_v2   ;;  %v379_v31 = vrot.slane %v319_v24, 3  ;;  %v510_v51 = vsel %vm399_vm5, %v320_v39, %v380_v44  ;;  %v519_v56 = vrot.slane %v517_v50, 2  ;;  %v1285_v39 = vperm.slane %v4244_v13, 6 }
  0x31   : > { %v498_v37 = vsel %vm399_vm5, %v319_v24, %v379_v31  ;;  %v499_v40 = vsel %vm403_vm6, %v319_v24, %v379_v31  ;;  %v502_v42 = vsel %vm407_vm8, %v319_v24, %v379_v31  ;;  %v505_v43 = vsel %vm411_vm9, %v319_v24, %v379_v31 }
  0x32   : > { %v501_v45 = vrot.slane %v499_v40, 1  ;;  %v504_v46 = vrot.slane %v502_v42, 2  ;;  %v507_v47 = vrot.slane %v505_v43, 3  ;;  %v385_v24 = vrot.slane %v325_v22, 3 }
  0x33   : > { %v1304_v40 = vperm.slane %v4244_v13, 7 }
  0x34   : > { %v556_v31 = vsel %vm407_vm8, %v325_v22, %v385_v24 }
  0x35   : > { %v4066_v43 = vpack.i.bf16 %v1304_v40, %v1285_v39  ;;  %4045 = vperm.xlu2 %4043, %v4284_v2  }
  0x36   : > { %v713_v6 = vld [vmem:[#allocation1] sm:$0xff] }
  0x37   : > { %715 = vst [vmem:[#allocation1] ss:$9 sm:$0xff] %v453_v61  ;;  %4060 = vset.pattern.permute.xlu0 %v4259_v34  ;;  %v526_v61 = vsel %vm403_vm6, %v322_v55, %v382_v58 }
  0x38   : > { %3769 = vmatmul.msk.bf16.gmra.mxu0 %vm847_vm12, %v713_v6  ;;  %716 = vst [vmem:[#allocation1 + $0x1] ss:$9 sm:$0xff] %v456_v0  ;;  %v532_v0 = vsel %vm411_vm9, %v322_v55, %v382_v58  ;;  %v525_v6 = vsel %vm399_vm5, %v322_v55, %v382_v58 }
  0x39   : > { %717 = vst [vmem:[#allocation1 + $0x2] ss:$9 sm:$0xff] %v459_v8  ;;  %v528_v8 = vrot.slane %v526_v61, 1 }
  0x3a   : > { %719 = vst [vmem:[#allocation1 + $0x3] ss:$9 sm:$0xff] %v462_v9  ;;  %v531_v9 = vrot.slane %v529_v63, 2 }
  0x3b   : > { %721 = vst [vmem:[#allocation1 + $0x4] ss:$9 sm:$0xff] %v465_v10  ;;  %v1247_v10 = vperm.slane %v4244_v13, 4 }
  0x3c   : > { %723 = vst [vmem:[#allocation1 + $0x5] ss:$9 sm:$0xff] %v468_v14  ;;  %v534_v14 = vrot.slane %v532_v0, 3 }
  0x3d   : > { %724 = vst [vmem:[#allocation1 + $0x6] ss:$9 sm:$0xff] %v471_v15  ;;  %v541_v15 = vsel %vm403_vm6, %v324_v59, %v384_v62  ;;  %v4326_v18 = vpack.i.bf16 %v1266_v11, %v1247_v10  ;;  %4054 = vset.pattern.permute.xlu2 %v4227_v7 }
  0x3e   : > { %726 = vst [vmem:[#allocation1 + $0x7] ss:$9 sm:$0xff] %v474_v16  ;;  %v543_v21 = vrot.slane %v541_v15, 1  ;;  %v332_v15 = vld [vmem:[%s4235_s16 + $0x5c] sm:$0x1] }
  0x3f   : > { %4050 = vperm.xlu1 %4031, %v4326_v18   ;;  %4062 = vperm.xlu0 %4060, %v4326_v18  }
  0x45   : > { %v727_v28 = vld [vmem:[#allocation1] sm:$0xff]  ;;  %4056 = vperm.xlu2 %4054, %v4326_v18  }
  0x46   : > { %729 = vst [vmem:[#allocation1] ss:$9 sm:$0xff] %v477_v23  ;;  %v546_v23 = vrot.slane %v544_v17, 2 }
  0x47   : > { %731 = vst [vmem:[#allocation1 + $0x1] ss:$9 sm:$0xff] %v480_v25  ;;  %v327_v25 = vld [vmem:[%s4235_s16 + $0x48] sm:$0xf]  ;;  %4067 = vperm.xlu1 %4031, %v4066_v43   ;;  %4077 = vset.pattern.permute.xlu0 %v4213_v3 }
  0x48   : > { %3770 = vmatmul.msk.bf16.gmra.mxu0 %vm847_vm12, %v727_v28  ;;  %732 = vst [vmem:[#allocation1 + $0x2] ss:$9 sm:$0xff] %v483_v29  ;;  %v553_v28 = vsel %vm403_vm6, %v325_v22, %v385_v24  ;;  %v387_v29 = vrot.slane %v327_v25, 3 }
  0x49   : > { %733 = vst [vmem:[#allocation1 + $0x3] ss:$9 sm:$0xff] %v486_v32  ;;  %v559_v32 = vsel %vm411_vm9, %v325_v22, %v385_v24 }
  0x4a   : > { %735 = vst [vmem:[#allocation1 + $0x4] ss:$9 sm:$0xff] %v489_v33  ;;  %v386_v33 = vrot.slane %v326_v27, 3  ;;  %v561_v41 = vrot.slane %v559_v32, 3  ;;  %v568_v42 = vsel %vm403_vm6, %v327_v25, %v387_v29  ;;  %v574_v50 = vsel %vm411_vm9, %v327_v25, %v387_v29 }
  0x4b   : > { %737 = vst [vmem:[#allocation1 + $0x5] ss:$9 sm:$0xff] %v492_v35  ;;  %v552_v35 = vsel %vm399_vm5, %v325_v22, %v385_v24  ;;  %v576_v55 = vrot.slane %v574_v50, 3  ;;  %v336_v50 = vld [vmem:[%s4235_s16 + $0x6c] sm:$0xf] }
  0x4c   : > { %739 = vst [vmem:[#allocation1 + $0x6] ss:$9 sm:$0xff] %v495_v36  ;;  %v555_v36 = vrot.slane %v553_v28, 1  ;;  %v564_v44 = vsel %vm399_vm5, %v326_v27, %v386_v33  ;;  %v333_v28 = vld [vmem:[%s4235_s16 + $0x60] sm:$0xf] }
  0x4d   : > { %740 = vst [vmem:[#allocation1 + $0x7] ss:$9 sm:$0xff] %v498_v37  ;;  %v558_v37 = vrot.slane %v556_v31, 2  ;;  %v334_v31 = vld [vmem:[%s4235_s16 + $0x64] sm:$0xf]  ;;  %1296 = vperm.xlu2 %4054, %v1285_v39  }
  0x4e   : > { %v394_v32 = vrot.slane %v334_v31, 3 }
  0x4f   : > { %4071 = vset.pattern.permute.xlu1 %v4259_v34 }
  0x54   : > { %v741_v49 = vld [vmem:[#allocation1] sm:$0xff] }
  0x55   : > { %743 = vst [vmem:[#allocation1] ss:$9 sm:$0xff] %v501_v45  ;;  %v567_v45 = vsel %vm399_vm5, %v327_v25, %v387_v29  ;;  %1315 = vperm.xlu2 %4054, %v1304_v40  }
  0x56   : > { %745 = vst [vmem:[#allocation1 + $0x1] ss:$9 sm:$0xff] %v504_v46  ;;  %v570_v46 = vrot.slane %v568_v42, 1 }
  0x57   : > { %747 = vst [vmem:[#allocation1 + $0x2] ss:$9 sm:$0xff] %v507_v47  ;;  %v328_v47 = vld [vmem:[%s4235_s16 + $0x4c] sm:$0xf]  ;;  %4073 = vperm.xlu1 %4071, %v4066_v43  }
  0x58   : > { %3771 = vmatmul.msk.bf16.gmra.mxu0 %vm847_vm12, %v741_v49  ;;  %748 = vst [vmem:[#allocation1 + $0x3] ss:$9 sm:$0xff] %v510_v51  ;;  %v388_v48 = vrot.slane %v328_v47, 3  ;;  %v571_v49 = vsel %vm407_vm8, %v327_v25, %v387_v29  ;;  %v329_v51 = vld [vmem:[%s4235_s16 + $0x50] sm:$0x1] }
  0x59   : > { %749 = vst [vmem:[#allocation1 + $0x4] ss:$9 sm:$0xff] %v513_v53  ;;  %v573_v52 = vrot.slane %v571_v49, 2  ;;  %v389_v59 = vrot.slane %v329_v51, 3 }
  0x5a   : > { %751 = vst [vmem:[#allocation1 + $0x5] ss:$9 sm:$0xff] %v516_v54  ;;  %v580_v53 = vsel %vm403_vm6, %v328_v47, %v388_v48  ;;  %v330_v54 = vld [vmem:[%s4235_s16 + $0x54] sm:$0xf]  ;;  %v579_v60 = vsel %vm399_vm5, %v328_v47, %v388_v48 }
  0x5b   : > { %753 = vst [vmem:[#allocation1 + $0x6] ss:$9 sm:$0xff] %v519_v56  ;;  %v583_v56 = vsel %vm407_vm8, %v328_v47, %v388_v48  ;;  %v582_v61 = vrot.slane %v580_v53, 1  ;;  %v390_v62 = vrot.slane %v330_v54, 3  ;;  %v591_v1 = vsel %vm399_vm5, %v329_v51, %v389_v59  ;;  %v335_v51 = vld [vmem:[%s4235_s16 + $0x68] sm:$0x1] }
  0x5c   : > { %755 = vst [vmem:[#allocation1 + $0x7] ss:$9 sm:$0xff] %v522_v57  ;;  %v586_v57 = vsel %vm411_vm9, %v328_v47, %v388_v48  ;;  %v585_v63 = vrot.slane %v583_v56, 2  ;;  %v1152_v48 = vadd.s32 %v1150_v4, %v4227_v7  ;;  %v396_v53 = vrot.slane %v336_v50, 3 }
  0x5d   : > { %v588_v0 = vrot.slane %v586_v57, 3  ;;  %v595_v10 = vsel %vm403_vm6, %v330_v54, %v390_v62  ;;  %v598_v11 = vsel %vm407_vm8, %v330_v54, %v390_v62  ;;  %v601_v2 = vsel %vm411_vm9, %v330_v54, %v390_v62  ;;  %4079 = vset.pattern.permute.xlu2 %v4259_v34 }
  0x5e   : > { %vm1156_vm13 = vcmp.gt.s32.totalorder %v1152_v48, 0  ;;  %vm1158_vm14 = vcmp.lt.s32.totalorder %v1152_v48, 17  ;;  %v395_v4 = vrot.slane %v335_v51, 3  ;;  %v649_v56 = vsel %vm403_vm6, %v336_v50, %v396_v53 }
  0x5f   : > { %4078 = vset.pattern.permute.xlu1 %v4227_v7  ;;  %vm1160_vm15 = vmand %vm1156_vm13, %vm1158_vm14  ;;  %v648_v5 = vsel %vm399_vm5, %v336_v50, %v396_v53 }
  0x60   : > { %vm1163_vm0 = vmand %vm1160_vm15, %vm1161_vm1  ;;  %v645_v59 = vsel %vm399_vm5, %v335_v51, %v395_v4  ;;  %vm2354_vm1 = vcmask 1046528  }
  0x61   : > { %vm1166_vm2 = vmand %vm1163_vm0, %vm1164_vm4  ;;  %vm3642_vm4 = vcmask 60416  }
  0x62   : > { %v4410_v13 = vsel %vm1166_vm2, 1.0, %v4130_v12  ;;  %v651_v12 = vrot.slane %v649_v56, 1 }
  0x63   : > { %v756_v16 = vld [vmem:[#allocation1] sm:$0xff]  ;;  %v1323_v57 = vperm.slane %v4410_v13, 0 }
  0x64   : > { %757 = vst [vmem:[#allocation1] ss:$9 sm:$0xff] %v525_v6  ;;  %v594_v6 = vsel %vm399_vm5, %v330_v54, %v390_v62  ;;  %v337_v54 = vld [vmem:[%s4235_s16 + $0x70] sm:$0xf] }
  0x65   : > { %759 = vst [vmem:[#allocation1 + $0x1] ss:$9 sm:$0xff] %v528_v8  ;;  %v331_v8 = vld [vmem:[%s4235_s16 + $0x58] sm:$0xf]  ;;  %v397_v40 = vrot.slane %v337_v54, 3  ;;  %1328 = vperm.xlu0 %4077, %v1323_v57   ;;  %1340 = vperm.xlu2 %4079, %v1323_v57  }
  0x66   : > { %761 = vst [vmem:[#allocation1 + $0x2] ss:$9 sm:$0xff] %v531_v9  ;;  %v391_v9 = vrot.slane %v331_v8, 3 }
  0x67   : > { %763 = vst [vmem:[#allocation1 + $0x3] ss:$9 sm:$0xff] %v534_v14  ;;  %v597_v14 = vrot.slane %v595_v10, 1  ;;  %1334 = vperm.xlu1 %4078, %v1323_v57   ;;  %v660_v10 = vsel %vm399_vm5, %v337_v54, %v397_v40 }
  0x68   : > { %764 = vst [vmem:[#allocation1 + $0x4] ss:$9 sm:$0xff] %v537_v19  ;;  %3772 = vmatmul.msk.bf16.gmra.mxu0 %vm847_vm12, %v756_v16  ;;  %v600_v16 = vrot.slane %v598_v11, 2  ;;  %v607_v17 = vsel %vm403_vm6, %v331_v8, %v391_v9  ;;  %v603_v19 = vrot.slane %v601_v2, 3  ;;  %v613_v22 = vsel %vm411_vm9, %v331_v8, %v391_v9 }
  0x69   : > { %765 = vst [vmem:[#allocation1 + $0x5] ss:$9 sm:$0xff] %v540_v20  ;;  %v610_v20 = vsel %vm407_vm8, %v331_v8, %v391_v9  ;;  %v606_v24 = vsel %vm399_vm5, %v331_v8, %v391_v9  ;;  %v609_v25 = vrot.slane %v607_v17, 1  ;;  %v615_v27 = vrot.slane %v613_v22, 3 }
  0x6a   : > { %767 = vst [vmem:[#allocation1 + $0x6] ss:$9 sm:$0xff] %v543_v21  ;;  %v612_v26 = vrot.slane %v610_v20, 2  ;;  %v664_v9 = vsel %vm407_vm8, %v337_v54, %v397_v40  ;;  %v4133_v22 = vmov 1414812756  }
  0x6b   : > { %769 = vst [vmem:[#allocation1 + $0x7] ss:$9 sm:$0xff] %v546_v23  ;;  %v392_v23 = vrot.slane %v332_v15, 3 }
  0x6d   : > { %v618_v29 = vsel %vm399_vm5, %v332_v15, %v392_v23  ;;  %v666_v15 = vrot.slane %v664_v9, 2  ;;  %v1400_v23 = vunpack.c.l.s4 %v4133_v22  ;;  %4082 = vset.pattern.permute.xlu0 %v4259_v34  ;;  %4081 = vset.pattern.permute.xlu2 %v4227_v7 }
  0x6f   : > { %4080 = vset.pattern.permute.xlu1 %v4213_v3  ;;  %v4442_v3 = vunpack.c.0.s8 %v1400_v23 }
  0x72   : > { %v770_v38 = vld [vmem:[#allocation1] sm:$0xff] }
  0x73   : > { %772 = vst [vmem:[#allocation1] ss:$9 sm:$0xff] %v549_v30  ;;  %v393_v30 = vrot.slane %v333_v28, 3 }
  0x74   : > { %773 = vst [vmem:[#allocation1 + $0x1] ss:$9 sm:$0xff] %v552_v35 }
  0x75   : > { %775 = vst [vmem:[#allocation1 + $0x2] ss:$9 sm:$0xff] %v555_v36  ;;  %v622_v33 = vsel %vm403_vm6, %v333_v28, %v393_v30  ;;  %v625_v35 = vsel %vm407_vm8, %v333_v28, %v393_v30  ;;  %v628_v36 = vsel %vm411_vm9, %v333_v28, %v393_v30  ;;  %v621_v18 = vsel %vm399_vm5, %v333_v28, %v393_v30  ;;  %v338_v28 = vld [vmem:[%s4235_s16 + $0x74] sm:$0x1] }
  0x76   : > { %777 = vst [vmem:[#allocation1 + $0x3] ss:$9 sm:$0xff] %v558_v37  ;;  %v624_v37 = vrot.slane %v622_v33, 1  ;;  %v630_v43 = vrot.slane %v628_v36, 3  ;;  %v398_v36 = vrot.slane %v338_v28, 3 }
  0x77   : > { %779 = vst [vmem:[#allocation1 + $0x4] ss:$9 sm:$0xff] %v561_v41  ;;  %v634_v41 = vsel %vm403_vm6, %v334_v31, %v394_v32 }
  0x78   : > { %780 = vst [vmem:[#allocation1 + $0x5] ss:$9 sm:$0xff] %v564_v44  ;;  %3773 = vmatmul.msk.bf16.gmra.mxu0 %vm847_vm12, %v770_v38  ;;  %v627_v38 = vrot.slane %v625_v35, 2  ;;  %v637_v44 = vsel %vm407_vm8, %v334_v31, %v394_v32  ;;  %v636_v47 = vrot.slane %v634_v41, 1 }
  0x79   : > { %781 = vst [vmem:[#allocation1 + $0x6] ss:$9 sm:$0xff] %v567_v45  ;;  %v640_v45 = vsel %vm411_vm9, %v334_v31, %v394_v32  ;;  %v639_v39 = vrot.slane %v637_v44, 2 }
  0x7a   : > { %783 = vst [vmem:[#allocation1 + $0x7] ss:$9 sm:$0xff] %v570_v46  ;;  %v633_v46 = vsel %vm399_vm5, %v334_v31, %v394_v32  ;;  %v642_v49 = vrot.slane %v640_v45, 3  ;;  %v667_v32 = vsel %vm411_vm9, %v337_v54, %v397_v40 }
  0x81   : > { %v784_v58 = vld [vmem:[#allocation1] sm:$0xff] }
  0x82   : > { %3774 = vmatmul.msk.bf16.vlgmr.msra.gmra.mxu2 %vm847_vm12, %v784_v58  ;;  %786 = vst [vmem:[#allocation1] ss:$9 sm:$0xff] %v573_v52  ;;  %v652_v58 = vsel %vm407_vm8, %v336_v50, %v396_v53 }
  0x83   : > { %788 = vst [vmem:[#allocation1 + $0x1] ss:$9 sm:$0xff] %v576_v55 }
  0x84   : > { %789 = vst [vmem:[#allocation1 + $0x2] ss:$9 sm:$0xff] %v579_v60  ;;  %v655_v60 = vsel %vm411_vm9, %v336_v50, %v396_v53  ;;  %v1342_v53 = vperm.slane %v4410_v13, 1 }
  0x85   : > { %791 = vst [vmem:[#allocation1 + $0x3] ss:$9 sm:$0xff] %v582_v61  ;;  %v4420_v61 = vld [vmem:[%s5624_s2] ss:$0 sm:$0xff]  ;;  %v657_v8 = vrot.slane %v655_v60, 3 }
  0x86   : > { %793 = vst [vmem:[#allocation1 + $0x4] ss:$9 sm:$0xff] %v585_v63  ;;  %1347 = vperm.xlu1 %4080, %v1342_v53   ;;  %1359 = vperm.xlu0 %4082, %v1342_v53  }
  0x87   : > { %795 = vst [vmem:[#allocation1 + $0x5] ss:$9 sm:$0xff] %v588_v0  ;;  %v654_v0 = vrot.slane %v652_v58, 2  ;;  %1353 = vperm.xlu2 %4081, %v1342_v53  }
  0x88   : > { %796 = vst [vmem:[#allocation1 + $0x6] ss:$9 sm:$0xff] %v591_v1  ;;  %v661_v1 = vsel %vm403_vm6, %v337_v54, %v397_v40 }
  0x89   : > { %797 = vst [vmem:[#allocation1 + $0x7] ss:$9 sm:$0xff] %v594_v6  ;;  %v663_v11 = vrot.slane %v661_v1, 1 }
  0x90   : > { %v798_v21 = vld [vmem:[#allocation1] sm:$0xff] }
  0x91   : > { %800 = vst [vmem:[#allocation1] ss:$9 sm:$0xff] %v597_v14  ;;  %v4403_v55 = vpop.permute.xlu0 %4015  ;;  %v4028_v1 = vpop.permute.xlu1 %4027 }
  0x92   : > { %3775 = vmatmul.msk.bf16.gmra.mxu2 %vm847_vm12, %v798_v21  ;;  %802 = vst [vmem:[#allocation1 + $0x1] ss:$9 sm:$0xff] %v600_v16  ;;  %v4131_v16 = vmov 269488144   ;;  %v4017_v44 = vunpack.i.l.bf16 %v4403_v55  ;;  %v4018_v40 = vunpack.i.h.bf16 %v4403_v55 }
  0x93   : > { %804 = vst [vmem:[#allocation1 + $0x2] ss:$9 sm:$0xff] %v603_v19  ;;  %v1392_v17 = vunpack.c.l.s4 %v4131_v16  ;;  %v4132_v19 = vmov 842150450  }
  0x94   : > { %805 = vst [vmem:[#allocation1 + $0x3] ss:$9 sm:$0xff] %v606_v24  ;;  %v1396_v20 = vunpack.c.l.s4 %v4132_v19  ;;  %v1402_v7 = vperm.slane %v4017_v44, %v4442_v3  ;;  %v4029_v19 = vunpack.i.l.bf16 %v4028_v1 }
  0x95   : > { %807 = vst [vmem:[#allocation1 + $0x4] ss:$9 sm:$0xff] %v609_v25  ;;  %v4134_v25 = vmov 1987475062   ;;  %v4436_v30 = vunpack.c.0.s8 %v1392_v17 }
  0x96   : > { %809 = vst [vmem:[#allocation1 + $0x5] ss:$9 sm:$0xff] %v612_v26  ;;  %v1404_v26 = vunpack.c.l.s4 %v4134_v25  ;;  %v4438_v31 = vunpack.c.0.s8 %v1396_v20 }
  0x97   : > { %811 = vst [vmem:[#allocation1 + $0x6] ss:$9 sm:$0xff] %v615_v27  ;;  %v1394_v56 = vperm.slane %v4017_v44, %v4436_v30 }
  0x98   : > { %812 = vst [vmem:[#allocation1 + $0x7] ss:$9 sm:$0xff] %v618_v29  ;;  %v1398_v60 = vperm.slane %v4017_v44, %v4438_v31 }
  0x9f   : > { %v813_v42 = vld [vmem:[#allocation1] sm:$0xff] }
  0xa0   : > { %814 = vst [vmem:[#allocation1] ss:$9 sm:$0xff] %v621_v18  ;;  %v4445_v18 = vunpack.c.0.s8 %v1404_v26 }
  0xa1   : > { %816 = vst [vmem:[#allocation1 + $0x1] ss:$9 sm:$0xff] %v624_v37  ;;  %v4428_v14 = vpop.permute.xlu0 %4021 }
  0xa2   : > { %3776 = vmatmul.msk.bf16.gmra.mxu2 %vm847_vm12, %v813_v42  ;;  %818 = vst [vmem:[#allocation1 + $0x2] ss:$9 sm:$0xff] %v627_v38  ;;  %v4023_v24 = vunpack.i.l.bf16 %v4428_v14  ;;  %v1406_v55 = vperm.slane %v4017_v44, %v4445_v18  ;;  %v1442_v23 = vperm.slane %v4018_v40, %v4445_v18 }
  0xa3   : > { %820 = vst [vmem:[#allocation1 + $0x3] ss:$9 sm:$0xff] %v630_v43  ;;  %v669_v43 = vrot.slane %v667_v32, 3 }
  0xa4   : > { %821 = vst [vmem:[#allocation1 + $0x4] ss:$9 sm:$0xff] %v633_v46  ;;  %v1410_v34 = vperm.slane %v4023_v24, %v4436_v30  ;;  %v1414_v38 = vperm.slane %v4023_v24, %v4438_v31  ;;  %v1418_v42 = vperm.slane %v4023_v24, %v4442_v3  ;;  %v1422_v46 = vperm.slane %v4023_v24, %v4445_v18 }
  0xa5   : > { %823 = vst [vmem:[#allocation1 + $0x5] ss:$9 sm:$0xff] %v636_v47  ;;  %v885_v52 = vpop.f32.mrf.mxu0 }
  0xa6   : > { %825 = vst [vmem:[#allocation1 + $0x6] ss:$9 sm:$0xff] %v639_v39  ;;  %v886_v21 = vadd.f32 %v4420_v61, %v885_v52 }
  0xa7   : > { %827 = vst [vmem:[#allocation1 + $0x7] ss:$9 sm:$0xff] %v642_v49  ;;  %v672_v49 = vsel %vm399_vm5, %v338_v28, %v398_v36  ;;  %v4030_v28 = vunpack.i.h.bf16 %v4028_v1 }
  0xa8   : > { %v944_v35 = vmax.f32 %v886_v21, 0.0 }
  0xa9   : > { %v1462_v36 = vperm.slane %v4030_v28, %v4436_v30 }
  0xaa   : > { %v967_v39 = vmin.f32 %v944_v35, 6.0  ;;  %v4024_v35 = vunpack.i.h.bf16 %v4428_v14 }
  0xac   : > { %v1014_v13 = vrot.slane %v967_v39, 4  ;;  %v1446_v44 = vperm.slane %v4024_v35, %v4436_v30 }
  0xad   : > { %v887_v62 = vpop.f32.mrf.mxu0 }
  0xae   : > { %v828_v63 = vld [vmem:[#allocation1] sm:$0xff]  ;;  %v888_v6 = vadd.f32 %v4420_v61, %v887_v62  ;;  %v1430_v62 = vperm.slane %v4018_v40, %v4436_v30 }
  0xaf   : > { %829 = vst [vmem:[#allocation1] ss:$9 sm:$0xff] %v645_v59  ;;  %v1013_v59 = vrot.slane %v967_v39, 2 }
  0xb0   : > { %830 = vst [vmem:[#allocation1 + $0x1] ss:$9 sm:$0xff] %v648_v5  ;;  %v945_v2 = vmax.f32 %v888_v6, 0.0  ;;  %v1015_v5 = vrot.slane %v967_v39, 6  ;;  %v1434_v6 = vperm.slane %v4018_v40, %v4438_v31 }
  0xb1   : > { %832 = vst [vmem:[#allocation1 + $0x2] ss:$9 sm:$0xff] %v651_v12 }
  0xb2   : > { %3777 = vmatmul.msk.bf16.gmra.mxu2 %vm847_vm12, %v828_v63  ;;  %834 = vst [vmem:[#allocation1 + $0x3] ss:$9 sm:$0xff] %v654_v0  ;;  %v968_v27 = vmin.f32 %v945_v2, 6.0  ;;  %v1841_v63 = vmul.f32 %v1394_v56, %v967_v39  ;;  %v1844_v16 = vmul.f32 %v1406_v55, %v1015_v5 }
  0xb3   : > { %836 = vst [vmem:[#allocation1 + $0x4] ss:$9 sm:$0xff] %v657_v8  ;;  %v1842_v8 = vmul.f32 %v1398_v60, %v1013_v59 }
  0xb4   : > { %837 = vst [vmem:[#allocation1 + $0x5] ss:$9 sm:$0xff] %v660_v10  ;;  %v1016_v37 = vrot.slane %v968_v27, 2  ;;  %v1017_v41 = vrot.slane %v968_v27, 4  ;;  %v1018_v45 = vrot.slane %v968_v27, 6  ;;  %v1845_v48 = vmul.f32 %v1410_v34, %v968_v27 }
  0xb5   : > { %839 = vst [vmem:[#allocation1 + $0x6] ss:$9 sm:$0xff] %v663_v11  ;;  %v890_v29 = vpop.f32.mrf.mxu0  ;;  %v1438_v10 = vperm.slane %v4018_v40, %v4442_v3  ;;  %v1843_v11 = vmul.f32 %v1402_v7, %v1014_v13  ;;  %v4492_v13 = vld [vmem:[%s5625_s3] sm:$0xff] }
  0xb6   : > { %841 = vst [vmem:[#allocation1 + $0x7] ss:$9 sm:$0xff] %v666_v15  ;;  %v891_v33 = vadd.f32 %v4420_v61, %v890_v29  ;;  %v1846_v51 = vmul.f32 %v1414_v38, %v1016_v37  ;;  %v1847_v54 = vmul.f32 %v1418_v42, %v1017_v41  ;;  %v1848_v57 = vmul.f32 %v1422_v46, %v1018_v45  ;;  %v4040_v42 = vpop.permute.xlu2 %4039 }
  0xb7   : > { %v1426_v29 = vperm.slane %v4029_v19, %v4436_v30  ;;  %v4041_v39 = vunpack.i.l.bf16 %v4040_v42 }
  0xb8   : > { %v946_v47 = vmax.f32 %v891_v33, 0.0 }
  0xb9   : > { %v1482_v59 = vperm.slane %v4041_v39, %v4436_v30 }
  0xba   : > { %v969_v58 = vmin.f32 %v946_v47, 6.0 }
  0xbc   : > { %v1019_v0 = vrot.slane %v969_v58, 2  ;;  %v1020_v9 = vrot.slane %v969_v58, 4  ;;  %v1021_v2 = vrot.slane %v969_v58, 6  ;;  %v1849_v37 = vmul.f32 %v1426_v29, %v969_v58 }
  0xbd   : > { %v842_v50 = vld [vmem:[#allocation1] sm:$0xff]  ;;  %v892_v52 = vpop.f32.mrf.mxu0 }
  0xbe   : > { %844 = vst [vmem:[#allocation1] ss:$9 sm:$0xff] %v669_v43  ;;  %v893_v4 = vadd.f32 %v4420_v61, %v892_v52  ;;  %v1850_v22 = vmul.f32 %v1430_v62, %v1019_v0  ;;  %v1851_v24 = vmul.f32 %v1434_v6, %v1020_v9  ;;  %v1852_v26 = vmul.f32 %v1438_v10, %v1021_v2 }
  0xbf   : > { %845 = vst [vmem:[#allocation1 + $0x1] ss:$9 sm:$0xff] %v672_v49  ;;  %v1490_v0 = vperm.slane %v4041_v39, %v4442_v3  ;;  %v1494_v10 = vperm.slane %v4041_v39, %v4445_v18 }
  0xc0   : > { %2029 = vst [vmem:[#allocation1 + $0x20] ss:$4 sm:$0xff] %v1845_v48  ;;  %v947_v12 = vmax.f32 %v893_v4, 0.0  ;;  %v1450_v48 = vperm.slane %v4024_v35, %v4438_v31 }
  0xc1   : > { %2031 = vst [vmem:[#allocation1 + $0x21] ss:$4 sm:$0xff] %v1846_v51  ;;  %v1454_v51 = vperm.slane %v4024_v35, %v4442_v3 }
  0xc2   : > { %3778 = vmatmul.msk.bf16.gmra.mxu2 %vm847_vm12, %v842_v50  ;;  %2033 = vst [vmem:[#allocation1 + $0x22] ss:$4 sm:$0xff] %v1847_v54  ;;  %v970_v20 = vmin.f32 %v947_v12, 6.0  ;;  %v4034_v50 = vpop.permute.xlu1 %4033  ;;  %v1458_v54 = vperm.slane %v4024_v35, %v4445_v18  ;;  %v1486_v12 = vperm.slane %v4041_v39, %v4438_v31  ;;  %v4530_v35 = vperm.slane %v4492_v13, 2  ;;  %v4046_v39 = vpop.permute.xlu2 %4045 }
  0xc3   : > { %2035 = vst [vmem:[#allocation1 + $0x23] ss:$4 sm:$0xff] %v1848_v57  ;;  %v4479_v53 = vunpack.i.h.bf16 %v4034_v50  ;;  %v4494_v5 = vunpack.i.l.bf16 %v4034_v50 }
  0xc4   : > { %v1853_v32 = vmul.f32 %v1442_v23, %v970_v20  ;;  %v1022_v46 = vrot.slane %v970_v20, 2  ;;  %v1023_v49 = vrot.slane %v970_v20, 4  ;;  %v1024_v52 = vrot.slane %v970_v20, 6 }
  0xc5   : > { %v895_v15 = vpop.f32.mrf.mxu0  ;;  %v1506_v9 = vperm.slane %v4479_v53, %v4438_v31  ;;  %v1510_v19 = vperm.slane %v4479_v53, %v4442_v3  ;;  %v1466_v20 = vperm.slane %v4494_v5, %v4436_v30  ;;  %v1514_v28 = vperm.slane %v4479_v53, %v4445_v18 }
  0xc6   : > { %v846_v17 = vld [vmem:[#allocation1] sm:$0xff]  ;;  %v896_v21 = vadd.f32 %v4420_v61, %v895_v15  ;;  %v1854_v57 = vmul.f32 %v1446_v44, %v1022_v46  ;;  %v1855_v7 = vmul.f32 %v1450_v48, %v1023_v49  ;;  %v1856_v62 = vmul.f32 %v1454_v51, %v1024_v52 }
  0xc7   : > { %2021 = vst [vmem:[#allocation1] ss:$4 sm:$0xff] %v1841_v63  ;;  %v1502_v63 = vperm.slane %v4479_v53, %v4436_v30  ;;  %v1474_v29 = vperm.slane %v4494_v5, %v4442_v3 }
  0xc8   : > { %2023 = vst [vmem:[#allocation1 + $0x1] ss:$4 sm:$0xff] %v1842_v8  ;;  %v948_v25 = vmax.f32 %v896_v21, 0.0  ;;  %v1470_v21 = vperm.slane %v4494_v5, %v4438_v31 }
  0xc9   : > { %2025 = vst [vmem:[#allocation1 + $0x2] ss:$4 sm:$0xff] %v1843_v11  ;;  %v4507_v11 = vperm.slane %v4492_v13, 1 }
  0xca   : > { %2027 = vst [vmem:[#allocation1 + $0x3] ss:$4 sm:$0xff] %v1844_v16  ;;  %v2037_v27 = vld.sshfl [vmem:[#allocation1 + $0x20] sm:$0xff pattern:$0x73625140]  ;;  %v4467_v33 = vmin.f32 %v948_v25, 6.0  ;;  %v4051_v48 = vpop.permute.xlu1 %4050 }
  0xcb   : > { %2040 = vst [vmem:[#allocation1 + $0x20] ss:$4 sm:$0xff] %v1850_v22  ;;  %v4548_v51 = vunpack.i.h.bf16 %v4051_v48 }
  0xcc   : > { %2041 = vst [vmem:[#allocation1 + $0x21] ss:$4 sm:$0xff] %v1851_v24  ;;  %v1025_v38 = vrot.slane %v4467_v33, 2  ;;  %v1857_v8 = vmul.f32 %v1458_v54, %v4467_v33  ;;  %v1026_v23 = vrot.slane %v4467_v33, 4  ;;  %v1027_v24 = vrot.slane %v4467_v33, 6 }
  0xcd   : > { %2042 = vst [vmem:[#allocation1 + $0x22] ss:$4 sm:$0xff] %v1852_v26  ;;  %v897_v34 = vpop.f32.mrf.mxu0 }
  0xce   : > { %2043 = vst [vmem:[#allocation1 + $0x23] ss:$4 sm:$0xff] %v1853_v32  ;;  %v898_v41 = vadd.f32 %v4420_v61, %v897_v34  ;;  %v1858_v14 = vmul.f32 %v1462_v36, %v1025_v38  ;;  %v4527_v32 = vunpack.i.h.bf16 %v4040_v42  ;;  %v1860_v46 = vmul.f32 %v1470_v21, %v1027_v24 }
  0xd0   : > { %v949_v43 = vmax.f32 %v898_v41, 0.0  ;;  %v1478_v41 = vperm.slane %v4494_v5, %v4445_v18  ;;  %v1518_v49 = vperm.slane %v4527_v32, %v4436_v30  ;;  %v1522_v50 = vperm.slane %v4527_v32, %v4438_v31 }
  0xd1   : > { %v2036_v45 = vld.sshfl [vmem:[#allocation1] sm:$0xff pattern:$0x73625140] }
  0xd2   : > { %3779 = vmatmul.msk.bf16.gmra.mxu2 %vm847_vm12, %v846_v17  ;;  %2038 = vst [vmem:[#allocation1] ss:$4 sm:$0xff] %v1849_v37  ;;  %v4475_v47 = vmin.f32 %v949_v43, 6.0  ;;  %v4484_v56 = vpack.c.bf16 %v2037_v27, %v2036_v45  ;;  %v4541_v43 = vperm.slane %v4492_v13, 0  ;;  %v1859_v45 = vmul.f32 %v1466_v20, %v1026_v23 }
  0xd4   : > { %v1029_v58 = vrot.slane %v4475_v47, 4  ;;  %v1030_v55 = vrot.slane %v4475_v47, 6  ;;  %3855 = vst [vmem:[#allocation2] sm:$0xff] %v4484_v56   ;;  %v3878_v16 = vunpack.c.l.bf16 %v4484_v56  ;;  %v3879_v17 = vunpack.c.h.bf16 %v4484_v56 }
  0xd5   : > { %v4482_v4 = vld.sshfl [vmem:[#allocation1 + $0x20] sm:$0xff pattern:$0x73625140]  ;;  %v900_v40 = vpop.f32.mrf.mxu0 }
  0xd6   : > { %2049 = vst [vmem:[#allocation1 + $0x20] ss:$4 sm:$0xff] %v1858_v14  ;;  %v901_v60 = vadd.f32 %v4420_v61, %v900_v40  ;;  %v1863_v2 = vmul.f32 %v1482_v59, %v1029_v58  ;;  %v1864_v22 = vmul.f32 %v1486_v12, %v1030_v55  ;;  %v2306_v36 = vmul.f32 %v3878_v16, %v4507_v11 }
  0xd7   : > { %v4534_v37 = vmul.f32 %v3879_v17, %v4507_v11  ;;  %v2181_v42 = vpack.c.bf16 %v4482_v4, %v4482_v4  ;;  %v1028_v14 = vrot.slane %v4475_v47, 2  ;;  %v4553_v56 = vmul.f32 %v3879_v17, %v4530_v35 }
  0xd8   : > { %v950_v1 = vmax.f32 %v901_v60, 0.0  ;;  %v2355_v4 = vrot.slane %v2306_v36, 1  ;;  %v1526_v58 = vperm.slane %v4527_v32, %v4442_v3  ;;  %v4047_v60 = vunpack.i.l.bf16 %v4046_v39 }
  0xd9   : > { %v2039_v6 = vld.sshfl [vmem:[#allocation1] sm:$0xff pattern:$0x73625140]  ;;  %v2356_v40 = vrot.slane %v4534_v37, 1  ;;  %2211 = vst [vmem:[#allocation2 + $0xc] sm:$0xf] %v2181_v42  ;;  %v1862_v5 = vmul.f32 %v1478_v41, %v1028_v14  ;;  %v1530_v55 = vperm.slane %v4527_v32, %v4445_v18  ;;  %v4561_v12 = vunpack.i.l.bf16 %v4051_v48 }
  0xda   : > { %2045 = vst [vmem:[#allocation1] ss:$4 sm:$0xff] %v1854_v57  ;;  %v4509_v15 = vmin.f32 %v950_v1, 6.0  ;;  %v2180_v33 = vpack.c.bf16 %v2039_v6, %v2039_v6  ;;  %v1861_v57 = vmul.f32 %v1474_v29, %v4475_v47  ;;  %v1574_v47 = vperm.slane %v4548_v51, %v4436_v30 }
  0xdb   : > { %2046 = vst [vmem:[#allocation1 + $0x1] ss:$4 sm:$0xff] %v1855_v7  ;;  %v2427_v38 = vld [vmem:[#allocation2] sm:$0xe]  ;;  %v4567_v1 = vmul.f32 %v3879_v17, %v4541_v43  ;;  %v4048_v6 = vunpack.i.h.bf16 %v4046_v39  ;;  %v1498_v17 = vperm.slane %v4047_v60, %v4436_v30  ;;  %v1546_v29 = vperm.slane %v4561_v12, %v4442_v3 }
  0xdc   : > { %2047 = vst [vmem:[#allocation1 + $0x2] ss:$4 sm:$0xff] %v1856_v62  ;;  %v1031_v25 = vrot.slane %v4509_v15, 2  ;;  %v1865_v26 = vmul.f32 %v1490_v0, %v4509_v15  ;;  %v2435_v44 = vunpack.c.l.bf16 %v2427_v38  ;;  %v1033_v59 = vrot.slane %v4509_v15, 6 }
  0xdd   : > { %2048 = vst [vmem:[#allocation1 + $0x3] ss:$4 sm:$0xff] %v1857_v8  ;;  %v2051_v27 = vld.sshfl [vmem:[#allocation1 + $0x20] sm:$0xff pattern:$0x73625140]  ;;  %v2273_v0 = vmul.f32 %v3878_v16, %v4541_v43  ;;  %v1032_v16 = vrot.slane %v4509_v15, 4  ;;  %v1538_v15 = vperm.slane %v4561_v12, %v4436_v30  ;;  %v4595_v36 = vperm.slane %v4048_v6, %v4436_v30 }
  0xde   : > { %2056 = vst [vmem:[#allocation1 + $0x20] ss:$4 sm:$0xff] %v1863_v2  ;;  %v1866_v34 = vmul.f32 %v1494_v10, %v1031_v25  ;;  %v2444_v52 = vmul.f32 %v4530_v35, %v2435_v44  ;;  %v2183_v54 = vpack.c.bf16 %v2051_v27, %v2051_v27  ;;  %v2357_v10 = vsel %vm2354_vm1, %v2355_v4, %v2356_v40 }
  0xdf   : > { %2057 = vst [vmem:[#allocation1 + $0x21] ss:$4 sm:$0xff] %v1864_v22  ;;  %v2494_v2 = vrot.slane %v4553_v56, 2  ;;  %v1868_v20 = vmul.f32 %v1502_v63, %v1033_v59  ;;  %v902_v22 = vpop.f32.mrf.mxu0  ;;  %v1586_v25 = vperm.slane %v4548_v51, %v4445_v18  ;;  %v1542_v27 = vperm.slane %v4561_v12, %v4438_v31  ;;  %v3849_v56 = vld [vmem:[%s5627_s5 + $0x30] sm:$0xff] }
  0xe0   : > { %2058 = vst [vmem:[#allocation1 + $0x22] ss:$4 sm:$0xff] %v1865_v26  ;;  %v2493_v62 = vrot.slane %v2444_v52, 2  ;;  %v903_v26 = vadd.f32 %v4420_v61, %v902_v22  ;;  %v1550_v38 = vperm.slane %v4561_v12, %v4445_v18  ;;  %v1867_v44 = vmul.f32 %v1498_v17, %v1032_v16  ;;  %v2768_v48 = vld [vmem:[#allocation2 + $0xc] sm:$0xe] }
  0xe1   : > { %2059 = vst [vmem:[#allocation1 + $0x23] ss:$4 sm:$0xff] %v1866_v34  ;;  %v4600_v14 = vperm.slane %v4492_v13, 3  ;;  %v4605_v52 = vperm.slane %v4492_v13, 5  ;;  %v4612_v59 = vperm.slane %v4492_v13, 4 }
  0xe2   : > { %2210 = vst [vmem:[#allocation2 + $0x8] sm:$0x1] %v2180_v33  ;;  %v2495_v63 = vsel %vm2492_vm3, %v2493_v62, %v2494_v2  ;;  %v2411_v33 = vadd.f32 %v2357_v10, %v2273_v0  ;;  %v951_v41 = vmax.f32 %v903_v26, 0.0  ;;  %v2776_v62 = vunpack.c.l.bf16 %v2768_v48 }
  0xe3   : > { %2213 = vst [vmem:[#allocation2 + $0x14] sm:$0x1] %v2183_v54 }
  0xe4   : > { %v2050_v7 = vld.sshfl [vmem:[#allocation1] sm:$0xff pattern:$0x73625140]  ;;  %v974_v54 = vmin.f32 %v951_v41, 6.0 }
  0xe5   : > { %2052 = vst [vmem:[#allocation1] ss:$4 sm:$0xff] %v1859_v45  ;;  %v2182_v8 = vpack.c.bf16 %v2050_v7, %v2050_v7  ;;  %v4068_v45 = vpop.permute.xlu1 %4067 }
  0xe6   : > { %2053 = vst [vmem:[#allocation1 + $0x1] ss:$4 sm:$0xff] %v1860_v46  ;;  %v2549_v46 = vadd.f32 %v2495_v63, %v2411_v33  ;;  %v4607_v4 = vunpack.i.h.bf16 %v4068_v45  ;;  %v1034_v0 = vrot.slane %v974_v54, 2  ;;  %v1035_v6 = vrot.slane %v974_v54, 4 }
  0xe7   : > { %2054 = vst [vmem:[#allocation1 + $0x2] ss:$4 sm:$0xff] %v1861_v57  ;;  %v4609_v57 = vunpack.i.l.bf16 %v4068_v45  ;;  %v1869_v10 = vmul.f32 %v1506_v9, %v974_v54  ;;  %v905_v63 = vpop.f32.mrf.mxu0 }
  0xe8   : > { %2055 = vst [vmem:[#allocation1 + $0x3] ss:$4 sm:$0xff] %v1862_v5  ;;  %v2061_v23 = vld.sshfl [vmem:[#allocation1 + $0x20] sm:$0xff pattern:$0x73625140]  ;;  %v1871_v9 = vmul.f32 %v1514_v28, %v1035_v6  ;;  %v906_v53 = vadd.f32 %v4420_v61, %v905_v63  ;;  %v4657_v63 = vmul.f32 %v4605_v52, %v2776_v62 }
  0xe9   : > { %2064 = vst [vmem:[#allocation1 + $0x20] ss:$4 sm:$0xff] %v1868_v20  ;;  %v2289_v34 = vld [vmem:[#allocation2 + $0x8] sm:$0x1] }
  0xea   : > { %2212 = vst [vmem:[#allocation2 + $0x10] sm:$0xf] %v2182_v8  ;;  %v2297_v42 = vunpack.c.l.bf16 %v2289_v34  ;;  %v4602_v39 = vld [vmem:[#allocation2 + $0x14] sm:$0x1]  ;;  %v1036_v8 = vrot.slane %v974_v54, 6  ;;  %v1870_v34 = vmul.f32 %v1510_v19, %v1034_v0  ;;  %v952_v6 = vmax.f32 %v906_v53, 0.0 }
  0xeb   : > { %v2639_v5 = vunpack.c.l.bf16 %v4602_v39  ;;  %2065 = vst [vmem:[#allocation1 + $0x21] ss:$4 sm:$0xff] %v1869_v10 }
  0xec   : > { %v2308_v60 = vmul.f32 %v4507_v11, %v2297_v42  ;;  %v2446_v7 = vmul.f32 %v4530_v35, %v2297_v42  ;;  %v1872_v33 = vmul.f32 %v1518_v49, %v1036_v8  ;;  %2066 = vst [vmem:[#allocation1 + $0x22] ss:$4 sm:$0xff] %v1870_v34  ;;  %v3850_v49 = vld [vmem:[%s5627_s5 + $0x38] sm:$0xff]  ;;  %v4057_v8 = vpop.permute.xlu2 %4056  ;;  %v975_v34 = vmin.f32 %v952_v6, 6.0 }
  0xed   : > { %2067 = vst [vmem:[#allocation1 + $0x23] ss:$4 sm:$0xff] %v1871_v9  ;;  %v4654_v26 = vmul.f32 %v4612_v59, %v2639_v5  ;;  %3429 = vmatpush.bf16.msra.mxu1 %v3850_v49  ;;  %3959 = vmatpush.bf16.msra.mxu3 %v3850_v49  ;;  %v4673_v37 = vunpack.i.h.bf16 %v4057_v8 }
  0xee   : > { %v2358_v48 = vrot.slane %v2308_v60, 1  ;;  %v2496_v54 = vrot.slane %v2446_v7, 2  ;;  %v1038_v6 = vrot.slane %v975_v34, 4 }
  0xef   : > { %v2060_v20 = vld.sshfl [vmem:[#allocation1] sm:$0xff pattern:$0x73625140]  ;;  %v907_v49 = vpop.f32.mrf.mxu0 }
  0xf0   : > { %2062 = vst [vmem:[#allocation1] ss:$4 sm:$0xff] %v1867_v44  ;;  %v4649_v45 = vpack.c.bf16 %v2061_v23, %v2060_v20  ;;  %v2359_v23 = vsel %vm2354_vm1, %v2356_v40, %v2358_v48  ;;  %v2497_v60 = vsel %vm2492_vm3, %v2494_v2, %v2496_v54  ;;  %v4675_v40 = vunpack.i.l.bf16 %v4057_v8 }
  0xf1   : > { %v2566_v28 = vld [vmem:[#allocation2 + $0xc] sm:$0xff]   ;;  %v2412_v62 = vadd.f32 %v2359_v23, %v4567_v1  ;;  %v1037_v54 = vrot.slane %v975_v34, 2  ;;  %v1039_v1 = vrot.slane %v975_v34, 6  ;;  %v1590_v8 = vperm.slane %v4673_v37, %v4436_v30  ;;  %3430 = vmatpush.bf16.msra.mxu1 %v3849_v56  ;;  %3960 = vmatpush.bf16.msra.mxu3 %v3849_v56 }
  0xf2   : > { %v2582_v0 = vunpack.c.l.bf16 %v2566_v28  ;;  %v2583_v10 = vunpack.c.h.bf16 %v2566_v28  ;;  %3940 = vst [vmem:[#allocation2 + $0x18] sm:$0xff] %v4649_v45   ;;  %v4668_v20 = vunpack.c.l.bf16 %v4649_v45  ;;  %v1594_v23 = vperm.slane %v4673_v37, %v4438_v31 }
  0xf3   : > { %v1874_v22 = vmul.f32 %v1526_v58, %v1037_v54  ;;  %v1558_v16 = vperm.slane %v4675_v40, %v4438_v31  ;;  %v1562_v19 = vperm.slane %v4675_v40, %v4442_v3  ;;  %v1566_v58 = vperm.slane %v4675_v40, %v4445_v18  ;;  %v4063_v54 = vpop.permute.xlu0 %4062 }
  0xf4   : > { %v2599_v7 = vmul.f32 %v4600_v14, %v2582_v0  ;;  %v2600_v9 = vmul.f32 %v4600_v14, %v2583_v10  ;;  %v2648_v53 = vmul.f32 %v4612_v59, %v2582_v0  ;;  %v2649_v28 = vmul.f32 %v4612_v59, %v2583_v10  ;;  %v4701_v17 = vld.sshfl [vmem:[#allocation1 + $0x20] sm:$0xff pattern:$0x73625140] }
  0xf5   : > { %v1873_v0 = vmul.f32 %v1522_v50, %v975_v34  ;;  %v1875_v50 = vmul.f32 %v1530_v55, %v1038_v6  ;;  %v1554_v34 = vperm.slane %v4675_v40, %v4436_v30  ;;  %v908_v32 = vadd.f32 %v4420_v61, %v907_v49  ;;  %v3848_v55 = vld [vmem:[%s5627_s5 + $0x28] sm:$0xff] }
  0xf6   : > { %v2615_v2 = vadd.f32 %v2599_v7, %v2549_v46  ;;  %v1598_v46 = vperm.slane %v4673_v37, %v4442_v3  ;;  %v2697_v44 = vrot.slane %v2649_v28, 1  ;;  %v4065_v41 = vunpack.i.h.bf16 %v4063_v54  ;;  %3431 = vmatpush.bf16.msra.mxu1 %v3848_v55  ;;  %3961 = vmatpush.bf16.msra.mxu3 %v3848_v55 }
  0xf7   : > { %v2063_v48 = vld.sshfl [vmem:[#allocation1] sm:$0xff pattern:$0x73625140]  ;;  %v953_v42 = vmax.f32 %v908_v32, 0.0  ;;  %v2699_v7 = vrot.slane %v4654_v26, 1  ;;  %v2786_v49 = vmul.f32 %v4605_v52, %v2583_v10 }
  0xf8   : > { %2069 = vst [vmem:[#allocation1] ss:$4 sm:$0xff] %v1872_v33  ;;  %v1876_v33 = vmul.f32 %v4595_v36, %v1039_v1  ;;  %v4713_v36 = vpop.permute.xlu2 %1296  ;;  %v2186_v6 = vpack.c.bf16 %v2063_v48, %v2063_v48  ;;  %v2550_v1 = vadd.f32 %v2497_v60, %v2412_v62  ;;  %v2833_v60 = vrot.slane %v4657_v63, 2  ;;  %v3847_v10 = vld [vmem:[%s5627_s5 + $0x20] sm:$0xff]  ;;  %v910_v63 = vpop.f32.mrf.mxu0 }
  0xf9   : > { %2070 = vst [vmem:[#allocation1 + $0x1] ss:$4 sm:$0xff] %v1873_v0  ;;  %v2696_v0 = vrot.slane %v2648_v53, 1  ;;  %v976_v62 = vmin.f32 %v953_v42, 6.0  ;;  %v1626_v53 = vperm.slane %v4713_v36, %v4436_v30  ;;  %v1630_v56 = vperm.slane %v4713_v36, %v4438_v31 }
  0xfa   : > { %2071 = vst [vmem:[#allocation1 + $0x2] ss:$4 sm:$0xff] %v1874_v22  ;;  %v2616_v24 = vadd.f32 %v2600_v9, %v2550_v1  ;;  %v2787_v22 = vmul.f32 %v4605_v52, %v2639_v5  ;;  %v1634_v26 = vperm.slane %v4713_v36, %v4442_v3  ;;  %v1638_v39 = vperm.slane %v4713_v36, %v4445_v18 }
  0xfb   : > { %2072 = vst [vmem:[#allocation1 + $0x3] ss:$4 sm:$0xff] %v1875_v50  ;;  %v2698_v21 = vsel %vm2354_vm1, %v2696_v0, %v2697_v44  ;;  %v4734_v5 = vperm.slane %v4065_v41, %v4436_v30  ;;  %v4064_v42 = vunpack.i.l.bf16 %v4063_v54  ;;  %v2700_v9 = vsel %vm2354_vm1, %v2697_v44, %v2699_v7  ;;  %3432 = vmatpush.bf16.msra.mxu1 %v3847_v10 }
  0xfc   : > { %2073 = vst [vmem:[#allocation1 + $0x20] ss:$4 sm:$0xff] %v1876_v33  ;;  %v1040_v28 = vrot.slane %v976_v62, 2  ;;  %v1041_v48 = vrot.slane %v976_v62, 4  ;;  %v1042_v50 = vrot.slane %v976_v62, 6  ;;  %v1877_v33 = vmul.f32 %v1538_v15, %v976_v62  ;;  %v3846_v15 = vld [vmem:[%s5627_s5 + $0x18] sm:$0xff]  ;;  %3962 = vmatpush.bf16.msra.mxu3 %v3847_v10 }
  0xfd   : > { %2216 = vst [vmem:[#allocation2 + $0x20] sm:$0x1] %v2186_v6  ;;  %v4741_v32 = vperm.slane %v4064_v42, %v4436_v30  ;;  %v911_v6 = vadd.f32 %v4420_v61, %v910_v63  ;;  %v2752_v1 = vadd.f32 %v2698_v21, %v2615_v2  ;;  %v2753_v41 = vadd.f32 %v2700_v9, %v2616_v24 }
  0xfe   : > { %v1878_v54 = vmul.f32 %v1542_v27, %v1040_v28  ;;  %v1879_v44 = vmul.f32 %v1546_v29, %v1041_v48  ;;  %v1880_v7 = vmul.f32 %v1550_v38, %v1042_v50  ;;  %v2834_v55 = vrot.slane %v2786_v49, 2  ;;  %v4783_v28 = vld [vmem:[%s5625_s3 + $0x8] ss:$0 sm:$0xff] }
  0xff   : > { %v954_v24 = vmax.f32 %v911_v6, 0.0  ;;  %v2836_v27 = vrot.slane %v2787_v22, 2  ;;  %v4761_v0 = vunpack.c.h.bf16 %v4649_v45  ;;  %v4764_v29 = vperm.slane %v4492_v13, 6  ;;  %3433 = vmatpush.bf16.msra.mxu1 %v3846_v15 }
 0x100   : > { %v4758_v2 = vpop.permute.xlu2 %1315  ;;  %v2835_v42 = vsel %vm2492_vm3, %v2833_v60, %v2834_v55  ;;  %v3845_v60 = vld [vmem:[%s5627_s5 + $0x10] sm:$0xff]  ;;  %3963 = vmatpush.bf16.msra.mxu3 %v3846_v15  ;;  %v4810_v15 = vperm.slane %v4492_v13, 7 }
 0x101   : > { %v977_v45 = vmin.f32 %v954_v24, 6.0  ;;  %v2837_v10 = vsel %vm2492_vm3, %v2834_v55, %v2836_v27  ;;  %v2939_v63 = vmul.f32 %v4668_v20, %v4764_v29  ;;  %v2889_v50 = vadd.f32 %v2835_v42, %v2752_v1 }
 0x102   : > { %v4756_v21 = vld.sshfl [vmem:[#allocation1] sm:$0xff pattern:$0x73625140]  ;;  %v2988_v40 = vmul.f32 %v4668_v20, %v4810_v15 }
 0x103   : > { %2076 = vst [vmem:[#allocation1] ss:$4 sm:$0xff] %v1877_v33  ;;  %v2890_v33 = vadd.f32 %v2837_v10, %v2753_v41  ;;  %v1043_v55 = vrot.slane %v977_v45, 2  ;;  %v1044_v24 = vrot.slane %v977_v45, 4  ;;  %v1045_v27 = vrot.slane %v977_v45, 6  ;;  %3434 = vmatpush.bf16.msra.mxu1 %v3845_v60 }
 0x104   : > { %2077 = vst [vmem:[#allocation1 + $0x1] ss:$4 sm:$0xff] %v1878_v54  ;;  %v4778_v9 = vld [vmem:[#allocation2 + $0x20] sm:$0x1]  ;;  %v4790_v54 = vld [vmem:[#allocation2 + $0x18] sm:$0xe]  ;;  %v2940_v41 = vmul.f32 %v4761_v0, %v4764_v29  ;;  %v2955_v42 = vadd.f32 %v2939_v63, %v2889_v50  ;;  %3964 = vmatpush.bf16.msra.mxu3 %v3845_v60 }
 0x105   : > { %v915_v62 = vpop.f32.mrf.mxu2  ;;  %2078 = vst [vmem:[#allocation1 + $0x2] ss:$4 sm:$0xff] %v1879_v44  ;;  %v2979_v6 = vunpack.c.l.bf16 %v4778_v9  ;;  %v912_v44 = vpop.f32.mrf.mxu0  ;;  %v4795_v49 = vld.sshfl [vmem:[#allocation1 + $0x20] sm:$0xff pattern:$0x73625140]  ;;  %v1883_v10 = vmul.f32 %v1562_v19, %v1044_v24  ;;  %v3844_v63 = vld [vmem:[%s5627_s5 + $0x8] sm:$0xff]  ;;  %v3116_v50 = vunpack.c.l.bf16 %v4790_v54 }
 0x106   : > { %v916_v48 = vadd.f32 %v4420_v61, %v915_v62  ;;  %2079 = vst [vmem:[#allocation1 + $0x3] ss:$4 sm:$0xff] %v1880_v7  ;;  %v1881_v62 = vmul.f32 %v1554_v34, %v977_v45  ;;  %v913_v1 = vadd.f32 %v4420_v61, %v912_v44  ;;  %v1882_v7 = vmul.f32 %v1558_v16, %v1043_v55  ;;  %v4074_v19 = vpop.permute.xlu1 %4073  ;;  %v3843_v60 = vld [vmem:[%s5627_s5] sm:$0xff] }
 0x107   : > { %v1884_v34 = vmul.f32 %v1566_v58, %v1045_v27  ;;  %v2956_v16 = vadd.f32 %v2940_v41, %v2890_v33  ;;  %v2989_v58 = vmul.f32 %v4761_v0, %v4810_v15  ;;  %v2990_v13 = vmul.f32 %v4810_v15, %v2979_v6  ;;  %2082 = vst [vmem:[#allocation1 + $0x22] ss:$4 sm:$0xff] %v1883_v10 }
 0x108   : > { %v956_v22 = vmax.f32 %v916_v48, 0.0  ;;  %2080 = vst [vmem:[#allocation1 + $0x20] ss:$4 sm:$0xff] %v1881_v62  ;;  %v955_v48 = vmax.f32 %v913_v1, 0.0  ;;  %v4075_v44 = vunpack.i.l.bf16 %v4074_v19  ;;  %v3036_v1 = vrot.slane %v2988_v40, 1  ;;  %3435 = vmatpush.bf16.msra.mxu1 %v3844_v63  ;;  %3965 = vmatpush.bf16.msra.mxu3 %v3844_v63 }
 0x109   : > { %2081 = vst [vmem:[#allocation1 + $0x21] ss:$4 sm:$0xff] %v1882_v7  ;;  %v3037_v41 = vrot.slane %v2989_v58, 1  ;;  %v4076_v40 = vunpack.i.h.bf16 %v4074_v19  ;;  %v3125_v63 = vmul.f32 %v4783_v28, %v3116_v50 }
 0x10a   : > { %v979_v45 = vmin.f32 %v956_v22, 6.0  ;;  %v4825_v22 = vmul.f32 %v4783_v28, %v4761_v0  ;;  %2083 = vst [vmem:[#allocation1 + $0x23] ss:$4 sm:$0xff] %v1884_v34  ;;  %v978_v62 = vmin.f32 %v955_v48, 6.0 }
 0x10b   : > { %v3038_v58 = vsel %vm2354_vm1, %v3036_v1, %v3037_v41 }
 0x10c   : > { %v1049_v55 = vrot.slane %v979_v45, 2  ;;  %v1050_v33 = vrot.slane %v979_v45, 4  ;;  %v1051_v24 = vrot.slane %v979_v45, 6  ;;  %v1889_v54 = vmul.f32 %v1586_v25, %v979_v45  ;;  %3436 = vmatpush.bf16.msra.mxu1 %v3843_v60  ;;  %3966 = vmatpush.bf16.msra.mxu3 %v3843_v60 }
 0x10d   : > { %v917_v27 = vpop.f32.mrf.mxu2  ;;  %v1046_v10 = vrot.slane %v978_v62, 2  ;;  %v1047_v34 = vrot.slane %v978_v62, 4  ;;  %v1048_v45 = vrot.slane %v978_v62, 6 }
 0x10e   : > { %v918_v7 = vadd.f32 %v4420_v61, %v917_v27  ;;  %v4834_v38 = vmul.f32 %v1590_v8, %v1049_v55  ;;  %v4839_v12 = vmul.f32 %v1594_v23, %v1050_v33  ;;  %v4844_v25 = vmul.f32 %v1598_v46, %v1051_v24 }
 0x10f   : > { %v4850_v8 = vmul.f32 %v4741_v32, %v978_v62  ;;  %v4853_v23 = vperm.slane %v4075_v44, %v4436_v30  ;;  %v1886_v46 = vmul.f32 %v1574_v47, %v1046_v10  ;;  %v5630_v55 = vperm.slane %v4548_v51, %v4438_v31 }
 0x110   : > { %v957_v48 = vmax.f32 %v918_v7, 0.0  ;;  %v5631_v32 = vperm.slane %v4548_v51, %v4442_v3  ;;  %v3039_v27 = vrot.slane %v2990_v13, 1  ;;  %v4866_v62 = vperm.slane %v4076_v40, %v4436_v30  ;;  %v2242_v13 = vld [vmem:[#allocation2 + $0xc] sm:$0xff]  }
 0x111   : > { %v1887_v33 = vmul.f32 %v5630_v55, %v1047_v34  ;;  %v3092_v44 = vadd.f32 %v3038_v58, %v2955_v42  ;;  %v3127_v47 = vmul.f32 %v4783_v28, %v2979_v6  ;;  %v3174_v7 = vrot.slane %v4825_v22, 2  ;;  %v2428_v40 = vld [vmem:[#allocation2 + $0xc] sm:$0xe] }
 0x112   : > { %v1888_v24 = vmul.f32 %v5631_v32, %v1048_v45  ;;  %v980_v19 = vmin.f32 %v957_v48, 6.0  ;;  %v3040_v1 = vsel %vm2354_vm1, %v3037_v41, %v3039_v27  ;;  %v2187_v51 = vpack.c.bf16 %v4701_v17, %v4701_v17  ;;  %v4881_v48 = vld.sshfl [vmem:[#allocation1 + $0x20] sm:$0xff pattern:$0x73625140] }
 0x113   : > { %v5632_v45 = vperm.slane %v4673_v37, %v4445_v18  ;;  %2091 = vst [vmem:[#allocation1 + $0x23] ss:$4 sm:$0xff] %v1889_v54  ;;  %v3093_v6 = vadd.f32 %v3040_v1, %v2956_v16  ;;  %v3173_v41 = vrot.slane %v3125_v63, 2  ;;  %v3176_v22 = vrot.slane %v3127_v47, 2  ;;  %v2290_v54 = vld [vmem:[#allocation2 + $0x14] sm:$0x1] }
 0x114   : > { %v1053_v10 = vrot.slane %v980_v19, 4  ;;  %v1054_v34 = vrot.slane %v980_v19, 6  ;;  %v1052_v50 = vrot.slane %v980_v19, 2  ;;  %v2188_v17 = vpack.c.bf16 %v4756_v21, %v4756_v21  ;;  %2088 = vst [vmem:[#allocation1 + $0x20] ss:$4 sm:$0xff] %v1886_v46 }
 0x115   : > { %v4879_v42 = vmul.f32 %v5632_v45, %v980_v19  ;;  %v920_v9 = vpop.f32.mrf.mxu2  ;;  %v5633_v58 = vperm.slane %v4609_v57, %v4436_v30  ;;  %v5634_v37 = vperm.slane %v4609_v57, %v4438_v31  ;;  %v4900_v21 = vld [vmem:[%s5626_s4] ss:$0 sm:$0xff]  ;;  %2089 = vst [vmem:[#allocation1 + $0x21] ss:$4 sm:$0xff] %v1887_v33  ;;  %v3175_v27 = vsel %vm2492_vm3, %v3173_v41, %v3174_v7 }
 0x116   : > { %v921_v60 = vadd.f32 %v4420_v61, %v920_v9  ;;  %v1894_v16 = vmul.f32 %v4734_v5, %v1052_v50  ;;  %v3177_v19 = vsel %vm2492_vm3, %v3174_v7, %v3176_v22  ;;  %v2189_v63 = vpack.c.bf16 %v4795_v49, %v4795_v49  ;;  %2090 = vst [vmem:[#allocation1 + $0x22] ss:$4 sm:$0xff] %v1888_v24 }
 0x117   : > { %v4888_v55 = vmul.f32 %v5633_v58, %v1053_v10  ;;  %v4893_v32 = vmul.f32 %v5634_v37, %v1054_v34  ;;  %v2258_v1 = vunpack.c.l.bf16 %v2242_v13  ;;  %v3229_v61 = vadd.f32 %v3175_v27, %v3092_v44  ;;  %2217 = vst [vmem:[#allocation2 + $0x24] sm:$0xf] %v2187_v51 }
 0x118   : > { %v958_v47 = vmax.f32 %v921_v60, 0.0  ;;  %v3230_v5 = vadd.f32 %v3177_v19, %v3093_v6  ;;  %v2259_v46 = vunpack.c.h.bf16 %v2242_v13  ;;  %v2298_v34 = vunpack.c.l.bf16 %v2290_v54  ;;  %2218 = vst [vmem:[#allocation2 + $0x28] sm:$0xf] %v2188_v17 }
 0x119   : > { %v2275_v10 = vmul.f32 %v4541_v43, %v2258_v1  ;;  %v2309_v45 = vmul.f32 %v4507_v11, %v2258_v1  ;;  %v2436_v33 = vunpack.c.l.bf16 %v2428_v40  ;;  %v3249_v9 = vadd.f32 %v4900_v21, %v3229_v61  ;;  %2219 = vst [vmem:[#allocation2 + $0x2c] sm:$0x1] %v2189_v63  ;;  %v4933_v61 = vld [vmem:[%s5624_s2] ss:$0 sm:$0xff] }
 0x11a   : > { %v981_v50 = vmin.f32 %v958_v47, 6.0  ;;  %v3250_v7 = vadd.f32 %v4900_v21, %v3230_v5  ;;  %v2276_v49 = vmul.f32 %v4541_v43, %v2259_v46  ;;  %v2310_v24 = vmul.f32 %v4507_v11, %v2259_v46 }
 0x11b   : > { %v2311_v44 = vmul.f32 %v4507_v11, %v2298_v34  ;;  %v2360_v51 = vrot.slane %v2309_v45, 1  ;;  %v2447_v13 = vmul.f32 %v4530_v35, %v2436_v33  ;;  %v5635_v40 = vperm.slane %v4609_v57, %v4442_v3 }
 0x11c   : > { %v1055_v6 = vrot.slane %v981_v50, 2  ;;  %v1056_v41 = vrot.slane %v981_v50, 4  ;;  %v1057_v22 = vrot.slane %v981_v50, 6  ;;  %v3265_v17 = vmax.f32 %v3249_v9, 0.0 }
 0x11d   : > { %v4917_v58 = vmul.f32 %v5635_v40, %v981_v50  ;;  %v922_v37 = vpop.f32.mrf.mxu2  ;;  %v3266_v60 = vmax.f32 %v3250_v7, 0.0  ;;  %v2361_v54 = vrot.slane %v2310_v24, 1  ;;  %v2363_v27 = vrot.slane %v2311_v44, 1  ;;  %v4936_v45 = vld.sshfl [vmem:[#allocation1 + $0x20] sm:$0xff pattern:$0x73625140] }
 0x11e   : > { %v5636_v19 = vperm.slane %v4609_v57, %v4445_v18  ;;  %v1899_v1 = vmul.f32 %v1626_v53, %v1056_v41  ;;  %v1900_v47 = vmul.f32 %v1630_v56, %v1057_v22  ;;  %v923_v5 = vadd.f32 %v4933_v61, %v922_v37  ;;  %2097 = vst [vmem:[#allocation1 + $0x20] ss:$4 sm:$0xff] %v1894_v16  ;;  %v2632_v44 = vld [vmem:[#allocation2 + $0x20] sm:$0x1] }
 0x11f   : > { %v3281_v57 = vmin.f32 %v3265_v17, 6.0  ;;  %v3282_v33 = vmin.f32 %v3266_v60, 6.0  ;;  %v2362_v50 = vsel %vm2354_vm1, %v2360_v51, %v2361_v54  ;;  %v2364_v9 = vsel %vm2354_vm1, %v2361_v54, %v2363_v27 }
 0x120   : > { %v4922_v63 = vmul.f32 %v5636_v19, %v1055_v6  ;;  %v959_v53 = vmax.f32 %v923_v5, 0.0  ;;  %v2413_v7 = vadd.f32 %v2362_v50, %v2275_v10  ;;  %v2414_v24 = vadd.f32 %v2364_v9, %v2276_v49 }
 0x121   : > { %v2448_v56 = vmul.f32 %v4530_v35, %v2259_v46  ;;  %v3297_v6 = vpack.c.bf16 %v3281_v57, %v3281_v57  ;;  %v3298_v41 = vpack.c.bf16 %v3282_v33, %v3282_v33  ;;  %v2449_v22 = vmul.f32 %v4530_v35, %v2298_v34 }
 0x122   : > { %v2498_v40 = vrot.slane %v2447_v13, 2  ;;  %v982_v37 = vmin.f32 %v959_v53, 6.0  ;;  %v2601_v17 = vmul.f32 %v4668_v20, %v4600_v14  ;;  %v2602_v51 = vmul.f32 %v4761_v0, %v4600_v14  ;;  %v4949_v13 = vld.sshfl [vmem:[#allocation1] sm:$0xff pattern:$0x73625140] }
 0x123   : > { %v2499_v19 = vrot.slane %v2448_v56, 2  ;;  %v3349_v60 = vunpack.c.l.b16 %v3297_v6  ;;  %v3350_v16 = vunpack.c.l.b16 %v3298_v41  ;;  %v2501_v10 = vrot.slane %v2449_v22, 2  ;;  %v2769_v53 = vld [vmem:[#allocation2 + $0x18] sm:$0xe]  ;;  %2086 = vst [vmem:[#allocation1] ss:$4 sm:$0xff] %v4850_v8 }
 0x124   : > { %v2640_v49 = vunpack.c.l.bf16 %v2632_v44  ;;  %v1058_v54 = vrot.slane %v982_v37, 2  ;;  %v1060_v46 = vrot.slane %v982_v37, 6  ;;  %v1901_v27 = vmul.f32 %v1634_v26, %v982_v37 }
 0x125   : > { %v1059_v34 = vrot.slane %v982_v37, 4  ;;  %v925_v5 = vpop.f32.mrf.mxu2  ;;  %v3365_v57 = vpack.c.b16 %v3350_v16, %v3349_v60  ;;  %v2500_v33 = vsel %vm2492_vm3, %v2498_v40, %v2499_v19  ;;  %v2502_v50 = vsel %vm2492_vm3, %v2499_v19, %v2501_v10  ;;  %v4968_v22 = vld.sshfl [vmem:[#allocation1 + $0x20] sm:$0xff pattern:$0x73625140]  ;;  %v2908_v10 = vld [vmem:[#allocation2 + $0x24] sm:$0xff]  }
 0x126   : > { %v2651_v9 = vmul.f32 %v4668_v20, %v4612_v59  ;;  %v1902_v56 = vmul.f32 %v1638_v39, %v1058_v54  ;;  %v5637_v26 = vperm.slane %v4607_v4, %v4436_v30  ;;  %v926_v6 = vadd.f32 %v4933_v61, %v925_v5  ;;  %2104 = vst [vmem:[#allocation1 + $0x20] ss:$4 sm:$0xff] %v1899_v1 }
 0x127   : > { %v4966_v41 = vmul.f32 %v4853_v23, %v1059_v34  ;;  %3437 = vmatmul.bf16.vlgmr.msra.gmra.mxu1 %v3365_v57  ;;  %v2551_v40 = vadd.f32 %v2500_v33, %v2413_v7  ;;  %v2552_v37 = vadd.f32 %v2502_v50, %v2414_v24  ;;  %v2652_v8 = vmul.f32 %v4761_v0, %v4612_v59 }
 0x128   : > { %v4962_v44 = vmul.f32 %v5637_v26, %v1060_v46  ;;  %v2653_v36 = vmul.f32 %v4612_v59, %v2640_v49  ;;  %v960_v39 = vmax.f32 %v926_v6, 0.0  ;;  %v2701_v19 = vrot.slane %v2651_v9, 1  ;;  %2105 = vst [vmem:[#allocation1 + $0x21] ss:$4 sm:$0xff] %v1900_v47 }
 0x129   : > { %v2777_v60 = vunpack.c.l.bf16 %v2769_v53  ;;  %v2789_v16 = vmul.f32 %v4761_v0, %v4605_v52  ;;  %v2617_v23 = vadd.f32 %v2601_v17, %v2551_v40  ;;  %v2618_v54 = vadd.f32 %v2602_v51, %v2552_v37  ;;  %2106 = vst [vmem:[#allocation1 + $0x22] ss:$4 sm:$0xff] %v1901_v27 }
 0x12a   : > { %v2702_v46 = vrot.slane %v2652_v8, 1  ;;  %v2704_v34 = vrot.slane %v2653_v36, 1  ;;  %v983_v7 = vmin.f32 %v960_v39, 6.0  ;;  %v2790_v5 = vmul.f32 %v4605_v52, %v2640_v49  ;;  %2107 = vst [vmem:[#allocation1 + $0x23] ss:$4 sm:$0xff] %v1902_v56 }
 0x12b   : > { %v2788_v24 = vmul.f32 %v4605_v52, %v2777_v60  ;;  %v2839_v57 = vrot.slane %v2789_v16, 2  ;;  %v2924_v50 = vunpack.c.l.bf16 %v2908_v10  ;;  %v2925_v9 = vunpack.c.h.bf16 %v2908_v10  ;;  %v2972_v56 = vld [vmem:[#allocation2 + $0x2c] sm:$0x1] }
 0x12c   : > { %v2703_v1 = vsel %vm2354_vm1, %v2701_v19, %v2702_v46  ;;  %v2705_v33 = vsel %vm2354_vm1, %v2702_v46, %v2704_v34  ;;  %v1061_v53 = vrot.slane %v983_v7, 2  ;;  %v1062_v47 = vrot.slane %v983_v7, 4 }
 0x12d   : > { %v1063_v17 = vrot.slane %v983_v7, 6  ;;  %v5638_v51 = vperm.slane %v4607_v4, %v4438_v31  ;;  %v927_v27 = vpop.f32.mrf.mxu2  ;;  %v2754_v6 = vadd.f32 %v2703_v1, %v2617_v23  ;;  %v2755_v40 = vadd.f32 %v2705_v33, %v2618_v54  ;;  %v3109_v23 = vld [vmem:[#allocation2 + $0x24] sm:$0xe] }
 0x12e   : > { %v2838_v49 = vrot.slane %v2788_v24, 2  ;;  %v2841_v37 = vrot.slane %v2790_v5, 2  ;;  %v5639_v8 = vperm.slane %v4607_v4, %v4442_v3  ;;  %v5640_v39 = vperm.slane %v4607_v4, %v4445_v18 }
 0x12f   : > { %v4982_v26 = vmul.f32 %v5638_v51, %v983_v7  ;;  %v5641_v60 = vperm.slane %v4758_v2, %v4436_v30  ;;  %v928_v10 = vadd.f32 %v4933_v61, %v927_v27  ;;  %v2941_v34 = vmul.f32 %v4764_v29, %v2924_v50 }
 0x130   : > { %v4987_v36 = vmul.f32 %v5639_v8, %v1061_v53  ;;  %v4992_v19 = vmul.f32 %v5640_v39, %v1062_v47  ;;  %v2840_v54 = vsel %vm2492_vm3, %v2838_v49, %v2839_v57  ;;  %v2842_v46 = vsel %vm2492_vm3, %v2839_v57, %v2841_v37  ;;  %v5008_v37 = vld.sshfl [vmem:[#allocation1] sm:$0xff pattern:$0x73625140] }
 0x131   : > { %v4997_v16 = vmul.f32 %v5641_v60, %v1063_v17  ;;  %v2942_v7 = vmul.f32 %v4764_v29, %v2925_v9  ;;  %v961_v24 = vmax.f32 %v928_v10, 0.0  ;;  %v2891_v4 = vadd.f32 %v2840_v54, %v2754_v6  ;;  %2093 = vst [vmem:[#allocation1] ss:$4 sm:$0xff] %v4834_v38 }
 0x132   : > { %v2892_v5 = vadd.f32 %v2842_v46, %v2755_v40  ;;  %v2980_v1 = vunpack.c.l.bf16 %v2972_v56  ;;  %v2991_v33 = vmul.f32 %v4810_v15, %v2924_v50  ;;  %v2992_v53 = vmul.f32 %v4810_v15, %v2925_v9  ;;  %2094 = vst [vmem:[#allocation1 + $0x1] ss:$4 sm:$0xff] %v4839_v12 }
 0x133   : > { %v3117_v47 = vunpack.c.l.bf16 %v3109_v23  ;;  %v3129_v17 = vmul.f32 %v4783_v28, %v2925_v9  ;;  %v984_v51 = vmin.f32 %v961_v24, 6.0  ;;  %v2957_v27 = vadd.f32 %v2941_v34, %v2891_v4  ;;  %v5019_v24 = vpop.permute.xlu1 %1334  ;;  %2095 = vst [vmem:[#allocation1 + $0x2] ss:$4 sm:$0xff] %v4844_v25 }
 0x134   : > { %v2958_v49 = vadd.f32 %v2942_v7, %v2892_v5  ;;  %v2993_v57 = vmul.f32 %v4810_v15, %v2980_v1  ;;  %v3041_v8 = vrot.slane %v2991_v33, 1  ;;  %v3042_v39 = vrot.slane %v2992_v53, 1  ;;  %2096 = vst [vmem:[#allocation1 + $0x3] ss:$4 sm:$0xff] %v4879_v42 }
 0x135   : > { %v3128_v6 = vmul.f32 %v4783_v28, %v3117_v47  ;;  %v3130_v40 = vmul.f32 %v4783_v28, %v2980_v1  ;;  %v1064_v56 = vrot.slane %v984_v51, 2  ;;  %v1065_v50 = vrot.slane %v984_v51, 4  ;;  %v930_v23 = vpop.f32.mrf.mxu2 }
 0x136   : > { %v1066_v60 = vrot.slane %v984_v51, 6  ;;  %v5642_v10 = vperm.slane %v4758_v2, %v4438_v31  ;;  %v3043_v54 = vsel %vm2354_vm1, %v3041_v8, %v3042_v39  ;;  %v3044_v46 = vrot.slane %v2993_v57, 1  ;;  %v1329_v57 = vpop.permute.xlu0 %1328 }
 0x137   : > { %v3178_v34 = vrot.slane %v3128_v6, 2  ;;  %v3179_v7 = vrot.slane %v3129_v17, 2  ;;  %v5643_v4 = vperm.slane %v4758_v2, %v4442_v3  ;;  %v5644_v1 = vperm.slane %v4758_v2, %v4445_v18 }
 0x138   : > { %v5015_v9 = vmul.f32 %v5642_v10, %v984_v51  ;;  %v5033_v38 = vmul.f32 %v4866_v62, %v1066_v60  ;;  %v931_v53 = vadd.f32 %v4933_v61, %v930_v23  ;;  %v3045_v47 = vsel %vm2354_vm1, %v3042_v39, %v3044_v46  ;;  %v5051_v60 = vpop.permute.xlu2 %1340 }
 0x139   : > { %v5025_v5 = vmul.f32 %v5643_v4, %v1064_v56  ;;  %v5030_v33 = vmul.f32 %v5644_v1, %v1065_v50  ;;  %v3094_v12 = vadd.f32 %v3043_v54, %v2957_v27  ;;  %v3180_v17 = vsel %vm2492_vm3, %v3178_v34, %v3179_v7 }
 0x13a   : > { %5645 = vst [vmem:[#allocation3_spill] sm:$0xff] %v5033_v38  ;;  %v3181_v51 = vrot.slane %v3130_v40, 2  ;;  %v962_v8 = vmax.f32 %v931_v53, 0.0  ;;  %v3095_v2 = vadd.f32 %v3045_v47, %v2958_v49  ;;  %v1698_v6 = vperm.slane %v5019_v24, %v4436_v30 }
 0x13b   : > { %v1702_v62 = vperm.slane %v5019_v24, %v4438_v31  ;;  %v3231_v25 = vadd.f32 %v3180_v17, %v3094_v12  ;;  %v1706_v27 = vperm.slane %v5019_v24, %v4442_v3  ;;  %v1710_v39 = vperm.slane %v5019_v24, %v4445_v18 }
 0x13c   : > { %v3182_v56 = vsel %vm2492_vm3, %v3179_v7, %v3181_v51  ;;  %v985_v40 = vmin.f32 %v962_v8, 6.0  ;;  %v1682_v42 = vperm.slane %v1329_v57, %v4436_v30  ;;  %v1686_v49 = vperm.slane %v1329_v57, %v4438_v31  ;;  %v2291_v51 = vld [vmem:[#allocation2 + $0x20] sm:$0x1] }
 0x13d   : > { %v3232_v50 = vadd.f32 %v3182_v56, %v3095_v2  ;;  %v3251_v10 = vadd.f32 %v4900_v21, %v3231_v25  ;;  %v1690_v23 = vperm.slane %v1329_v57, %v4442_v3  ;;  %v1694_v54 = vperm.slane %v1329_v57, %v4445_v18  ;;  %v932_v53 = vpop.f32.mrf.mxu2  ;;  %v2429_v25 = vld [vmem:[#allocation2 + $0x18] sm:$0xe] }
 0x13e   : > { %v1067_v34 = vrot.slane %v985_v40, 2  ;;  %v1068_v7 = vrot.slane %v985_v40, 4  ;;  %v1069_v24 = vrot.slane %v985_v40, 6  ;;  %v5059_v47 = vmul.f32 %v1682_v42, %v985_v40 }
 0x13f   : > { %v3252_v4 = vadd.f32 %v4900_v21, %v3232_v50  ;;  %v3267_v1 = vmax.f32 %v3251_v10, 0.0  ;;  %v2192_v12 = vpack.c.bf16 %v5008_v37, %v5008_v37  ;;  %v5065_v17 = vpack.c.bf16 %v4881_v48, %v4949_v13 }
 0x140   : > { %5646 = vst [vmem:[#allocation4_spill] sm:$0xff] %v5059_v47  ;;  %v933_v8 = vadd.f32 %v4933_v61, %v932_v53  ;;  %v5068_v2 = vmul.f32 %v1686_v49, %v1067_v34  ;;  %v5070_v56 = vmul.f32 %v1690_v23, %v1068_v7  ;;  %v5072_v10 = vmul.f32 %v1694_v54, %v1069_v24 }
 0x141   : > { %v3268_v57 = vmax.f32 %v3252_v4, 0.0  ;;  %v3283_v50 = vmin.f32 %v3267_v1, 6.0  ;;  %3941 = vst [vmem:[#allocation2 + $0x30] sm:$0xff] %v5065_v17   ;;  %v2277_v37 = vmul.f32 %v4668_v20, %v4541_v43  ;;  %v2278_v48 = vmul.f32 %v4761_v0, %v4541_v43 }
 0x142   : > { %5647 = vst [vmem:[#allocation5_spill] sm:$0xff] %v5068_v2  ;;  %v963_v40 = vmax.f32 %v933_v8, 0.0  ;;  %v2299_v42 = vunpack.c.l.bf16 %v2291_v51  ;;  %v2312_v49 = vmul.f32 %v4668_v20, %v4507_v11  ;;  %v2313_v54 = vmul.f32 %v4761_v0, %v4507_v11  ;;  %v2570_v2 = vld [vmem:[#allocation2 + $0x24] sm:$0xff]  }
 0x143   : > { %5648 = vst [vmem:[#allocation6_spill] sm:$0xff] %v5070_v56  ;;  %v3284_v13 = vmin.f32 %v3268_v57, 6.0  ;;  %v3299_v23 = vpack.c.bf16 %v3283_v50, %v3283_v50  ;;  %v2437_v34 = vunpack.c.l.bf16 %v2429_v25  ;;  %v2451_v7 = vmul.f32 %v4761_v0, %v4530_v35 }
 0x144   : > { %5649 = vst [vmem:[#allocation7_spill] sm:$0xff] %v5072_v10  ;;  %v986_v4 = vmin.f32 %v963_v40, 6.0  ;;  %v2314_v1 = vmul.f32 %v4507_v11, %v2299_v42  ;;  %v2365_v53 = vrot.slane %v2312_v49, 1  ;;  %v2366_v8 = vrot.slane %v2313_v54, 1 }
 0x145   : > { %2222 = vst [vmem:[#allocation2 + $0x38] sm:$0x1] %v2192_v12  ;;  %v3300_v24 = vpack.c.bf16 %v3284_v13, %v3284_v13  ;;  %v3351_v57 = vunpack.c.l.b16 %v3299_v23  ;;  %v2450_v12 = vmul.f32 %v4530_v35, %v2437_v34  ;;  %v2452_v51 = vmul.f32 %v4530_v35, %v2299_v42  ;;  %v935_v25 = vpop.f32.mrf.mxu2  ;;  %v2633_v42 = vld [vmem:[#allocation2 + $0x2c] sm:$0x1]  ;;  %v2770_v34 = vld [vmem:[#allocation2 + $0x24] sm:$0xe] }
 0x146   : > { %v1070_v50 = vrot.slane %v986_v4, 2  ;;  %v1071_v46 = vrot.slane %v986_v4, 4  ;;  %v1072_v10 = vrot.slane %v986_v4, 6  ;;  %v5088_v56 = vmul.f32 %v1698_v6, %v986_v4 }
 0x147   : > { %v3352_v20 = vunpack.c.l.b16 %v3300_v24  ;;  %v2367_v0 = vsel %vm2354_vm1, %v2365_v53, %v2366_v8  ;;  %v2368_v13 = vrot.slane %v2314_v1, 1  ;;  %v2503_v40 = vrot.slane %v2450_v12, 2 }
 0x148   : > { %5650 = vst [vmem:[#allocation8_spill] sm:$0xff] %v5088_v56  ;;  %v5091_v49 = vmul.f32 %v1702_v62, %v1070_v50  ;;  %v5093_v23 = vmul.f32 %v1706_v27, %v1071_v46  ;;  %v5095_v54 = vmul.f32 %v1710_v39, %v1072_v10  ;;  %v936_v24 = vadd.f32 %v4933_v61, %v935_v25  ;;  %v5100_v39 = vld.sshfl [vmem:[#allocation1] sm:$0xff pattern:$0x73625140] }
 0x149   : > { %v3366_v47 = vpack.c.b16 %v3352_v20, %v3351_v57  ;;  %v2369_v6 = vsel %vm2354_vm1, %v2366_v8, %v2368_v13  ;;  %v2415_v4 = vadd.f32 %v2367_v0, %v2277_v37  ;;  %v2504_v56 = vrot.slane %v2451_v7, 2  ;;  %2100 = vst [vmem:[#allocation1] ss:$4 sm:$0xff] %v4888_v55 }
 0x14a   : > { %v2416_v53 = vadd.f32 %v2369_v6, %v2278_v48  ;;  %v2506_v1 = vrot.slane %v2452_v51, 2  ;;  %v2586_v12 = vunpack.c.l.bf16 %v2570_v2  ;;  %v2587_v38 = vunpack.c.h.bf16 %v2570_v2  ;;  %2101 = vst [vmem:[#allocation1 + $0x1] ss:$4 sm:$0xff] %v4893_v32 }
 0x14b   : > { %3442 = vmatmul.bf16.gmra.mxu1 %v3366_v47  ;;  %v964_v57 = vmax.f32 %v936_v24, 0.0  ;;  %v2505_v62 = vsel %vm2492_vm3, %v2503_v40, %v2504_v56  ;;  %v2641_v27 = vunpack.c.l.bf16 %v2633_v42  ;;  %v2778_v46 = vunpack.c.l.bf16 %v2770_v34  ;;  %2102 = vst [vmem:[#allocation1 + $0x2] ss:$4 sm:$0xff] %v4917_v58 }
 0x14c   : > { %v2507_v10 = vsel %vm2492_vm3, %v2504_v56, %v2506_v1  ;;  %v2553_v20 = vadd.f32 %v2505_v62, %v2415_v4  ;;  %v2603_v50 = vmul.f32 %v4600_v14, %v2586_v12  ;;  %v2604_v37 = vmul.f32 %v4600_v14, %v2587_v38  ;;  %2103 = vst [vmem:[#allocation1 + $0x3] ss:$4 sm:$0xff] %v4922_v63  ;;  %v2973_v1 = vld [vmem:[#allocation2 + $0x38] sm:$0x1] }
 0x14d   : > { %v5106_v47 = vmin.f32 %v964_v57, 6.0  ;;  %v2554_v48 = vadd.f32 %v2507_v10, %v2416_v53  ;;  %v2654_v2 = vmul.f32 %v4612_v59, %v2586_v12  ;;  %v2655_v7 = vmul.f32 %v4612_v59, %v2587_v38  ;;  %v937_v13 = vpop.f32.mrf.mxu2 }
 0x14e   : > { %v2619_v8 = vadd.f32 %v2603_v50, %v2553_v20  ;;  %v2656_v51 = vmul.f32 %v4612_v59, %v2641_v27  ;;  %v2791_v56 = vmul.f32 %v4605_v52, %v2778_v46  ;;  %v2792_v25 = vmul.f32 %v4605_v52, %v2587_v38  ;;  %v3110_v46 = vld [vmem:[#allocation2 + $0x30] sm:$0xe] }
 0x14f   : > { %v5651_v55 = vperm.slane %v5051_v60, %v4436_v30  ;;  %v2620_v40 = vadd.f32 %v2604_v37, %v2554_v48  ;;  %v2706_v42 = vrot.slane %v2654_v2, 1  ;;  %v2707_v34 = vrot.slane %v2655_v7, 1 }
 0x150   : > { %v938_v32 = vadd.f32 %v4933_v61, %v937_v13  ;;  %v2709_v24 = vrot.slane %v2656_v51, 1  ;;  %v2793_v6 = vmul.f32 %v4605_v52, %v2641_v27  ;;  %v2843_v38 = vrot.slane %v2791_v56, 2 }
 0x151   : > { %v5119_v0 = vmul.f32 %v5651_v55, %v5106_v47  ;;  %v2708_v58 = vsel %vm2354_vm1, %v2706_v42, %v2707_v34  ;;  %v2844_v4 = vrot.slane %v2792_v25, 2  ;;  %v5126_v53 = vunpack.c.l.bf16 %v5065_v17 }
 0x152   : > { %v5129_v60 = vunpack.c.h.bf16 %v5065_v17  ;;  %v965_v12 = vmax.f32 %v938_v32, 0.0  ;;  %v2710_v57 = vsel %vm2354_vm1, %v2707_v34, %v2709_v24  ;;  %v2756_v63 = vadd.f32 %v2708_v58, %v2619_v8 }
 0x153   : > { %v2846_v62 = vrot.slane %v2793_v6, 2  ;;  %v2757_v10 = vadd.f32 %v2710_v57, %v2620_v40  ;;  %v2845_v27 = vsel %vm2492_vm3, %v2843_v38, %v2844_v4  ;;  %v2943_v20 = vmul.f32 %v5126_v53, %v4764_v29 }
 0x154   : > { %v2944_v50 = vmul.f32 %v5129_v60, %v4764_v29  ;;  %v988_v37 = vmin.f32 %v965_v12, 6.0  ;;  %v2893_v48 = vadd.f32 %v2845_v27, %v2756_v63  ;;  %v2981_v2 = vunpack.c.l.bf16 %v2973_v1  ;;  %v1348_v63 = vpop.permute.xlu1 %1347 }
 0x155   : > { %v2847_v17 = vsel %vm2492_vm3, %v2844_v4, %v2846_v62  ;;  %v2994_v8 = vmul.f32 %v5126_v53, %v4810_v15  ;;  %v2995_v51 = vmul.f32 %v5129_v60, %v4810_v15  ;;  %v3118_v56 = vunpack.c.l.bf16 %v3110_v46  ;;  %v940_v6 = vpop.f32.mrf.mxu2 }
 0x156   : > { %v2894_v7 = vadd.f32 %v2847_v17, %v2757_v10  ;;  %v2959_v25 = vadd.f32 %v2943_v20, %v2893_v48  ;;  %v2996_v55 = vmul.f32 %v4810_v15, %v2981_v2  ;;  %v3132_v13 = vmul.f32 %v4783_v28, %v5129_v60 }
 0x157   : > { %v3133_v40 = vmul.f32 %v4783_v28, %v2981_v2  ;;  %v3046_v34 = vrot.slane %v2994_v8, 1  ;;  %v3047_v32 = vrot.slane %v2995_v51, 1  ;;  %v3131_v24 = vmul.f32 %v4783_v28, %v3118_v56 }
 0x158   : > { %v2960_v42 = vadd.f32 %v2944_v50, %v2894_v7  ;;  %v3049_v38 = vrot.slane %v2996_v55, 1  ;;  %v3184_v58 = vrot.slane %v3132_v13, 2  ;;  %v1073_v1 = vrot.slane %v5106_v47, 2  ;;  %v1354_v7 = vpop.permute.xlu2 %1353 }
 0x159   : > { %v3186_v4 = vrot.slane %v3133_v40, 2  ;;  %v3048_v12 = vsel %vm2354_vm1, %v3046_v34, %v3047_v32  ;;  %v3183_v57 = vrot.slane %v3131_v24, 2  ;;  %v1074_v62 = vrot.slane %v5106_v47, 4 }
 0x15a   : > { %v1075_v46 = vrot.slane %v5106_v47, 6  ;;  %v3050_v10 = vsel %vm2354_vm1, %v3047_v32, %v3049_v38  ;;  %v3096_v27 = vadd.f32 %v3048_v12, %v2959_v25  ;;  %v1718_v28 = vperm.slane %v1348_v63, %v4436_v30 }
 0x15b   : > { %v3187_v20 = vsel %vm2492_vm3, %v3184_v58, %v3186_v4  ;;  %v3097_v50 = vadd.f32 %v3050_v10, %v2960_v42  ;;  %v3185_v17 = vsel %vm2492_vm3, %v3183_v57, %v3184_v58  ;;  %v1722_v48 = vperm.slane %v1348_v63, %v4438_v31  ;;  %v1360_v42 = vpop.permute.xlu0 %1359 }
 0x15c   : > { %v1726_v2 = vperm.slane %v1348_v63, %v4442_v3  ;;  %v3233_v8 = vadd.f32 %v3185_v17, %v3096_v27  ;;  %v1730_v51 = vperm.slane %v1348_v63, %v4445_v18  ;;  %v5158_v56 = vmul.f32 %v1718_v28, %v1073_v1  ;;  %v2246_v27 = vld [vmem:[#allocation2 + $0x24] sm:$0xff]  }
 0x15d   : > { %v1076_v47 = vrot.slane %v988_v37, 2  ;;  %v3234_v55 = vadd.f32 %v3187_v20, %v3097_v50  ;;  %v5160_v25 = vmul.f32 %v1722_v48, %v1074_v62  ;;  %v1077_v40 = vrot.slane %v988_v37, 4  ;;  %v942_v57 = vpop.f32.mrf.mxu2 }
 0x15e   : > { %v5162_v13 = vmul.f32 %v1726_v2, %v1075_v46  ;;  %v3253_v34 = vadd.f32 %v4900_v21, %v3233_v8  ;;  %v5165_v32 = vmul.f32 %v1730_v51, %v988_v37  ;;  %v1078_v24 = vrot.slane %v988_v37, 6  ;;  %v2292_v37 = vld [vmem:[#allocation2 + $0x2c] sm:$0x1] }
 0x15f   : > { %v1734_v38 = vperm.slane %v1354_v7, %v4436_v30  ;;  %v3254_v58 = vadd.f32 %v4900_v21, %v3234_v55  ;;  %v1738_v4 = vperm.slane %v1354_v7, %v4438_v31  ;;  %v1742_v1 = vperm.slane %v1354_v7, %v4442_v3  ;;  %v2430_v3 = vld [vmem:[#allocation2 + $0x24] sm:$0xe] }
 0x160   : > { %v1746_v12 = vperm.slane %v1354_v7, %v4445_v18  ;;  %v3269_v63 = vmax.f32 %v3253_v34, 0.0  ;;  %v941_v46 = vadd.f32 %v4933_v61, %v940_v6  ;;  %v1750_v10 = vperm.slane %v1360_v42, %v4436_v30 }
 0x161   : > { %v5172_v62 = vmul.f32 %v1734_v38, %v1076_v47  ;;  %v3270_v20 = vmax.f32 %v3254_v58, 0.0  ;;  %v5176_v28 = vmul.f32 %v1738_v4, %v1077_v40  ;;  %v5178_v50 = vmul.f32 %v1742_v1, %v1078_v24 }
 0x162   : > { %v2193_v31 = vpack.c.bf16 %v4936_v45, %v4936_v45  ;;  %v3285_v18 = vmin.f32 %v3269_v63, 6.0  ;;  %v966_v17 = vmax.f32 %v941_v46, 0.0  ;;  %v2194_v48 = vpack.c.bf16 %v5100_v39, %v5100_v39  ;;  %v2634_v63 = vld [vmem:[#allocation2 + $0x38] sm:$0x1] }
 0x163   : > { %v2195_v61 = vpack.c.bf16 %v4968_v22, %v4968_v22  ;;  %v3286_v30 = vmin.f32 %v3270_v20, 6.0  ;;  %v2262_v6 = vunpack.c.l.bf16 %v2246_v27  ;;  %v2263_v2 = vunpack.c.h.bf16 %v2246_v27 }
 0x164   : > { %2223 = vst [vmem:[#allocation2 + $0x3c] sm:$0xf] %v2193_v31  ;;  %v2300_v7 = vunpack.c.l.bf16 %v2292_v37  ;;  %v3301_v8 = vpack.c.bf16 %v3285_v18, %v3285_v18  ;;  %v989_v51 = vmin.f32 %v966_v17, 6.0  ;;  %v2438_v47 = vunpack.c.l.bf16 %v2430_v3  ;;  %v5200_v31 = vld.sshfl [vmem:[#allocation1] sm:$0xff pattern:$0x73625140] }
 0x165   : > { %2224 = vst [vmem:[#allocation2 + $0x40] sm:$0xf] %v2194_v48  ;;  %v2605_v45 = vmul.f32 %v5126_v53, %v4600_v14  ;;  %v3302_v55 = vpack.c.bf16 %v3286_v30, %v3286_v30  ;;  %v2279_v40 = vmul.f32 %v4541_v43, %v2262_v6  ;;  %v2280_v39 = vmul.f32 %v4541_v43, %v2263_v2  ;;  %v5204_v48 = vld.sshfl [vmem:[#allocation1 + $0x20] sm:$0xff pattern:$0x73625140] }
 0x166   : > { %2225 = vst [vmem:[#allocation2 + $0x44] sm:$0x1] %v2195_v61  ;;  %v2315_v22 = vmul.f32 %v4507_v11, %v2262_v6  ;;  %v3353_v42 = vunpack.c.l.b16 %v3301_v8  ;;  %v1079_v34 = vrot.slane %v989_v51, 2  ;;  %v5191_v24 = vmul.f32 %v1746_v12, %v989_v51  ;;  %v2771_v8 = vld [vmem:[#allocation2 + $0x30] sm:$0xe] }
 0x167   : > { %v2316_v38 = vmul.f32 %v4507_v11, %v2263_v2  ;;  %v3354_v58 = vunpack.c.l.b16 %v3302_v55  ;;  %v2317_v4 = vmul.f32 %v4507_v11, %v2300_v7  ;;  %v2453_v57 = vmul.f32 %v4530_v35, %v2438_v47  ;;  %2110 = vst [vmem:[#allocation1] ss:$4 sm:$0xff] %v4966_v41 }
 0x168   : > { %v2370_v1 = vrot.slane %v2315_v22, 1  ;;  %v5196_v46 = vmul.f32 %v1750_v10, %v1079_v34  ;;  %v2454_v37 = vmul.f32 %v4530_v35, %v2263_v2  ;;  %v2455_v20 = vmul.f32 %v4530_v35, %v2300_v7  ;;  %2112 = vst [vmem:[#allocation1 + $0x20] ss:$4 sm:$0xff] %v4962_v44 }
 0x169   : > { %v2371_v27 = vrot.slane %v2316_v38, 1  ;;  %v3367_v12 = vpack.c.b16 %v3354_v58, %v3353_v42  ;;  %v2373_v3 = vrot.slane %v2317_v4, 1  ;;  %v2508_v18 = vrot.slane %v2453_v57, 2  ;;  %2113 = vst [vmem:[#allocation1 + $0x21] ss:$4 sm:$0xff] %v4982_v26 }
 0x16a   : > { %v2606_v17 = vmul.f32 %v5129_v60, %v4600_v14  ;;  %v2509_v30 = vrot.slane %v2454_v37, 2  ;;  %v2511_v10 = vrot.slane %v2455_v20, 2  ;;  %v2642_v6 = vunpack.c.l.bf16 %v2634_v63  ;;  %2114 = vst [vmem:[#allocation1 + $0x22] ss:$4 sm:$0xff] %v4987_v36 }
 0x16b   : > { %v2372_v61 = vsel %vm2354_vm1, %v2370_v1, %v2371_v27  ;;  %3447 = vmatmul.bf16.gmra.mxu1 %v3367_v12  ;;  %v2374_v2 = vsel %vm2354_vm1, %v2371_v27, %v2373_v3  ;;  %v2657_v51 = vmul.f32 %v5126_v53, %v4612_v59  ;;  %v2658_v47 = vmul.f32 %v5129_v60, %v4612_v59 }
 0x16c   : > { %v2417_v7 = vadd.f32 %v2372_v61, %v2279_v40  ;;  %v2418_v55 = vadd.f32 %v2374_v2, %v2280_v39  ;;  %v2510_v22 = vsel %vm2492_vm3, %v2508_v18, %v2509_v30  ;;  %v2512_v42 = vsel %vm2492_vm3, %v2509_v30, %v2511_v10  ;;  %v2912_v38 = vld [vmem:[#allocation2 + $0x3c] sm:$0xff]   ;;  %2115 = vst [vmem:[#allocation1 + $0x23] ss:$4 sm:$0xff] %v4992_v19 }
 0x16d   : > { %v2659_v34 = vmul.f32 %v4612_v59, %v2642_v6  ;;  %v2711_v58 = vrot.slane %v2657_v51, 1  ;;  %v2712_v4 = vrot.slane %v2658_v47, 1  ;;  %v2779_v40 = vunpack.c.l.bf16 %v2771_v8  ;;  %v2974_v12 = vld [vmem:[#allocation2 + $0x44] sm:$0x1]  ;;  %v3111_v30 = vld [vmem:[#allocation2 + $0x3c] sm:$0xe] }
 0x16e   : > { %v2555_v41 = vadd.f32 %v2510_v22, %v2417_v7  ;;  %v2556_v1 = vadd.f32 %v2512_v42, %v2418_v55  ;;  %v2795_v39 = vmul.f32 %v5129_v60, %v4605_v52  ;;  %v2796_v63 = vmul.f32 %v4605_v52, %v2642_v6 }
 0x16f   : > { %v2714_v57 = vrot.slane %v2659_v34, 1  ;;  %v2713_v37 = vsel %vm2354_vm1, %v2711_v58, %v2712_v4  ;;  %v2794_v44 = vmul.f32 %v4605_v52, %v2779_v40  ;;  %v2928_v20 = vunpack.c.l.bf16 %v2912_v38 }
 0x170   : > { %v2621_v27 = vadd.f32 %v2605_v45, %v2555_v41  ;;  %v2622_v3 = vadd.f32 %v2606_v17, %v2556_v1  ;;  %v2849_v18 = vrot.slane %v2795_v39, 2  ;;  %v2851_v61 = vrot.slane %v2796_v63, 2  ;;  %v2111_v45 = vld.sshfl [vmem:[#allocation1] sm:$0xff pattern:$0x73625140] }
 0x171   : > { %v2715_v26 = vsel %vm2354_vm1, %v2712_v4, %v2714_v57  ;;  %v2848_v8 = vrot.slane %v2794_v44, 2  ;;  %v2929_v6 = vunpack.c.h.bf16 %v2912_v38  ;;  %v2945_v36 = vmul.f32 %v4764_v29, %v2928_v20  ;;  %2117 = vst [vmem:[#allocation1] ss:$4 sm:$0xff] %v4997_v16  ;;  %v5239_v16 = vld [vmem:[%s5625_s3 + $0x8] ss:$0 sm:$0xff] }
 0x172   : > { %v2758_v10 = vadd.f32 %v2713_v37, %v2621_v27  ;;  %v2759_v2 = vadd.f32 %v2715_v26, %v2622_v3  ;;  %v2852_v7 = vsel %vm2492_vm3, %v2849_v18, %v2851_v61  ;;  %v2982_v51 = vunpack.c.l.bf16 %v2974_v12  ;;  %2118 = vst [vmem:[#allocation1 + $0x1] ss:$4 sm:$0xff] %v5015_v9  ;;  %v2293_v27 = vld [vmem:[#allocation2 + $0x38] sm:$0x1] }
 0x173   : > { %v2997_v47 = vmul.f32 %v4810_v15, %v2928_v20  ;;  %v2850_v19 = vsel %vm2492_vm3, %v2848_v8, %v2849_v18  ;;  %v2946_v17 = vmul.f32 %v4764_v29, %v2929_v6  ;;  %v2998_v55 = vmul.f32 %v4810_v15, %v2929_v6  ;;  %2119 = vst [vmem:[#allocation1 + $0x2] ss:$4 sm:$0xff] %v5025_v5  ;;  %v5245_v5 = vld.sshfl [vmem:[#allocation1 + $0x20] sm:$0xff pattern:$0x73625140] }
 0x174   : > { %v3119_v22 = vunpack.c.l.bf16 %v3111_v30  ;;  %v2895_v42 = vadd.f32 %v2850_v19, %v2758_v10  ;;  %v2896_v34 = vadd.f32 %v2852_v7, %v2759_v2  ;;  %v2999_v38 = vmul.f32 %v4810_v15, %v2982_v51  ;;  %2120 = vst [vmem:[#allocation1 + $0x3] ss:$4 sm:$0xff] %v5030_v33  ;;  %v5652_v3 = vld [vmem:[#allocation3_spill] sm:$0xff]  ;;  %v2431_v30 = vld [vmem:[#allocation2 + $0x30] sm:$0xe] }
 0x175   : > { %v3051_v41 = vrot.slane %v2997_v47, 1  ;;  %v3052_v58 = vrot.slane %v2998_v55, 1  ;;  %v3135_v40 = vmul.f32 %v5239_v16, %v2929_v6  ;;  %v3136_v1 = vmul.f32 %v5239_v16, %v2982_v51  ;;  %2121 = vst [vmem:[#allocation1 + $0x20] ss:$4 sm:$0xff] %v5652_v3  ;;  %v2574_v10 = vld [vmem:[#allocation2 + $0x3c] sm:$0xff]  }
 0x176   : > { %v3134_v4 = vmul.f32 %v5239_v16, %v3119_v22  ;;  %v2961_v9 = vadd.f32 %v2945_v36, %v2895_v42  ;;  %v2962_v57 = vadd.f32 %v2946_v17, %v2896_v34  ;;  %v3054_v39 = vrot.slane %v2999_v38, 1 }
 0x177   : > { %v2198_v63 = vpack.c.bf16 %v2111_v45, %v2111_v45  ;;  %v3053_v37 = vsel %vm2354_vm1, %v3051_v41, %v3052_v58  ;;  %v3189_v20 = vrot.slane %v3135_v40, 2  ;;  %v3191_v12 = vrot.slane %v3136_v1, 2  ;;  %v5653_v40 = vld [vmem:[#allocation4_spill] sm:$0xff] }
 0x178   : > { %v3188_v44 = vrot.slane %v3134_v4, 2  ;;  %v3055_v26 = vsel %vm2354_vm1, %v3052_v58, %v3054_v39  ;;  %v3098_v18 = vadd.f32 %v3053_v37, %v2961_v9  ;;  %v5252_v33 = vpack.c.bf16 %v5204_v48, %v5200_v31 }
 0x179   : > { %2228 = vst [vmem:[#allocation2 + $0x50] sm:$0x1] %v2198_v63  ;;  %v2281_v61 = vmul.f32 %v5126_v53, %v4541_v43  ;;  %v3099_v8 = vadd.f32 %v3055_v26, %v2962_v57  ;;  %v3192_v36 = vsel %vm2492_vm3, %v3189_v20, %v3191_v12  ;;  %v2282_v45 = vmul.f32 %v5129_v60, %v4541_v43  ;;  %v2772_v26 = vld [vmem:[#allocation2 + $0x3c] sm:$0xe] }
 0x17a   : > { %v3190_v6 = vsel %vm2492_vm3, %v3188_v44, %v3189_v20  ;;  %3942 = vst [vmem:[#allocation2 + $0x48] sm:$0xff] %v5252_v33   ;;  %v2301_v7 = vunpack.c.l.bf16 %v2293_v27  ;;  %v2318_v31 = vmul.f32 %v5126_v53, %v4507_v11  ;;  %v2319_v48 = vmul.f32 %v5129_v60, %v4507_v11  ;;  %v2635_v44 = vld [vmem:[#allocation2 + $0x44] sm:$0x1] }
 0x17b   : > { %v3235_v2 = vadd.f32 %v3190_v6, %v3098_v18  ;;  %v3236_v51 = vadd.f32 %v3192_v36, %v3099_v8  ;;  %v2439_v47 = vunpack.c.l.bf16 %v2431_v30  ;;  %v2457_v19 = vmul.f32 %v5129_v60, %v4530_v35  ;;  %v5269_v38 = vld.sshfl [vmem:[#allocation1] sm:$0xff pattern:$0x73625140]  ;;  %v5654_v18 = vld [vmem:[#allocation5_spill] sm:$0xff] }
 0x17c   : > { %v2590_v17 = vunpack.c.l.bf16 %v2574_v10  ;;  %v2320_v22 = vmul.f32 %v4507_v11, %v2301_v7  ;;  %v2375_v42 = vrot.slane %v2318_v31, 1  ;;  %v2376_v34 = vrot.slane %v2319_v48, 1  ;;  %2124 = vst [vmem:[#allocation1] ss:$4 sm:$0xff] %v5653_v40  ;;  %v5655_v48 = vld [vmem:[#allocation6_spill] sm:$0xff] }
 0x17d   : > { %v3255_v55 = vadd.f32 %v4900_v21, %v3235_v2  ;;  %v3256_v41 = vadd.f32 %v4900_v21, %v3236_v51  ;;  %v2456_v53 = vmul.f32 %v4530_v35, %v2439_v47  ;;  %v2458_v58 = vmul.f32 %v4530_v35, %v2301_v7  ;;  %2125 = vst [vmem:[#allocation1 + $0x1] ss:$4 sm:$0xff] %v5654_v18 }
 0x17e   : > { %v2514_v4 = vrot.slane %v2457_v19, 2  ;;  %v2377_v60 = vsel %vm2354_vm1, %v2375_v42, %v2376_v34  ;;  %v2378_v9 = vrot.slane %v2320_v22, 1  ;;  %v2591_v57 = vunpack.c.h.bf16 %v2574_v10  ;;  %2126 = vst [vmem:[#allocation1 + $0x2] ss:$4 sm:$0xff] %v5655_v48  ;;  %v5656_v22 = vld [vmem:[#allocation7_spill] sm:$0xff] }
 0x17f   : > { %v3271_v1 = vmax.f32 %v3255_v55, 0.0  ;;  %v3272_v39 = vmax.f32 %v3256_v41, 0.0  ;;  %v2419_v63 = vadd.f32 %v2377_v60, %v2281_v61  ;;  %v2513_v27 = vrot.slane %v2456_v53, 2  ;;  %v5282_v61 = vld.sshfl [vmem:[#allocation1 + $0x20] sm:$0xff pattern:$0x73625140] }
 0x180   : > { %v2516_v37 = vrot.slane %v2458_v58, 2  ;;  %v2379_v21 = vsel %vm2354_vm1, %v2376_v34, %v2378_v9  ;;  %v2607_v12 = vmul.f32 %v4600_v14, %v2590_v17  ;;  %v2608_v3 = vmul.f32 %v4600_v14, %v2591_v57  ;;  %2127 = vst [vmem:[#allocation1 + $0x3] ss:$4 sm:$0xff] %v5656_v22  ;;  %v5657_v53 = vld [vmem:[#allocation8_spill] sm:$0xff] }
 0x181   : > { %v3287_v20 = vmin.f32 %v3271_v1, 6.0  ;;  %v3288_v30 = vmin.f32 %v3272_v39, 6.0  ;;  %v2420_v8 = vadd.f32 %v2379_v21, %v2282_v45  ;;  %v2515_v6 = vsel %vm2492_vm3, %v2513_v27, %v2514_v4  ;;  %2128 = vst [vmem:[#allocation1 + $0x20] ss:$4 sm:$0xff] %v5657_v53 }
 0x182   : > { %v2517_v10 = vsel %vm2492_vm3, %v2514_v4, %v2516_v37  ;;  %v2557_v2 = vadd.f32 %v2515_v6, %v2419_v63  ;;  %v2643_v7 = vunpack.c.l.bf16 %v2635_v44  ;;  %v2660_v31 = vmul.f32 %v4612_v59, %v2590_v17  ;;  %2129 = vst [vmem:[#allocation1 + $0x21] ss:$4 sm:$0xff] %v5091_v49  ;;  %v2975_v63 = vld [vmem:[#allocation2 + $0x50] sm:$0x1] }
 0x183   : > { %v3303_v36 = vpack.c.bf16 %v3287_v20, %v3287_v20  ;;  %v3304_v51 = vpack.c.bf16 %v3288_v30, %v3288_v30  ;;  %v2558_v47 = vadd.f32 %v2517_v10, %v2420_v8  ;;  %v2661_v19 = vmul.f32 %v4612_v59, %v2591_v57  ;;  %2130 = vst [vmem:[#allocation1 + $0x22] ss:$4 sm:$0xff] %v5093_v23 }
 0x184   : > { %v2780_v55 = vunpack.c.l.bf16 %v2772_v26  ;;  %v2623_v42 = vadd.f32 %v2607_v12, %v2557_v2  ;;  %v2662_v34 = vmul.f32 %v4612_v59, %v2643_v7  ;;  %v2716_v41 = vrot.slane %v2660_v31, 1  ;;  %2131 = vst [vmem:[#allocation1 + $0x23] ss:$4 sm:$0xff] %v5095_v54 }
 0x185   : > { %v3355_v45 = vunpack.c.l.b16 %v3303_v36  ;;  %v3356_v58 = vunpack.c.l.b16 %v3304_v51  ;;  %v2624_v4 = vadd.f32 %v2608_v3, %v2558_v47  ;;  %v2717_v40 = vrot.slane %v2661_v19, 1  ;;  %v3112_v3 = vld [vmem:[#allocation2 + $0x48] sm:$0xe] }
 0x186   : > { %v2797_v17 = vmul.f32 %v4605_v52, %v2780_v55  ;;  %v2719_v1 = vrot.slane %v2662_v34, 1  ;;  %v2798_v60 = vmul.f32 %v4605_v52, %v2591_v57  ;;  %v2799_v9 = vmul.f32 %v4605_v52, %v2643_v7  ;;  %v2294_v34 = vld [vmem:[#allocation2 + $0x44] sm:$0x1] }
 0x187   : > { %v5295_v39 = vunpack.c.l.bf16 %v5252_v33  ;;  %v3368_v27 = vpack.c.b16 %v3356_v58, %v3355_v45  ;;  %v2718_v37 = vsel %vm2354_vm1, %v2716_v41, %v2717_v40  ;;  %v5300_v20 = vunpack.c.h.bf16 %v5252_v33  ;;  %v2432_v41 = vld [vmem:[#allocation2 + $0x3c] sm:$0xe] }
 0x188   : > { %v2853_v44 = vrot.slane %v2797_v17, 2  ;;  %v2720_v49 = vsel %vm2354_vm1, %v2717_v40, %v2719_v1  ;;  %v2760_v57 = vadd.f32 %v2718_v37, %v2623_v42  ;;  %v2854_v21 = vrot.slane %v2798_v60, 2  ;;  %v2250_v42 = vld [vmem:[#allocation2 + $0x3c] sm:$0xff]  }
 0x189   : > { %v2856_v12 = vrot.slane %v2799_v9, 2  ;;  %3452 = vmatmul.bf16.gmra.mxu1 %v3368_v27  ;;  %v2761_v26 = vadd.f32 %v2720_v49, %v2624_v4  ;;  %v2947_v23 = vmul.f32 %v5295_v39, %v4764_v29  ;;  %v2948_v18 = vmul.f32 %v5300_v20, %v4764_v29  ;;  %v5322_v17 = vld.sshfl [vmem:[#allocation1] sm:$0xff pattern:$0x73625140] }
 0x18a   : > { %v2983_v30 = vunpack.c.l.bf16 %v2975_v63  ;;  %v2855_v33 = vsel %vm2492_vm3, %v2853_v44, %v2854_v21  ;;  %v3000_v54 = vmul.f32 %v5295_v39, %v4810_v15  ;;  %v3001_v6 = vmul.f32 %v5300_v20, %v4810_v15  ;;  %2134 = vst [vmem:[#allocation1] ss:$4 sm:$0xff] %v5119_v0 }
 0x18b   : > { %v2857_v8 = vsel %vm2492_vm3, %v2854_v21, %v2856_v12  ;;  %v2897_v10 = vadd.f32 %v2855_v33, %v2760_v57  ;;  %v3120_v7 = vunpack.c.l.bf16 %v3112_v3  ;;  %v3138_v51 = vmul.f32 %v5239_v16, %v5300_v20 }
 0x18c   : > { %v2898_v36 = vadd.f32 %v2857_v8, %v2761_v26  ;;  %v3002_v2 = vmul.f32 %v4810_v15, %v2983_v30  ;;  %v3056_v31 = vrot.slane %v3000_v54, 1  ;;  %v3057_v48 = vrot.slane %v3001_v6, 1  ;;  %v5344_v8 = vld [vmem:[%s5626_s4] ss:$0 sm:$0xff] }
 0x18d   : > { %v3139_v47 = vmul.f32 %v5239_v16, %v2983_v30  ;;  %v2963_v19 = vadd.f32 %v2947_v23, %v2897_v10  ;;  %v3137_v45 = vmul.f32 %v5239_v16, %v3120_v7  ;;  %v3194_v58 = vrot.slane %v3138_v51, 2 }
 0x18e   : > { %v2964_v55 = vadd.f32 %v2948_v18, %v2898_v36  ;;  %v3059_v22 = vrot.slane %v3002_v2, 1  ;;  %v3058_v53 = vsel %vm2354_vm1, %v3056_v31, %v3057_v48  ;;  %v2199_v40 = vpack.c.bf16 %v5245_v5, %v5245_v5  ;;  %v5331_v5 = vld.sshfl [vmem:[#allocation1 + $0x20] sm:$0xff pattern:$0x73625140]  ;;  %v2636_v2 = vld [vmem:[#allocation2 + $0x50] sm:$0x1] }
 0x18f   : > { %v3196_v4 = vrot.slane %v3139_v47, 2  ;;  %v3100_v60 = vadd.f32 %v3058_v53, %v2963_v19  ;;  %v3193_v9 = vrot.slane %v3137_v45, 2  ;;  %v2200_v63 = vpack.c.bf16 %v5269_v38, %v5269_v38  ;;  %2136 = vst [vmem:[#allocation1 + $0x20] ss:$4 sm:$0xff] %v5158_v56 }
 0x190   : > { %v3060_v1 = vsel %vm2354_vm1, %v3057_v48, %v3059_v22  ;;  %v2201_v44 = vpack.c.bf16 %v5282_v61, %v5282_v61  ;;  %2229 = vst [vmem:[#allocation2 + $0x54] sm:$0xf] %v2199_v40  ;;  %v2266_v49 = vunpack.c.l.bf16 %v2250_v42  ;;  %v2267_v21 = vunpack.c.h.bf16 %v2250_v42 }
 0x191   : > { %v3101_v27 = vadd.f32 %v3060_v1, %v2964_v55  ;;  %v3197_v37 = vsel %vm2492_vm3, %v3194_v58, %v3196_v4  ;;  %v3195_v57 = vsel %vm2492_vm3, %v3193_v9, %v3194_v58  ;;  %2230 = vst [vmem:[#allocation2 + $0x58] sm:$0xf] %v2200_v63  ;;  %v2302_v12 = vunpack.c.l.bf16 %v2294_v34  ;;  %v5354_v22 = vld.sshfl [vmem:[#allocation1] sm:$0xff pattern:$0x73625140] }
 0x192   : > { %v2440_v3 = vunpack.c.l.bf16 %v2432_v41  ;;  %v3237_v26 = vadd.f32 %v3195_v57, %v3100_v60  ;;  %2231 = vst [vmem:[#allocation2 + $0x5c] sm:$0x1] %v2201_v44  ;;  %v2283_v0 = vmul.f32 %v4541_v43, %v2266_v49  ;;  %v2321_v23 = vmul.f32 %v4507_v11, %v2266_v49  ;;  %v2773_v4 = vld [vmem:[#allocation2 + $0x48] sm:$0xe] }
 0x193   : > { %v3238_v38 = vadd.f32 %v3197_v37, %v3101_v27  ;;  %v2284_v18 = vmul.f32 %v4541_v43, %v2267_v21  ;;  %v2322_v61 = vmul.f32 %v4507_v11, %v2267_v21  ;;  %v2323_v30 = vmul.f32 %v4507_v11, %v2302_v12  ;;  %2137 = vst [vmem:[#allocation1 + $0x21] ss:$4 sm:$0xff] %v5160_v25 }
 0x194   : > { %v2459_v33 = vmul.f32 %v4530_v35, %v2440_v3  ;;  %v3257_v54 = vadd.f32 %v5344_v8, %v3237_v26  ;;  %v2380_v10 = vrot.slane %v2321_v23, 1  ;;  %v2460_v36 = vmul.f32 %v4530_v35, %v2267_v21  ;;  %2138 = vst [vmem:[#allocation1 + $0x22] ss:$4 sm:$0xff] %v5162_v13 }
 0x195   : > { %v3258_v6 = vadd.f32 %v5344_v8, %v3238_v38  ;;  %v2381_v7 = vrot.slane %v2322_v61, 1  ;;  %v2383_v31 = vrot.slane %v2323_v30, 1  ;;  %v2461_v48 = vmul.f32 %v4530_v35, %v2302_v12  ;;  %2139 = vst [vmem:[#allocation1 + $0x23] ss:$4 sm:$0xff] %v5165_v32 }
 0x196   : > { %v2518_v56 = vrot.slane %v2459_v33, 2  ;;  %v3273_v51 = vmax.f32 %v3257_v54, 0.0  ;;  %v2519_v19 = vrot.slane %v2460_v36, 2  ;;  %v2609_v55 = vmul.f32 %v5295_v39, %v4600_v14  ;;  %2141 = vst [vmem:[#allocation1] ss:$4 sm:$0xff] %v5172_v62 }
 0x197   : > { %v3274_v47 = vmax.f32 %v3258_v6, 0.0  ;;  %v2382_v45 = vsel %vm2354_vm1, %v2380_v10, %v2381_v7  ;;  %v2384_v42 = vsel %vm2354_vm1, %v2381_v7, %v2383_v31  ;;  %v2521_v25 = vrot.slane %v2461_v48, 2  ;;  %2142 = vst [vmem:[#allocation1 + $0x1] ss:$4 sm:$0xff] %v5176_v28 }
 0x198   : > { %v2610_v34 = vmul.f32 %v5300_v20, %v4600_v14  ;;  %v3289_v41 = vmin.f32 %v3273_v51, 6.0  ;;  %v2421_v58 = vadd.f32 %v2382_v45, %v2283_v0  ;;  %v2422_v13 = vadd.f32 %v2384_v42, %v2284_v18  ;;  %v2916_v12 = vld [vmem:[#allocation2 + $0x54] sm:$0xff]   ;;  %2143 = vst [vmem:[#allocation1 + $0x2] ss:$4 sm:$0xff] %v5178_v50 }
 0x199   : > { %v3290_v53 = vmin.f32 %v3274_v47, 6.0  ;;  %v2520_v40 = vsel %vm2492_vm3, %v2518_v56, %v2519_v19  ;;  %v2522_v1 = vsel %vm2492_vm3, %v2519_v19, %v2521_v25  ;;  %v2644_v60 = vunpack.c.l.bf16 %v2636_v2  ;;  %2144 = vst [vmem:[#allocation1 + $0x3] ss:$4 sm:$0xff] %v5191_v24  ;;  %v2976_v6 = vld [vmem:[#allocation2 + $0x5c] sm:$0x1] }
 0x19a   : > { %v2663_v9 = vmul.f32 %v5295_v39, %v4612_v59  ;;  %v3305_v63 = vpack.c.bf16 %v3289_v41, %v3289_v41  ;;  %v2559_v37 = vadd.f32 %v2520_v40, %v2421_v58  ;;  %v2560_v44 = vadd.f32 %v2522_v1, %v2422_v13  ;;  %v3113_v24 = vld [vmem:[#allocation2 + $0x54] sm:$0xe] }
 0x19b   : > { %v3306_v27 = vpack.c.bf16 %v3290_v53, %v3290_v53  ;;  %v2664_v49 = vmul.f32 %v5300_v20, %v4612_v59  ;;  %v2665_v32 = vmul.f32 %v4612_v59, %v2644_v60  ;;  %v2781_v21 = vunpack.c.l.bf16 %v2773_v4 }
 0x19c   : > { %v2721_v57 = vrot.slane %v2663_v9, 1  ;;  %v3357_v3 = vunpack.c.l.b16 %v3305_v63  ;;  %v2625_v38 = vadd.f32 %v2609_v55, %v2559_v37  ;;  %v2626_v62 = vadd.f32 %v2610_v34, %v2560_v44  ;;  %v2295_v9 = vld [vmem:[#allocation2 + $0x50] sm:$0x1] }
 0x19d   : > { %v3358_v26 = vunpack.c.l.b16 %v3306_v27  ;;  %v2722_v0 = vrot.slane %v2664_v49, 1  ;;  %v2724_v23 = vrot.slane %v2665_v32, 1  ;;  %v2800_v28 = vmul.f32 %v4605_v52, %v2781_v21  ;;  %v5390_v49 = vld.sshfl [vmem:[#allocation1 + $0x20] sm:$0xff pattern:$0x73625140] }
 0x19e   : > { %v2801_v18 = vmul.f32 %v5300_v20, %v4605_v52  ;;  %v2802_v30 = vmul.f32 %v4605_v52, %v2644_v60  ;;  %v2932_v33 = vunpack.c.l.bf16 %v2916_v12  ;;  %v2933_v54 = vunpack.c.h.bf16 %v2916_v12  ;;  %2145 = vst [vmem:[#allocation1 + $0x20] ss:$4 sm:$0xff] %v5196_v46 }
 0x19f   : > { %v3369_v61 = vpack.c.b16 %v3358_v26, %v3357_v3  ;;  %v2723_v50 = vsel %vm2354_vm1, %v2721_v57, %v2722_v0  ;;  %v2725_v10 = vsel %vm2354_vm1, %v2722_v0, %v2724_v23  ;;  %v2858_v36 = vrot.slane %v2800_v28, 2  ;;  %v2433_v3 = vld [vmem:[#allocation2 + $0x48] sm:$0xe] }
 0x1a0   : > { %v2859_v2 = vrot.slane %v2801_v18, 2  ;;  %v2762_v7 = vadd.f32 %v2723_v50, %v2625_v38  ;;  %v2763_v31 = vadd.f32 %v2725_v10, %v2626_v62  ;;  %v2861_v48 = vrot.slane %v2802_v30, 2  ;;  %v2578_v50 = vld [vmem:[#allocation2 + $0x54] sm:$0xff]  }
 0x1a1   : > { %3457 = vmatmul.bf16.gmra.mxu1 %v3369_v61  ;;  %v2949_v56 = vmul.f32 %v4764_v29, %v2932_v33  ;;  %v2950_v47 = vmul.f32 %v4764_v29, %v2933_v54  ;;  %v2984_v19 = vunpack.c.l.bf16 %v2976_v6  ;;  %v3003_v55 = vmul.f32 %v4810_v15, %v2932_v33 }
 0x1a2   : > { %v2860_v51 = vsel %vm2492_vm3, %v2858_v36, %v2859_v2  ;;  %v2862_v45 = vsel %vm2492_vm3, %v2859_v2, %v2861_v48  ;;  %v3004_v25 = vmul.f32 %v4810_v15, %v2933_v54  ;;  %v3121_v34 = vunpack.c.l.bf16 %v3113_v24 }
 0x1a3   : > { %v2899_v42 = vadd.f32 %v2860_v51, %v2762_v7  ;;  %v2900_v41 = vadd.f32 %v2862_v45, %v2763_v31  ;;  %v3005_v53 = vmul.f32 %v4810_v15, %v2984_v19  ;;  %v3061_v58 = vrot.slane %v3003_v55, 1 }
 0x1a4   : > { %v3141_v13 = vmul.f32 %v5239_v16, %v2933_v54  ;;  %v3062_v40 = vrot.slane %v3004_v25, 1  ;;  %v3140_v1 = vmul.f32 %v5239_v16, %v3121_v34  ;;  %v3142_v60 = vmul.f32 %v5239_v16, %v2984_v19 }
 0x1a5   : > { %v2965_v4 = vadd.f32 %v2949_v56, %v2899_v42  ;;  %v2966_v63 = vadd.f32 %v2950_v47, %v2900_v41  ;;  %v3064_v27 = vrot.slane %v3005_v53, 1  ;;  %v2204_v44 = vpack.c.bf16 %v5354_v22, %v5354_v22 }
 0x1a6   : > { %v3199_v37 = vrot.slane %v3141_v13, 2  ;;  %v3063_v32 = vsel %vm2354_vm1, %v3061_v58, %v3062_v40  ;;  %v3198_v57 = vrot.slane %v3140_v1, 2  ;;  %v3201_v21 = vrot.slane %v3142_v60, 2  ;;  %v2774_v60 = vld [vmem:[#allocation2 + $0x54] sm:$0xe] }
 0x1a7   : > { %v5395_v12 = vpack.c.bf16 %v5331_v5, %v5322_v17  ;;  %v3065_v26 = vsel %vm2354_vm1, %v3062_v40, %v3064_v27  ;;  %v3102_v38 = vadd.f32 %v3063_v32, %v2965_v4  ;;  %2234 = vst [vmem:[#allocation2 + $0x68] sm:$0x1] %v2204_v44  ;;  %v2285_v22 = vmul.f32 %v5295_v39, %v4541_v43 }
 0x1a8   : > { %v2286_v62 = vmul.f32 %v5300_v20, %v4541_v43  ;;  %v3103_v0 = vadd.f32 %v3065_v26, %v2966_v63  ;;  %v3200_v23 = vsel %vm2492_vm3, %v3198_v57, %v3199_v37  ;;  %v3202_v28 = vsel %vm2492_vm3, %v3199_v37, %v3201_v21 }
 0x1a9   : > { %3943 = vst [vmem:[#allocation2 + $0x60] sm:$0xff] %v5395_v12   ;;  %v2303_v17 = vunpack.c.l.bf16 %v2295_v9  ;;  %v3239_v5 = vadd.f32 %v3200_v23, %v3102_v38  ;;  %v2324_v46 = vmul.f32 %v5295_v39, %v4507_v11  ;;  %v2325_v18 = vmul.f32 %v5300_v20, %v4507_v11 }
 0x1aa   : > { %v2441_v61 = vunpack.c.l.bf16 %v2433_v3  ;;  %v3240_v30 = vadd.f32 %v3202_v28, %v3103_v0  ;;  %v2463_v54 = vmul.f32 %v5300_v20, %v4530_v35  ;;  %v2594_v19 = vunpack.c.l.bf16 %v2578_v50  ;;  %v2637_v20 = vld [vmem:[#allocation2 + $0x5c] sm:$0x1] }
 0x1ab   : > { %v2326_v33 = vmul.f32 %v4507_v11, %v2303_v17  ;;  %v2464_v6 = vmul.f32 %v4530_v35, %v2303_v17  ;;  %v3259_v10 = vadd.f32 %v5344_v8, %v3239_v5  ;;  %v2385_v36 = vrot.slane %v2324_v46, 1 }
 0x1ac   : > { %v2386_v2 = vrot.slane %v2325_v18, 1  ;;  %v2462_v24 = vmul.f32 %v4530_v35, %v2441_v61  ;;  %v3260_v39 = vadd.f32 %v5344_v8, %v3240_v30  ;;  %v2524_v31 = vrot.slane %v2463_v54, 2 }
 0x1ad   : > { %v2388_v7 = vrot.slane %v2326_v33, 1  ;;  %v2526_v48 = vrot.slane %v2464_v6, 2  ;;  %v3275_v56 = vmax.f32 %v3259_v10, 0.0  ;;  %v2595_v58 = vunpack.c.h.bf16 %v2578_v50 }
 0x1ae   : > { %v2387_v51 = vsel %vm2354_vm1, %v2385_v36, %v2386_v2  ;;  %v2523_v47 = vrot.slane %v2462_v24, 2  ;;  %v3276_v55 = vmax.f32 %v3260_v39, 0.0  ;;  %v2611_v40 = vmul.f32 %v4600_v14, %v2594_v19  ;;  %v2977_v61 = vld [vmem:[#allocation2 + $0x68] sm:$0x1] }
 0x1af   : > { %v2389_v45 = vsel %vm2354_vm1, %v2386_v2, %v2388_v7  ;;  %v2423_v42 = vadd.f32 %v2387_v51, %v2285_v22  ;;  %v2527_v25 = vsel %vm2492_vm3, %v2524_v31, %v2526_v48  ;;  %v3291_v34 = vmin.f32 %v3275_v56, 6.0 }
 0x1b0   : > { %v2424_v41 = vadd.f32 %v2389_v45, %v2286_v62  ;;  %v2525_v53 = vsel %vm2492_vm3, %v2523_v47, %v2524_v31  ;;  %v3292_v13 = vmin.f32 %v3276_v55, 6.0  ;;  %v2645_v1 = vunpack.c.l.bf16 %v2637_v20  ;;  %v3114_v50 = vld [vmem:[#allocation2 + $0x60] sm:$0xe] }
 0x1b1   : > { %v2561_v4 = vadd.f32 %v2525_v53, %v2423_v42  ;;  %v3307_v9 = vpack.c.bf16 %v3291_v34, %v3291_v34  ;;  %v2612_v27 = vmul.f32 %v4600_v14, %v2595_v58  ;;  %v2666_v37 = vmul.f32 %v4612_v59, %v2594_v19  ;;  %v2146_v42 = vld.sshfl [vmem:[#allocation1] sm:$0xff pattern:$0x73625140] }
 0x1b2   : > { %v2562_v63 = vadd.f32 %v2527_v25, %v2424_v41  ;;  %v3308_v44 = vpack.c.bf16 %v3292_v13, %v3292_v13  ;;  %v2667_v57 = vmul.f32 %v4612_v59, %v2595_v58  ;;  %v2668_v21 = vmul.f32 %v4612_v59, %v2645_v1 }
 0x1b3   : > { %v2627_v32 = vadd.f32 %v2611_v40, %v2561_v4  ;;  %v3359_v3 = vunpack.c.l.b16 %v3307_v9  ;;  %v2726_v38 = vrot.slane %v2666_v37, 1  ;;  %v2782_v22 = vunpack.c.l.bf16 %v2774_v60  ;;  %v2254_v60 = vld [vmem:[#allocation2 + $0x54] sm:$0xff]  }
 0x1b4   : > { %v2628_v26 = vadd.f32 %v2612_v27, %v2562_v63  ;;  %v3360_v62 = vunpack.c.l.b16 %v3308_v44  ;;  %v2727_v0 = vrot.slane %v2667_v57, 1  ;;  %v2729_v23 = vrot.slane %v2668_v21, 1  ;;  %v2434_v9 = vld [vmem:[#allocation2 + $0x54] sm:$0xe] }
 0x1b5   : > { %v2804_v28 = vmul.f32 %v4605_v52, %v2595_v58  ;;  %v2803_v17 = vmul.f32 %v4605_v52, %v2782_v22  ;;  %v2805_v5 = vmul.f32 %v4605_v52, %v2645_v1  ;;  %v5430_v46 = vunpack.c.l.bf16 %v5395_v12  ;;  %v2147_v58 = vld.sshfl [vmem:[#allocation1 + $0x20] sm:$0xff pattern:$0x73625140] }
 0x1b6   : > { %v5433_v18 = vunpack.c.h.bf16 %v5395_v12  ;;  %v3370_v30 = vpack.c.b16 %v3360_v62, %v3359_v3  ;;  %v2728_v33 = vsel %vm2354_vm1, %v2726_v38, %v2727_v0  ;;  %v2730_v54 = vsel %vm2354_vm1, %v2727_v0, %v2729_v23 }
 0x1b7   : > { %v2864_v6 = vrot.slane %v2804_v28, 2  ;;  %v2764_v10 = vadd.f32 %v2728_v33, %v2627_v32  ;;  %v2765_v36 = vadd.f32 %v2730_v54, %v2628_v26  ;;  %v2863_v2 = vrot.slane %v2803_v17, 2  ;;  %v2296_v32 = vld [vmem:[#allocation2 + $0x5c] sm:$0x1] }
 0x1b8   : > { %v2866_v24 = vrot.slane %v2805_v5, 2  ;;  %3462 = vmatmul.bf16.vlgmr.msra.gmra.mxu3 %v3370_v30  ;;  %v2951_v39 = vmul.f32 %v5430_v46, %v4764_v29  ;;  %v2952_v12 = vmul.f32 %v5433_v18, %v4764_v29  ;;  %v2985_v7 = vunpack.c.l.bf16 %v2977_v61 }
 0x1b9   : > { %v3006_v31 = vmul.f32 %v5430_v46, %v4810_v15  ;;  %v2865_v48 = vsel %vm2492_vm3, %v2863_v2, %v2864_v6  ;;  %v3007_v51 = vmul.f32 %v5433_v18, %v4810_v15  ;;  %v3122_v47 = vunpack.c.l.bf16 %v3114_v50 }
 0x1ba   : > { %v2867_v56 = vsel %vm2492_vm3, %v2864_v6, %v2866_v24  ;;  %v2901_v19 = vadd.f32 %v2865_v48, %v2764_v10  ;;  %v3008_v55 = vmul.f32 %v4810_v15, %v2985_v7  ;;  %v3144_v41 = vmul.f32 %v5239_v16, %v5433_v18 }
 0x1bb   : > { %v2902_v20 = vadd.f32 %v2867_v56, %v2765_v36  ;;  %v3066_v45 = vrot.slane %v3006_v31, 1  ;;  %v3067_v25 = vrot.slane %v3007_v51, 1  ;;  %v3143_v34 = vmul.f32 %v5239_v16, %v3122_v47 }
 0x1bc   : > { %v3145_v53 = vmul.f32 %v5239_v16, %v2985_v7  ;;  %v2967_v13 = vadd.f32 %v2951_v39, %v2901_v19  ;;  %v3069_v40 = vrot.slane %v3008_v55, 1  ;;  %v2205_v1 = vpack.c.bf16 %v5390_v49, %v5390_v49  ;;  %v2638_v19 = vld [vmem:[#allocation2 + $0x68] sm:$0x1] }
 0x1bd   : > { %v2968_v4 = vadd.f32 %v2952_v12, %v2902_v20  ;;  %v3068_v63 = vsel %vm2354_vm1, %v3066_v45, %v3067_v25  ;;  %v3203_v27 = vrot.slane %v3143_v34, 2  ;;  %v3204_v37 = vrot.slane %v3144_v41, 2 }
 0x1be   : > { %v3206_v44 = vrot.slane %v3145_v53, 2  ;;  %v3070_v57 = vsel %vm2354_vm1, %v3067_v25, %v3069_v40  ;;  %v3104_v21 = vadd.f32 %v3068_v63, %v2967_v13  ;;  %v2206_v3 = vpack.c.bf16 %v2146_v42, %v2146_v42  ;;  %2235 = vst [vmem:[#allocation2 + $0x6c] sm:$0xf] %v2205_v1  ;;  %v2775_v53 = vld [vmem:[#allocation2 + $0x60] sm:$0xe] }
 0x1bf   : > { %v2207_v26 = vpack.c.bf16 %v2147_v58, %v2147_v58  ;;  %v3105_v38 = vadd.f32 %v3070_v57, %v2968_v4  ;;  %v3205_v22 = vsel %vm2492_vm3, %v3203_v27, %v3204_v37  ;;  %v2270_v49 = vunpack.c.l.bf16 %v2254_v60 }
 0x1c0   : > { %v3207_v62 = vsel %vm2492_vm3, %v3204_v37, %v3206_v44  ;;  %v3241_v0 = vadd.f32 %v3205_v22, %v3104_v21  ;;  %2236 = vst [vmem:[#allocation2 + $0x70] sm:$0xf] %v2206_v3  ;;  %v2271_v23 = vunpack.c.h.bf16 %v2254_v60  ;;  %v2304_v28 = vunpack.c.l.bf16 %v2296_v32 }
 0x1c1   : > { %v2442_v17 = vunpack.c.l.bf16 %v2434_v9  ;;  %v3242_v5 = vadd.f32 %v3207_v62, %v3105_v38  ;;  %2237 = vst [vmem:[#allocation2 + $0x74] sm:$0x1] %v2207_v26  ;;  %v2287_v61 = vmul.f32 %v4541_v43, %v2270_v49  ;;  %v2327_v30 = vmul.f32 %v4507_v11, %v2270_v49 }
 0x1c2   : > { %v2613_v33 = vmul.f32 %v5430_v46, %v4600_v14  ;;  %v3261_v54 = vadd.f32 %v5344_v8, %v3241_v0  ;;  %v2288_v6 = vmul.f32 %v4541_v43, %v2271_v23  ;;  %v2328_v50 = vmul.f32 %v4507_v11, %v2271_v23 }
 0x1c3   : > { %v2329_v10 = vmul.f32 %v4507_v11, %v2304_v28  ;;  %v3262_v36 = vadd.f32 %v5344_v8, %v3242_v5  ;;  %v2390_v2 = vrot.slane %v2327_v30, 1  ;;  %v2465_v24 = vmul.f32 %v4530_v35, %v2442_v17 }
 0x1c4   : > { %v2466_v39 = vmul.f32 %v4530_v35, %v2271_v23  ;;  %v3277_v12 = vmax.f32 %v3261_v54, 0.0  ;;  %v2391_v7 = vrot.slane %v2328_v50, 1  ;;  %v2467_v48 = vmul.f32 %v4530_v35, %v2304_v28  ;;  %v5475_v35 = vpop.f32.mrf.mxu1 }
 0x1c5   : > { %v2393_v31 = vrot.slane %v2329_v10, 1  ;;  %v3278_v56 = vmax.f32 %v3262_v36, 0.0  ;;  %v2528_v51 = vrot.slane %v2465_v24, 2  ;;  %v2614_v43 = vmul.f32 %v5433_v18, %v4600_v14 }
 0x1c6   : > { %v2529_v47 = vrot.slane %v2466_v39, 2  ;;  %v3293_v11 = vmin.f32 %v3277_v12, 6.0  ;;  %v2392_v20 = vsel %vm2354_vm1, %v2390_v2, %v2391_v7  ;;  %v2531_v45 = vrot.slane %v2467_v48, 2 }
 0x1c7   : > { %v2394_v55 = vsel %vm2354_vm1, %v2391_v7, %v2393_v31  ;;  %v3294_v42 = vmin.f32 %v3278_v56, 6.0  ;;  %v2425_v25 = vadd.f32 %v2392_v20, %v2287_v61  ;;  %v2646_v14 = vunpack.c.l.bf16 %v2638_v19  ;;  %v2920_v32 = vld [vmem:[#allocation2 + $0x6c] sm:$0xff]  }
 0x1c8   : > { %v2426_v34 = vadd.f32 %v2394_v55, %v2288_v6  ;;  %v2530_v41 = vsel %vm2492_vm3, %v2528_v51, %v2529_v47  ;;  %v3309_v58 = vpack.c.bf16 %v3293_v11, %v3293_v11  ;;  %v2532_v13 = vsel %vm2492_vm3, %v2529_v47, %v2531_v45  ;;  %v2978_v28 = vld [vmem:[#allocation2 + $0x74] sm:$0x1]  ;;  %v5506_v47 = vld [vmem:[%s5628_s6] ss:$0 sm:$0xff] }
 0x1c9   : > { %v2669_v4 = vmul.f32 %v5430_v46, %v4612_v59  ;;  %v3310_v40 = vpack.c.bf16 %v3294_v42, %v3294_v42  ;;  %v2563_v1 = vadd.f32 %v2530_v41, %v2425_v25  ;;  %v2670_v9 = vmul.f32 %v5433_v18, %v4612_v59 }
 0x1ca   : > { %v2564_v60 = vadd.f32 %v2532_v13, %v2426_v34  ;;  %v3361_v63 = vunpack.c.l.b16 %v3309_v58  ;;  %v2671_v27 = vmul.f32 %v4612_v59, %v2646_v14  ;;  %v2783_v44 = vunpack.c.l.bf16 %v2775_v53  ;;  %v3818_v58 = vld [vmem:[%s4235_s16 + $0x14] sm:$0x1] }
 0x1cb   : > { %v2731_v37 = vrot.slane %v2669_v4, 1  ;;  %v3362_v57 = vunpack.c.l.b16 %v3310_v40  ;;  %v2629_v21 = vadd.f32 %v2613_v33, %v2563_v1  ;;  %v2732_v26 = vrot.slane %v2670_v9, 1  ;;  %v3115_v33 = vld [vmem:[#allocation2 + $0x6c] sm:$0xe]  ;;  %v3954_v4 = vld [vmem:[%s4235_s16 + $0x18] sm:$0xff]  }
 0x1cc   : > { %v2630_v3 = vadd.f32 %v2614_v43, %v2564_v60  ;;  %v2734_v38 = vrot.slane %v2671_v27, 1  ;;  %v2806_v46 = vmul.f32 %v4605_v52, %v2783_v44  ;;  %v2807_v22 = vmul.f32 %v5433_v18, %v4605_v52  ;;  %v3440_v50 = vpop.f32.mrf.mxu1  ;;  %v3816_v43 = vld [vmem:[%s4235_s16 + $0xc] sm:$0xff]   ;;  %v3821_v40 = vld [vmem:[%s4235_s16 + $0x20] sm:$0x1] }
 0x1cd   : > { %v2808_v62 = vmul.f32 %v4605_v52, %v2646_v14  ;;  %v3371_v49 = vpack.c.b16 %v3362_v57, %v3361_v63  ;;  %v2733_v59 = vsel %vm2354_vm1, %v2731_v37, %v2732_v26  ;;  %v2936_v0 = vunpack.c.l.bf16 %v2920_v32 }
 0x1ce   : > { %v2937_v23 = vunpack.c.h.bf16 %v2920_v32  ;;  %v2735_v17 = vsel %vm2354_vm1, %v2732_v26, %v2734_v38  ;;  %v2766_v5 = vadd.f32 %v2733_v59, %v2629_v21  ;;  %v2868_v61 = vrot.slane %v2806_v46, 2 }
 0x1cf   : > { %v2869_v30 = vrot.slane %v2807_v22, 2  ;;  %3467 = vmatmul.bf16.gmra.mxu3 %v3371_v49  ;;  %v2767_v54 = vadd.f32 %v2735_v17, %v2630_v3  ;;  %v2871_v6 = vrot.slane %v2808_v62, 2  ;;  %v2953_v18 = vmul.f32 %v4764_v29, %v2936_v0 }
 0x1d0   : > { %v2954_v52 = vmul.f32 %v4764_v29, %v2937_v23  ;;  %v2986_v36 = vunpack.c.l.bf16 %v2978_v28  ;;  %v3009_v2 = vmul.f32 %v4810_v15, %v2936_v0  ;;  %v3010_v24 = vmul.f32 %v4810_v15, %v2937_v23 }
 0x1d1   : > { %v2870_v10 = vsel %vm2492_vm3, %v2868_v61, %v2869_v30  ;;  %v2872_v39 = vsel %vm2492_vm3, %v2869_v30, %v2871_v6  ;;  %v3123_v7 = vunpack.c.l.bf16 %v3115_v33  ;;  %v3147_v29 = vmul.f32 %v5239_v16, %v2937_v23  ;;  %v3822_v61 = vld [vmem:[%s4235_s16 + $0x24] sm:$0xff]  }
 0x1d2   : > { %v2903_v12 = vadd.f32 %v2870_v10, %v2766_v5  ;;  %v2904_v31 = vadd.f32 %v2872_v39, %v2767_v54  ;;  %v3011_v48 = vmul.f32 %v4810_v15, %v2986_v36  ;;  %v3071_v56 = vrot.slane %v3009_v2, 1 }
 0x1d3   : > { %v3072_v51 = vrot.slane %v3010_v24, 1  ;;  %v3146_v11 = vmul.f32 %v5239_v16, %v3123_v7  ;;  %v3148_v20 = vmul.f32 %v5239_v16, %v2986_v36  ;;  %v3209_v55 = vrot.slane %v3147_v29, 2 }
 0x1d4   : > { %v2969_v19 = vadd.f32 %v2953_v18, %v2903_v12  ;;  %v2970_v15 = vadd.f32 %v2954_v52, %v2904_v31  ;;  %v3074_v42 = vrot.slane %v3011_v48, 1  ;;  %v3506_v53 = vunpack.c.l.bf16 %v3816_v43  ;;  %v3443_v27 = vpop.f32.mrf.mxu1 }
 0x1d5   : > { %v3073_v45 = vsel %vm2354_vm1, %v3071_v56, %v3072_v51  ;;  %v3208_v34 = vrot.slane %v3146_v11, 2  ;;  %v3211_v41 = vrot.slane %v3148_v20, 2  ;;  %v3439_v16 = vadd.f32 %v5506_v47, %v5475_v35  ;;  %v3824_v20 = vld [vmem:[%s4235_s16 + $0x2c] sm:$0x1] }
 0x1d6   : > { %v3106_v25 = vadd.f32 %v3073_v45, %v2969_v19  ;;  %v3075_v13 = vsel %vm2354_vm1, %v3072_v51, %v3074_v42  ;;  %v3507_v14 = vunpack.c.h.bf16 %v3816_v43  ;;  %v3554_v9 = vrot.slane %v3506_v53, 1 }
 0x1d7   : > { %v3107_v1 = vadd.f32 %v3075_v13, %v2970_v15  ;;  %v3210_v60 = vsel %vm2492_vm3, %v3208_v34, %v3209_v55  ;;  %v3441_v63 = vadd.f32 %v5506_v47, %v3440_v50  ;;  %v3212_v37 = vsel %vm2492_vm3, %v3209_v55, %v3211_v41 }
 0x1d8   : > { %v3243_v44 = vadd.f32 %v3210_v60, %v3106_v25  ;;  %v3555_v32 = vrot.slane %v3507_v14, 1  ;;  %v3508_v57 = vunpack.c.l.bf16 %v3818_v58  ;;  %v3926_v3 = vunpack.c.l.bf16 %v3954_v4 }
 0x1d9   : > { %v3244_v21 = vadd.f32 %v3212_v37, %v3107_v1  ;;  %v3927_v35 = vunpack.c.h.bf16 %v3954_v4  ;;  %v3511_v26 = vunpack.c.l.bf16 %v3821_v40  ;;  %v3444_v62 = vadd.f32 %v5506_v47, %v3443_v27  ;;  %v3955_v4 = vld [vmem:[%s4235_s16 + $0x30] sm:$0xff]  }
 0x1da   : > { %v3263_v38 = vadd.f32 %v5344_v8, %v3243_v44  ;;  %v3556_v46 = vsel %vm2354_vm1, %v3554_v9, %v3555_v32  ;;  %v3557_v22 = vrot.slane %v3508_v57, 1  ;;  %v3559_v0 = vrot.slane %v3926_v3, 1 }
 0x1db   : > { %v3264_v49 = vadd.f32 %v5344_v8, %v3244_v21  ;;  %v3610_v59 = vadd.f32 %v3556_v46, %v3439_v16  ;;  %v3560_v23 = vrot.slane %v3927_v35, 1  ;;  %v3562_v5 = vrot.slane %v3511_v26, 1 }
 0x1dc   : > { %v3279_v28 = vmax.f32 %v3263_v38, 0.0  ;;  %v3558_v17 = vsel %vm2354_vm1, %v3555_v32, %v3557_v22  ;;  %v3445_v10 = vpop.f32.mrf.mxu1  ;;  %v3512_v2 = vunpack.c.l.bf16 %v3822_v61  ;;  %v3513_v7 = vunpack.c.h.bf16 %v3822_v61  ;;  %v3828_v22 = vld [vmem:[%s4235_s16 + $0x3c] sm:$0xff]  }
 0x1dd   : > { %v3280_v30 = vmax.f32 %v3264_v49, 0.0  ;;  %v3626_v33 = vpack.c.bf16 %v3610_v59, %v3610_v59  ;;  %v3611_v54 = vadd.f32 %v3558_v17, %v3441_v63  ;;  %v3561_v8 = vsel %vm2354_vm1, %v3559_v0, %v3560_v23  ;;  %v3827_v63 = vld [vmem:[%s4235_s16 + $0x38] sm:$0x1] }
 0x1de   : > { %v3295_v6 = vmin.f32 %v3279_v28, 6.0  ;;  %v3612_v18 = vadd.f32 %v3561_v8, %v3444_v62  ;;  %v3563_v36 = vsel %vm2354_vm1, %v3560_v23, %v3562_v5  ;;  %v3446_v12 = vadd.f32 %v5506_v47, %v3445_v10  ;;  %v3830_v28 = vld [vmem:[%s4235_s16 + $0x44] sm:$0x1] }
 0x1df   : > { %v3296_v52 = vmin.f32 %v3280_v30, 6.0  ;;  %3643 = vst.msk [vmem:[%s5533_s23] sm:$0xf] %vm3642_vm4, %v3626_v33  ;;  %v3627_v50 = vpack.c.bf16 %v3611_v54, %v3611_v54  ;;  %v3564_v43 = vrot.slane %v3512_v2, 1  ;;  %v3565_v19 = vrot.slane %v3513_v7, 1 }
 0x1e0   : > { %v3311_v24 = vpack.c.bf16 %v3295_v6, %v3295_v6  ;;  %v3628_v39 = vpack.c.bf16 %v3612_v18, %v3612_v18  ;;  %v3613_v31 = vadd.f32 %v3563_v36, %v3446_v12  ;;  %v3514_v45 = vunpack.c.l.bf16 %v3824_v20  ;;  %v3956_v36 = vld [vmem:[%s4235_s16 + $0x48] sm:$0xff]   ;;  %v3833_v7 = vld [vmem:[%s4235_s16 + $0x50] sm:$0x1] }
 0x1e1   : > { %v3312_v29 = vpack.c.bf16 %v3296_v52, %v3296_v52  ;;  %3644 = vst.msk [vmem:[%s5533_s23 + $0x4] sm:$0xf] %vm3642_vm4, %v3627_v50  ;;  %v3566_v15 = vsel %vm2354_vm1, %v3564_v43, %v3565_v19  ;;  %v3930_v40 = vunpack.c.l.bf16 %v3955_v4  ;;  %v3931_v1 = vunpack.c.h.bf16 %v3955_v4 }
 0x1e2   : > { %3645 = vst.msk [vmem:[%s5533_s23 + $0x8] sm:$0xf] %vm3642_vm4, %v3628_v39  ;;  %v3363_v48 = vunpack.c.l.b16 %v3311_v24  ;;  %v3629_v51 = vpack.c.bf16 %v3613_v31, %v3613_v31  ;;  %v3567_v34 = vrot.slane %v3514_v45, 1  ;;  %v3517_v44 = vunpack.c.l.bf16 %v3827_v63  ;;  %v3834_v45 = vld [vmem:[%s4235_s16 + $0x54] sm:$0xff]  }
 0x1e3   : > { %v3364_v56 = vunpack.c.l.b16 %v3312_v29  ;;  %v3569_v60 = vrot.slane %v3930_v40, 1  ;;  %v3570_v9 = vrot.slane %v3931_v1, 1  ;;  %v3518_v49 = vunpack.c.l.bf16 %v3828_v22 }
 0x1e4   : > { %3646 = vst.msk [vmem:[%s5533_s23 + $0xc] sm:$0xf] %vm3642_vm4, %v3629_v51  ;;  %v3568_v58 = vsel %vm2354_vm1, %v3565_v19, %v3567_v34  ;;  %v3572_v21 = vrot.slane %v3517_v44, 1  ;;  %v3519_v59 = vunpack.c.h.bf16 %v3828_v22  ;;  %v3520_v61 = vunpack.c.l.bf16 %v3830_v28 }
 0x1e5   : > { %v3372_v11 = vpack.c.b16 %v3364_v56, %v3363_v48  ;;  %v3571_v37 = vsel %vm2354_vm1, %v3569_v60, %v3570_v9  ;;  %v3574_v0 = vrot.slane %v3518_v49, 1  ;;  %v3934_v2 = vunpack.c.l.bf16 %v3956_v36 }
 0x1e6   : > { %v3573_v26 = vsel %vm2354_vm1, %v3570_v9, %v3572_v21  ;;  %v3575_v23 = vrot.slane %v3519_v59, 1  ;;  %v3577_v54 = vrot.slane %v3520_v61, 1  ;;  %v3935_v24 = vunpack.c.h.bf16 %v3956_v36 }
 0x1e7   : > { %3472 = vmatmul.bf16.gmra.mxu3 %v3372_v11  ;;  %v3579_v39 = vrot.slane %v3934_v2, 1  ;;  %v3523_v48 = vunpack.c.l.bf16 %v3833_v7  ;;  %v3525_v34 = vunpack.c.h.bf16 %v3834_v45 }
 0x1e8   : > { %v3448_v55 = vpop.f32.mrf.mxu1  ;;  %v3576_v5 = vsel %vm2354_vm1, %v3574_v0, %v3575_v23  ;;  %v3578_v18 = vsel %vm2354_vm1, %v3575_v23, %v3577_v54  ;;  %v3580_v12 = vrot.slane %v3935_v24, 1 }
 0x1e9   : > { %v3449_v42 = vadd.f32 %v5506_v47, %v3448_v55  ;;  %v3582_v43 = vrot.slane %v3523_v48, 1 }
 0x1ea   : > { %v3581_v31 = vsel %vm2354_vm1, %v3579_v39, %v3580_v12 }
 0x1eb   : > { %v3614_v25 = vadd.f32 %v3566_v15, %v3449_v42  ;;  %v3583_v20 = vsel %vm2354_vm1, %v3580_v12, %v3582_v43 }
 0x1ed   : > { %v3630_v41 = vpack.c.bf16 %v3614_v25, %v3614_v25  ;;  %v3524_v25 = vunpack.c.l.bf16 %v3834_v45 }
 0x1ef   : > { %3647 = vst.msk [vmem:[%s5533_s23 + $0x10] sm:$0xf] %vm3642_vm4, %v3630_v41  ;;  %v3584_v41 = vrot.slane %v3524_v25, 1 }
 0x1f0   : > { %v3450_v53 = vpop.f32.mrf.mxu1 }
 0x1f1   : > { %v3451_v13 = vadd.f32 %v5506_v47, %v3450_v53  ;;  %v3585_v53 = vrot.slane %v3525_v34, 1 }
 0x1f3   : > { %v3615_v16 = vadd.f32 %v3568_v58, %v3451_v13  ;;  %v3836_v58 = vld [vmem:[%s4235_s16 + $0x5c] sm:$0x1] }
 0x1f5   : > { %v3631_v14 = vpack.c.bf16 %v3615_v16, %v3615_v16  ;;  %v3586_v16 = vsel %vm2354_vm1, %v3584_v41, %v3585_v53 }
 0x1f7   : > { %3648 = vst.msk [vmem:[%s5533_s23 + $0x14] sm:$0xf] %vm3642_vm4, %v3631_v14  ;;  %v3526_v14 = vunpack.c.l.bf16 %v3836_v58 }
 0x1f9   : > { %v3587_v1 = vrot.slane %v3526_v14, 1 }
 0x1fb   : > { %v3588_v63 = vsel %vm2354_vm1, %v3585_v53, %v3587_v1 }
 0x206   : > { %v3453_v27 = vpop.f32.mrf.mxu1 }
 0x207   : > { %v3454_v32 = vadd.f32 %v5506_v47, %v3453_v27 }
 0x209   : > { %v3616_v57 = vadd.f32 %v3571_v37, %v3454_v32  ;;  %v3957_v32 = vld [vmem:[%s4235_s16 + $0x60] sm:$0xff]  }
 0x20a   : > { %v3939_v21 = vunpack.c.h.bf16 %v3957_v32 }
 0x20b   : > { %v3632_v3 = vpack.c.bf16 %v3616_v57, %v3616_v57  ;;  %v3938_v57 = vunpack.c.l.bf16 %v3957_v32 }
 0x20d   : > { %3649 = vst.msk [vmem:[%s5533_s23 + $0x18] sm:$0xf] %vm3642_vm4, %v3632_v3  ;;  %v3589_v3 = vrot.slane %v3938_v57, 1 }
 0x20e   : > { %v3455_v35 = vpop.f32.mrf.mxu1 }
 0x20f   : > { %v3456_v38 = vadd.f32 %v5506_v47, %v3455_v35  ;;  %v3590_v35 = vrot.slane %v3939_v21, 1 }
 0x211   : > { %v3617_v46 = vadd.f32 %v3573_v26, %v3456_v38  ;;  %v3839_v26 = vld [vmem:[%s4235_s16 + $0x68] sm:$0x1] }
 0x212   : > { %v3529_v22 = vunpack.c.l.bf16 %v3839_v26 }
 0x213   : > { %v3633_v62 = vpack.c.bf16 %v3617_v46, %v3617_v46  ;;  %v3591_v46 = vsel %vm2354_vm1, %v3589_v3, %v3590_v35 }
 0x214   : > { %v3592_v59 = vrot.slane %v3529_v22, 1 }
 0x215   : > { %3650 = vst.msk [vmem:[%s5533_s23 + $0x1c] sm:$0xf] %vm3642_vm4, %v3633_v62 }
 0x216   : > { %v3593_v28 = vsel %vm2354_vm1, %v3590_v35, %v3592_v59 }
 0x21e   : > { %v3458_v17 = vpop.f32.mrf.mxu1 }
 0x21f   : > { %v3459_v30 = vadd.f32 %v5506_v47, %v3458_v17 }
 0x221   : > { %v3618_v33 = vadd.f32 %v3576_v5, %v3459_v30 }
 0x223   : > { %v3634_v8 = vpack.c.bf16 %v3618_v33, %v3618_v33 }
 0x225   : > { %3651 = vst.msk [vmem:[%s5533_s23 + $0x20] sm:$0xf] %vm3642_vm4, %v3634_v8 }
 0x226   : > { %v3460_v6 = vpop.f32.mrf.mxu1 }
 0x227   : > { %v3461_v52 = vadd.f32 %v5506_v47, %v3460_v6 }
 0x229   : > { %v3619_v50 = vadd.f32 %v3578_v18, %v3461_v52 }
 0x22b   : > { %v3635_v10 = vpack.c.bf16 %v3619_v50, %v3619_v50 }
 0x22d   : > { %3652 = vst.msk [vmem:[%s5533_s23 + $0x24] sm:$0xf] %vm3642_vm4, %v3635_v10 }
 0x23b   : > { %v3463_v29 = vpop.f32.mrf.mxu3 }
 0x23c   : > { %v3464_v56 = vadd.f32 %v5506_v47, %v3463_v29 }
 0x23e   : > { %v3620_v51 = vadd.f32 %v3581_v31, %v3464_v56 }
 0x240   : > { %v3636_v19 = vpack.c.bf16 %v3620_v51, %v3620_v51 }
 0x242   : > { %3653 = vst.msk [vmem:[%s5533_s23 + $0x28] sm:$0xf] %vm3642_vm4, %v3636_v19 }
 0x243   : > { %v3465_v11 = vpop.f32.mrf.mxu3 }
 0x244   : > { %v3466_v55 = vadd.f32 %v5506_v47, %v3465_v11 }
 0x246   : > { %v3621_v15 = vadd.f32 %v3583_v20, %v3466_v55 }
 0x248   : > { %v3637_v42 = vpack.c.bf16 %v3621_v15, %v3621_v15 }
 0x24a   : > { %3654 = vst.msk [vmem:[%s5533_s23 + $0x2c] sm:$0xf] %vm3642_vm4, %v3637_v42 }
 0x252   : > { %v3468_v13 = vpop.f32.mrf.mxu3 }
 0x253   : > { %v3469_v4 = vadd.f32 %v5506_v47, %v3468_v13 }
 0x255   : > { %v3622_v40 = vadd.f32 %v3586_v16, %v3469_v4 }
 0x257   : > { %v3638_v60 = vpack.c.bf16 %v3622_v40, %v3622_v40 }
 0x259   : > { %3655 = vst.msk [vmem:[%s5533_s23 + $0x30] sm:$0xf] %vm3642_vm4, %v3638_v60 }
 0x25a   : > { %v3470_v9 = vpop.f32.mrf.mxu3 }
 0x25b   : > { %v3471_v27 = vadd.f32 %v5506_v47, %v3470_v9 }
 0x25d   : > { %v3623_v37 = vadd.f32 %v3588_v63, %v3471_v27 }
 0x25f   : > { %v3639_v44 = vpack.c.bf16 %v3623_v37, %v3623_v37 }
 0x261   : > { %3656 = vst.msk [vmem:[%s5533_s23 + $0x34] sm:$0xf] %vm3642_vm4, %v3639_v44 }
 0x26a   : > { %v3473_v38 = vpop.f32.mrf.mxu3 }
 0x26b   : > { %v3474_v62 = vadd.f32 %v5506_v47, %v3473_v38 }
 0x26d   : > { %v3624_v49 = vadd.f32 %v3591_v46, %v3474_v62 }
 0x26f   : > { %v3640_v0 = vpack.c.bf16 %v3624_v49, %v3624_v49 }
 0x271   : > { %3657 = vst.msk [vmem:[%s5533_s23 + $0x38] sm:$0xf] %vm3642_vm4, %v3640_v0 }
 0x272   : > { %v3475_v23 = vpop.f32.mrf.mxu3 }
 0x273   : > { %v3476_v17 = vadd.f32 %v5506_v47, %v3475_v23 }
 0x275   : > { %v3625_v5 = vadd.f32 %v3593_v28, %v3476_v17 }
 0x277   : > { %v3641_v61 = vpack.c.bf16 %v3625_v5, %v3625_v5 }
 0x279   : > { %3658 = vst.msk [vmem:[%s5533_s23 + $0x3c] sm:$0xf] %vm3642_vm4, %v3641_v61 }
 0x27a PF: > { %s17_s28 = sadd.s32 1, %s4128_s28   ;;  %s5658_s24 = smov %s4120_s26 }
 0x27b   : > { %p14_p7 = scmp.ge.s32.totalorder %s17_s28, 6   ;;  %s5659_s25 = smov %s4124_s27 }
 0x27c   : > { %s5660_s26 = smov %s5663_s29  ;;  %s5661_s27 = smov %s5667_s30 }
 0x27d   :  { %16 = sbr.rel (!%p14_p7) target bundleno = 3 (0x3), region = 96 }

</bundles_post_ra>
